<compile_context>
chip_gen: v7x
topology: tpu7x:2x2x1
jax: 0.10.0
libtpu: 0.0.40
codegen_flags: <defaults>
</compile_context>

<pallas_src>
import functools

import jax
import jax.numpy as jnp
from jax.experimental import pallas as pl
from jax.experimental.pallas import tpu as pltpu

EPS = 1e-5            # PyTorch BatchNorm2d default eps
LANE = 128            # TPU lane width; channel dims are zero-padded to a multiple of this
MAX_TILE_ROWS = 256   # rows per grid step (256-1024 is the sweet spot; keeps VMEM small on v7x)
MATMUL_DTYPE = jnp.float32  # set to jnp.bfloat16 on v6e/v7x for 2x MXU + half the HBM traffic


# ----------------------------- Pallas kernels ------------------------------
def _conv_bias_kernel(x_ref, w_ref, b_ref, o_ref):
    """o = x @ w + b on one (tile_m, Kc) x (Kc, Coutp) block."""
    o_ref[...] = jnp.dot(x_ref[...].astype(w_ref.dtype), w_ref[...],
                         preferred_element_type=jnp.float32) + b_ref[...]


def _conv_bias_stats_kernel(x_ref, w_ref, b_ref, o_ref, stats_ref):
    """Conv matmul + bias; epilogue emits per-tile BN partial stats (sum, sum-of-squares)."""
    y = jnp.dot(x_ref[...].astype(w_ref.dtype), w_ref[...],
                preferred_element_type=jnp.float32) + b_ref[...]
    o_ref[...] = y
    s = jnp.sum(y, axis=0, keepdims=True)        # XLU reduce -> free filler next to the MXU
    ss = jnp.sum(y * y, axis=0, keepdims=True)
    stats_ref[...] = jnp.concatenate([s, ss], axis=0).reshape(stats_ref.shape)


def _affine_relu_conv_bias_stats_kernel(x_ref, sc_ref, sh_ref, w_ref, b_ref, o_ref, stats_ref):
    """Fuses the previous layer's BN affine + ReLU on the input side of the conv matmul."""
    a = jnp.maximum(x_ref[...].astype(jnp.float32) * sc_ref[...] + sh_ref[...], 0.0)
    y = jnp.dot(a.astype(w_ref.dtype), w_ref[...],
                preferred_element_type=jnp.float32) + b_ref[...]
    o_ref[...] = y
    s = jnp.sum(y, axis=0, keepdims=True)
    ss = jnp.sum(y * y, axis=0, keepdims=True)
    stats_ref[...] = jnp.concatenate([s, ss], axis=0).reshape(stats_ref.shape)


def _affine_relu_kernel(x_ref, sc_ref, sh_ref, o_ref):
    """o = relu(x * scale + shift)  (BN affine with precomputed global stats)."""
    o_ref[...] = jnp.maximum(x_ref[...] * sc_ref[...] + sh_ref[...], 0.0)


def _affine_add_relu_kernel(x_ref, skip_ref, sc_ref, sh_ref, o_ref):
    """o = relu(x * scale + shift + skip)  (BN3 + residual add + ReLU, fused)."""
    o_ref[...] = jnp.maximum(x_ref[...] * sc_ref[...] + sh_ref[...] + skip_ref[...], 0.0)


# ------------------------------ small helpers --------------------------------
def _round_up(c, m=LANE):
    return ((c + m - 1) // m) * m


def _pad_axis(a, axis, size):
    if a.shape[axis] == size:
        return a
    widths = [(0, 0)] * a.ndim
    widths[axis] = (0, size - a.shape[axis])
    return jnp.pad(a, widths)


def _pick_tile(m, cap=MAX_TILE_ROWS):
    """Largest divisor of m that is <= cap and a multiple of 8 (or m itself if small)."""
    if m <= cap:
        return m
    t = (cap // 8) * 8
    while t >= 8:
        if m % t == 0:
            return t
        t -= 8
    return m


# ------------------------------ op wrappers ---------------------------------
def conv_matmul(patches, w_mat, bias, *, with_stats, in_affine=None):
    """Tiled (M, Kc) @ (Kc, Coutp) + bias with a parallel grid over M.

    Optionally fuses a per-input-channel affine + ReLU (previous BN) and emits
    per-tile BatchNorm partial statistics so the global BN reduction never
    re-reads the activation from HBM.
    """
    M, Kc = patches.shape
    Coutp = w_mat.shape[1]
    tm = _pick_tile(M)
    gm = M // tm

    operands = [patches.astype(MATMUL_DTYPE)]
    in_specs = [pl.BlockSpec((tm, Kc), lambda i: (i, 0))]
    if in_affine is not None:
        sc, sh = in_affine
        operands += [sc, sh]
        in_specs += [pl.BlockSpec((1, Kc), lambda i: (0, 0)),
                     pl.BlockSpec((1, Kc), lambda i: (0, 0))]
    operands += [w_mat.astype(MATMUL_DTYPE), bias]
    in_specs += [pl.BlockSpec((Kc, Coutp), lambda i: (0, 0)),
                 pl.BlockSpec((1, Coutp), lambda i: (0, 0))]

    cost = pl.CostEstimate(
        flops=2 * M * Kc * Coutp,
        transcendentals=0,
        bytes_accessed=4 * (M * Kc + Kc * Coutp + M * Coutp),
    )
    cparams = pltpu.CompilerParams(dimension_semantics=("parallel",))

    if with_stats:
        kernel = (_affine_relu_conv_bias_stats_kernel if in_affine is not None
                  else _conv_bias_stats_kernel)
        out, stats = pl.pallas_call(
            kernel,
            grid=(gm,),
            in_specs=in_specs,
            out_specs=(pl.BlockSpec((tm, Coutp), lambda i: (i, 0)),
                       pl.BlockSpec((1, 2, Coutp), lambda i: (i, 0, 0))),
            out_shape=(jax.ShapeDtypeStruct((M, Coutp), jnp.float32),
                       jax.ShapeDtypeStruct((gm, 2, Coutp), jnp.float32)),
            compiler_params=cparams,
            cost_estimate=cost,
        )(*operands)
        return out, stats

    out = pl.pallas_call(
        _conv_bias_kernel,
        grid=(gm,),
        in_specs=in_specs,
        out_specs=pl.BlockSpec((tm, Coutp), lambda i: (i, 0)),
        out_shape=jax.ShapeDtypeStruct((M, Coutp), jnp.float32),
        compiler_params=cparams,
        cost_estimate=cost,
    )(*operands)
    return out


def affine_relu(x2d, scale, shift):
    M, Cp = x2d.shape
    tm = _pick_tile(M)
    return pl.pallas_call(
        _affine_relu_kernel,
        grid=(M // tm,),
        in_specs=[pl.BlockSpec((tm, Cp), lambda i: (i, 0)),
                  pl.BlockSpec((1, Cp), lambda i: (0, 0)),
                  pl.BlockSpec((1, Cp), lambda i: (0, 0))],
        out_specs=pl.BlockSpec((tm, Cp), lambda i: (i, 0)),
        out_shape=jax.ShapeDtypeStruct((M, Cp), jnp.float32),
        compiler_params=pltpu.CompilerParams(dimension_semantics=("parallel",)),
    )(x2d, scale, shift)


def affine_add_relu(x2d, skip2d, scale, shift):
    M, Cp = x2d.shape
    tm = _pick_tile(M)
    return pl.pallas_call(
        _affine_add_relu_kernel,
        grid=(M // tm,),
        in_specs=[pl.BlockSpec((tm, Cp), lambda i: (i, 0)),
                  pl.BlockSpec((tm, Cp), lambda i: (i, 0)),
                  pl.BlockSpec((1, Cp), lambda i: (0, 0)),
                  pl.BlockSpec((1, Cp), lambda i: (0, 0))],
        out_specs=pl.BlockSpec((tm, Cp), lambda i: (i, 0)),
        out_shape=jax.ShapeDtypeStruct((M, Cp), jnp.float32),
        compiler_params=pltpu.CompilerParams(dimension_semantics=("parallel",)),
    )(x2d, skip2d, scale, shift)


def _bn_scale_shift(stats, m_rows, gamma_p, beta_p):
    """Reduce per-tile partial (sum, sumsq) -> per-channel affine scale/shift (train-mode BN)."""
    s = jnp.sum(stats[:, 0, :], axis=0)
    ss = jnp.sum(stats[:, 1, :], axis=0)
    mean = s / m_rows
    var = jnp.maximum(ss / m_rows - mean * mean, 0.0)   # biased variance (train mode)
    scale = gamma_p * jax.lax.rsqrt(var + EPS)
    shift = beta_p - mean * scale
    return scale.reshape(1, -1), shift.reshape(1, -1)


def _prep_1x1(w, b, cin_p, cout_p):
    wm = _pad_axis(_pad_axis(w[:, :, 0, 0].T.astype(jnp.float32), 0, cin_p), 1, cout_p)
    bm = _pad_axis(b.astype(jnp.float32), 0, cout_p).reshape(1, cout_p)
    return wm, bm


def _prep_3x3(w, b, cin_p, cout_p):
    wt = jnp.transpose(w, (2, 3, 1, 0)).astype(jnp.float32)       # (3,3,Cin,Cout)
    wt = _pad_axis(_pad_axis(wt, 2, cin_p), 3, cout_p)
    wm = wt.reshape(9 * cin_p, cout_p)                            # rows = (ky*3+kx)*Cin_p + ci
    bm = _pad_axis(b.astype(jnp.float32), 0, cout_p).reshape(1, cout_p)
    return wm, bm


def _im2col_3x3(a, stride):
    """Glue (data movement only): 9 shifted/strided views of the spatially padded activation,
    concatenated along channels, so the 3x3 conv is ONE deep matmul in the kernel."""
    # TODO(synk): for very large shapes, gather taps in-kernel (memory_space=pl.ANY + manual
    # DMA with halos) instead of materializing the 9x patch matrix in HBM.
    n, h, w, c = a.shape
    ap = jnp.pad(a, ((0, 0), (1, 1), (1, 1), (0, 0)))
    ho = (h + 2 - 3) // stride + 1
    wo = (w + 2 - 3) // stride + 1
    cols = []
    for ky in range(3):
        for kx in range(3):
            v = jax.lax.slice(
                ap, (0, ky, kx, 0),
                (n, ky + stride * (ho - 1) + 1, kx + stride * (wo - 1) + 1, c),
                (1, stride, stride, 1))
            cols.append(v.reshape(n * ho * wo, c))
    return jnp.concatenate(cols, axis=1), ho, wo


# ------------------------------ Residual block -------------------------------
def init_residual_params(key, in_channels, out_channels1, out_channels2, use_1x1conv):
    """Init mirroring PyTorch defaults (uniform +-1/sqrt(fan_in), bn gamma=1 / beta=0)."""
    def conv_init(k, cout, cin, ks):
        fan_in = cin * ks * ks
        bound = 1.0 / jnp.sqrt(jnp.float32(fan_in))
        kw_, kb_ = jax.random.split(k)
        w = jax.random.uniform(kw_, (cout, cin, ks, ks), jnp.float32, -bound, bound)
        b = jax.random.uniform(kb_, (cout,), jnp.float32, -bound, bound)
        return w, b

    keys = jax.random.split(key, 4)
    p = {}
    p["w1"], p["b1"] = conv_init(keys[0], out_channels1, in_channels, 1)
    p["w2"], p["b2"] = conv_init(keys[1], out_channels1, out_channels1, 3)
    p["w3"], p["b3"] = conv_init(keys[2], out_channels2, out_channels1, 1)
    if use_1x1conv:
        p["w4"], p["b4"] = conv_init(keys[3], out_channels2, in_channels, 1)
    p["g1"], p["be1"] = jnp.ones((out_channels1,)), jnp.zeros((out_channels1,))
    p["g2"], p["be2"] = jnp.ones((out_channels1,)), jnp.zeros((out_channels1,))
    p["g3"], p["be3"] = jnp.ones((out_channels2,)), jnp.zeros((out_channels2,))
    return p


@functools.partial(jax.jit, static_argnames=("use_1x1conv", "stride"))
def residual_forward(params, x_nchw, *, use_1x1conv=False, stride=1):
    x = jnp.transpose(x_nchw, (0, 2, 3, 1)).astype(jnp.float32)   # NCHW -> NHWC
    n, h, w, cin = x.shape
    c1 = params["w1"].shape[0]
    c2 = params["w3"].shape[0]
    cin_p, c1_p, c2_p = _round_up(cin), _round_up(c1), _round_up(c2)

    g1 = _pad_axis(params["g1"], 0, c1_p); be1 = _pad_axis(params["be1"], 0, c1_p)
    g2 = _pad_axis(params["g2"], 0, c1_p); be2 = _pad_axis(params["be2"], 0, c1_p)
    g3 = _pad_axis(params["g3"], 0, c2_p); be3 = _pad_axis(params["be3"], 0, c2_p)

    x_p = _pad_axis(x, 3, cin_p)                                   # lane-dense channels
    m1 = n * h * w

    # conv1 (1x1) with BN1 partial stats in the kernel epilogue
    w1m, b1m = _prep_1x1(params["w1"], params["b1"], cin_p, c1_p)
    y1, st1 = conv_matmul(x_p.reshape(m1, cin_p), w1m, b1m, with_stats=True)
    sc1, sh1 = _bn_scale_shift(st1, m1, g1, be1)

    # BN1 affine + ReLU (separate pass: conv2's spatial zero-padding must see the
    # post-activation tensor, so this cannot be folded into the conv2 taps)
    a1 = affine_relu(y1, sc1, sh1).reshape(n, h, w, c1_p)

    # conv2 (3x3, stride, pad=1) as ONE (tile_m, 9*C1p) x (9*C1p, C1p) matmul + BN2 stats
    patches, ho, wo = _im2col_3x3(a1, stride)
    m2 = n * ho * wo
    w2m, b2m = _prep_3x3(params["w2"], params["b2"], c1_p, c1_p)
    y2, st2 = conv_matmul(patches, w2m, b2m, with_stats=True)
    sc2, sh2 = _bn_scale_shift(st2, m2, g2, be2)

    # conv3 (1x1) with BN2-affine + ReLU fused on the input side, + BN3 stats
    w3m, b3m = _prep_1x1(params["w3"], params["b3"], c1_p, c2_p)
    y3, st3 = conv_matmul(y2, w3m, b3m, with_stats=True, in_affine=(sc2, sh2))
    sc3, sh3 = _bn_scale_shift(st3, m2, g3, be3)

    # skip path
    if use_1x1conv:
        xs = x_p if stride == 1 else x_p[:, ::stride, ::stride, :]
        w4m, b4m = _prep_1x1(params["w4"], params["b4"], cin_p, c2_p)
        skip = conv_matmul(xs.reshape(m2, cin_p), w4m, b4m, with_stats=False)
    else:
        # identity skip (requires cin == c2 and stride == 1, as in the PyTorch module)
        skip = x_p.reshape(m1, cin_p)

    out = affine_add_relu(y3, skip, sc3, sh3)                      # BN3 + residual + ReLU
    out = out.reshape(n, ho, wo, c2_p)[:, :, :, :c2]
    return jnp.transpose(out, (0, 3, 1, 2))                        # back to NCHW


# ------------------------------ pure-JAX reference ---------------------------
def _ref_conv(x, w, b, stride, padding):
    return jax.lax.conv_general_dilated(
        x,
        jnp.transpose(w, (2, 3, 1, 0)),
        window_strides=(stride, stride),
        padding=((padding, padding), (padding, padding)),
        dimension_numbers=("NHWC", "HWIO", "NHWC"),
        precision=jax.lax.Precision.HIGHEST,
    ) + b.reshape(1, 1, 1, -1)


def _ref_bn(x, g, be):
    mean = jnp.mean(x, axis=(0, 1, 2), keepdims=True)
    var = jnp.mean((x - mean) ** 2, axis=(0, 1, 2), keepdims=True)
    return (x - mean) * jax.lax.rsqrt(var + EPS) * g.reshape(1, 1, 1, -1) + be.reshape(1, 1, 1, -1)


def residual_reference(params, x_nchw, *, use_1x1conv=False, stride=1):
    x = jnp.transpose(x_nchw, (0, 2, 3, 1)).astype(jnp.float32)
    y = jax.nn.relu(_ref_bn(_ref_conv(x, params["w1"], params["b1"], 1, 0), params["g1"], params["be1"]))
    y = jax.nn.relu(_ref_bn(_ref_conv(y, params["w2"], params["b2"], stride, 1), params["g2"], params["be2"]))
    y = _ref_bn(_ref_conv(y, params["w3"], params["b3"], 1, 0), params["g3"], params["be3"])
    skip = _ref_conv(x, params["w4"], params["b4"], stride, 0) if use_1x1conv else x
    return jnp.transpose(jax.nn.relu(y + skip), (0, 3, 1, 2))


# ------------------------------------ main -----------------------------------
if __name__ == "__main__":
    key = jax.random.PRNGKey(0)
    kx, kp1, kp2 = jax.random.split(key, 3)
    x = jax.random.normal(kx, (2, 4, 16, 16), jnp.float32)  # NCHW, PyTorch convention

    # Config 1: identity skip (use_1x1conv=False, stride=1, out_channels2 == in_channels)
    p1 = init_residual_params(kp1, 4, 8, 4, use_1x1conv=False)
    out1 = residual_forward(p1, x, use_1x1conv=False, stride=1)
    jax.block_until_ready(out1)
    ref1 = residual_reference(p1, x, use_1x1conv=False, stride=1)
    assert out1.shape == (2, 4, 16, 16)
    assert float(jnp.max(jnp.abs(out1 - ref1))) < 1e-2

    # Config 2: projection skip + downsample (use_1x1conv=True, stride=2)
    p2 = init_residual_params(kp2, 4, 8, 16, use_1x1conv=True)
    out2 = residual_forward(p2, x, use_1x1conv=True, stride=2)
    jax.block_until_ready(out2)
    ref2 = residual_reference(p2, x, use_1x1conv=True, stride=2)
    assert out2.shape == (2, 16, 8, 8)
    assert float(jnp.max(jnp.abs(out2 - ref2))) < 1e-2

    print("KERNEL_OK")
</pallas_src>

<mosaic_0001>
module attributes {stable_mosaic.version = 11 : i64} {
  func.func @_conv_bias_stats_kernel(%arg0: i32, %arg1: memref<256x128xf32, #tpu.memory_space<vmem>>, %arg2: memref<128x128xf32, #tpu.memory_space<vmem>>, %arg3: memref<1x128xf32, #tpu.memory_space<vmem>>, %arg4: memref<256x128xf32, #tpu.memory_space<vmem>>, %arg5: memref<1x2x128xf32, #tpu.memory_space<vmem>>) attributes {dimension_semantics = [#tpu.dimension_semantics<parallel>], iteration_bounds = array<i64: 2>, scalar_prefetch = 0 : i64, scratch_operands = 0 : i64, tpu.core_type = #tpu.core_type<tc>, window_params = [{transform_indices = @transform_0, window_bounds = array<i64: 256, 128>}, {pipeline_mode = #tpu.pipeline_mode<synchronous>, transform_indices = @transform_1, window_bounds = array<i64: 128, 128>}, {pipeline_mode = #tpu.pipeline_mode<synchronous>, transform_indices = @transform_2, window_bounds = array<i64: 1, 128>}, {transform_indices = @transform_3, window_bounds = array<i64: 256, 128>}, {transform_indices = @transform_4, window_bounds = array<i64: 1, 2, 128>}]} {
    %c0 = arith.constant 0 : index
    %c0_0 = arith.constant 0 : index
    %0 = vector.load %arg1[%c0, %c0_0] : memref<256x128xf32, #tpu.memory_space<vmem>>, vector<256x128xf32>
    %c0_1 = arith.constant 0 : index
    %c0_2 = arith.constant 0 : index
    %1 = vector.load %arg2[%c0_1, %c0_2] : memref<128x128xf32, #tpu.memory_space<vmem>>, vector<128x128xf32>
    %cst = arith.constant dense<0.000000e+00> : vector<256x128xf32>
    %2 = tpu.matmul %0, %1, %cst {dimension_numbers = #tpu.dot_dimension_numbers<[1], [0], [0], [1], [0, 0, 1, 1], [], []>} : vector<256x128xf32>, vector<128x128xf32>, vector<256x128xf32> -> vector<256x128xf32>
    %c0_3 = arith.constant 0 : index
    %c0_4 = arith.constant 0 : index
    %3 = vector.load %arg3[%c0_3, %c0_4] : memref<1x128xf32, #tpu.memory_space<vmem>>, vector<1x128xf32>
    %4 = vector.broadcast %3 : vector<1x128xf32> to vector<256x128xf32>
    %5 = arith.addf %2, %4 : vector<256x128xf32>
    %c0_5 = arith.constant 0 : index
    %c0_6 = arith.constant 0 : index
    %6 = vector.load %arg4[%c0_5, %c0_6] : memref<256x128xf32, #tpu.memory_space<vmem>>, vector<256x128xf32>
    tpu.vector_store %arg4[%c0_5, %c0_6], %5 {strides = array<i32>} : memref<256x128xf32, #tpu.memory_space<vmem>>, vector<256x128xf32>,
    %cst_7 = arith.constant dense<0.000000e+00> : vector<128xf32>
    %7 = vector.multi_reduction <add>, %5, %cst_7 [0] : vector<256x128xf32> to vector<128xf32>
    %8 = vector.shape_cast %7 : vector<128xf32> to vector<1x128xf32>
    %9 = arith.mulf %5, %5 : vector<256x128xf32>
    %cst_8 = arith.constant dense<0.000000e+00> : vector<128xf32>
    %10 = vector.multi_reduction <add>, %9, %cst_8 [0] : vector<256x128xf32> to vector<128xf32>
    %11 = vector.shape_cast %10 : vector<128xf32> to vector<1x128xf32>
    %12 = tpu.concatenate %8, %11 in 0 : vector<1x128xf32>, vector<1x128xf32> -> vector<2x128xf32>
    %13 = vector.shape_cast %12 : vector<2x128xf32> to vector<1x2x128xf32>
    %c0_9 = arith.constant 0 : index
    %c0_10 = arith.constant 0 : index
    %c0_11 = arith.constant 0 : index
    %14 = vector.load %arg5[%c0_9, %c0_10, %c0_11] : memref<1x2x128xf32, #tpu.memory_space<vmem>>, vector<1x2x128xf32>
    tpu.vector_store %arg5[%c0_9, %c0_10, %c0_11], %13 {strides = array<i32>} : memref<1x2x128xf32, #tpu.memory_space<vmem>>, vector<1x2x128xf32>,
    return
  }
  func.func @transform_0(%arg0: i32) -> (i32, i32) {
    %c0_i32 = arith.constant 0 : i32
    %c0_i32_0 = arith.constant 0 : i32
    return %arg0, %c0_i32 : i32, i32
  }
  func.func @transform_1(%arg0: i32) -> (i32, i32) {
    %c0_i32 = arith.constant 0 : i32
    %c0_i32_0 = arith.constant 0 : i32
    %c0_i32_1 = arith.constant 0 : i32
    return %c0_i32, %c0_i32_0 : i32, i32
  }
  func.func @transform_2(%arg0: i32) -> (i32, i32) {
    %c0_i32 = arith.constant 0 : i32
    %c0_i32_0 = arith.constant 0 : i32
    %c0_i32_1 = arith.constant 0 : i32
    return %c0_i32, %c0_i32_0 : i32, i32
  }
  func.func @transform_3(%arg0: i32) -> (i32, i32) {
    %c0_i32 = arith.constant 0 : i32
    %c0_i32_0 = arith.constant 0 : i32
    return %arg0, %c0_i32 : i32, i32
  }
  func.func @transform_4(%arg0: i32) -> (i32, i32, i32) {
    %c0_i32 = arith.constant 0 : i32
    %c0_i32_0 = arith.constant 0 : i32
    %c0_i32_1 = arith.constant 0 : i32
    return %arg0, %c0_i32, %c0_i32_0 : i32, i32, i32
  }
}

module attributes {stable_mosaic.version = 11 : i64} {
  func.func @_affine_relu_kernel(%arg0: i32, %arg1: memref<256x128xf32, #tpu.memory_space<vmem>>, %arg2: memref<1x128xf32, #tpu.memory_space<vmem>>, %arg3: memref<1x128xf32, #tpu.memory_space<vmem>>, %arg4: memref<256x128xf32, #tpu.memory_space<vmem>>) attributes {dimension_semantics = [#tpu.dimension_semantics<parallel>], iteration_bounds = array<i64: 2>, scalar_prefetch = 0 : i64, scratch_operands = 0 : i64, tpu.core_type = #tpu.core_type<tc>, window_params = [{transform_indices = @transform_0, window_bounds = array<i64: 256, 128>}, {pipeline_mode = #tpu.pipeline_mode<synchronous>, transform_indices = @transform_1, window_bounds = array<i64: 1, 128>}, {pipeline_mode = #tpu.pipeline_mode<synchronous>, transform_indices = @transform_2, window_bounds = array<i64: 1, 128>}, {transform_indices = @transform_3, window_bounds = array<i64: 256, 128>}]} {
    %c0 = arith.constant 0 : index
    %c0_0 = arith.constant 0 : index
    %0 = vector.load %arg1[%c0, %c0_0] : memref<256x128xf32, #tpu.memory_space<vmem>>, vector<256x128xf32>
    %c0_1 = arith.constant 0 : index
    %c0_2 = arith.constant 0 : index
    %1 = vector.load %arg2[%c0_1, %c0_2] : memref<1x128xf32, #tpu.memory_space<vmem>>, vector<1x128xf32>
    %2 = vector.broadcast %1 : vector<1x128xf32> to vector<256x128xf32>
    %3 = arith.mulf %0, %2 : vector<256x128xf32>
    %c0_3 = arith.constant 0 : index
    %c0_4 = arith.constant 0 : index
    %4 = vector.load %arg3[%c0_3, %c0_4] : memref<1x128xf32, #tpu.memory_space<vmem>>, vector<1x128xf32>
    %5 = vector.broadcast %4 : vector<1x128xf32> to vector<256x128xf32>
    %6 = arith.addf %3, %5 : vector<256x128xf32>
    %cst = arith.constant 0.000000e+00 : f32
    %7 = vector.broadcast %cst : f32 to vector<256x128xf32>
    %8 = arith.maximumf %6, %7 : vector<256x128xf32>
    %c0_5 = arith.constant 0 : index
    %c0_6 = arith.constant 0 : index
    %9 = vector.load %arg4[%c0_5, %c0_6] : memref<256x128xf32, #tpu.memory_space<vmem>>, vector<256x128xf32>
    tpu.vector_store %arg4[%c0_5, %c0_6], %8 {strides = array<i32>} : memref<256x128xf32, #tpu.memory_space<vmem>>, vector<256x128xf32>,
    return
  }
  func.func @transform_0(%arg0: i32) -> (i32, i32) {
    %c0_i32 = arith.constant 0 : i32
    %c0_i32_0 = arith.constant 0 : i32
    return %arg0, %c0_i32 : i32, i32
  }
  func.func @transform_1(%arg0: i32) -> (i32, i32) {
    %c0_i32 = arith.constant 0 : i32
    %c0_i32_0 = arith.constant 0 : i32
    %c0_i32_1 = arith.constant 0 : i32
    return %c0_i32, %c0_i32_0 : i32, i32
  }
  func.func @transform_2(%arg0: i32) -> (i32, i32) {
    %c0_i32 = arith.constant 0 : i32
    %c0_i32_0 = arith.constant 0 : i32
    %c0_i32_1 = arith.constant 0 : i32
    return %c0_i32, %c0_i32_0 : i32, i32
  }
  func.func @transform_3(%arg0: i32) -> (i32, i32) {
    %c0_i32 = arith.constant 0 : i32
    %c0_i32_0 = arith.constant 0 : i32
    return %arg0, %c0_i32 : i32, i32
  }
}

module attributes {stable_mosaic.version = 11 : i64} {
  func.func @_affine_relu_conv_bias_stats_kernel(%arg0: i32, %arg1: memref<256x128xf32, #tpu.memory_space<vmem>>, %arg2: memref<1x128xf32, #tpu.memory_space<vmem>>, %arg3: memref<1x128xf32, #tpu.memory_space<vmem>>, %arg4: memref<128x128xf32, #tpu.memory_space<vmem>>, %arg5: memref<1x128xf32, #tpu.memory_space<vmem>>, %arg6: memref<256x128xf32, #tpu.memory_space<vmem>>, %arg7: memref<1x2x128xf32, #tpu.memory_space<vmem>>) attributes {dimension_semantics = [#tpu.dimension_semantics<parallel>], iteration_bounds = array<i64: 2>, scalar_prefetch = 0 : i64, scratch_operands = 0 : i64, tpu.core_type = #tpu.core_type<tc>, window_params = [{transform_indices = @transform_0, window_bounds = array<i64: 256, 128>}, {pipeline_mode = #tpu.pipeline_mode<synchronous>, transform_indices = @transform_1, window_bounds = array<i64: 1, 128>}, {pipeline_mode = #tpu.pipeline_mode<synchronous>, transform_indices = @transform_2, window_bounds = array<i64: 1, 128>}, {pipeline_mode = #tpu.pipeline_mode<synchronous>, transform_indices = @transform_3, window_bounds = array<i64: 128, 128>}, {pipeline_mode = #tpu.pipeline_mode<synchronous>, transform_indices = @transform_4, window_bounds = array<i64: 1, 128>}, {transform_indices = @transform_5, window_bounds = array<i64: 256, 128>}, {transform_indices = @transform_6, window_bounds = array<i64: 1, 2, 128>}]} {
    %c0 = arith.constant 0 : index
    %c0_0 = arith.constant 0 : index
    %0 = vector.load %arg1[%c0, %c0_0] : memref<256x128xf32, #tpu.memory_space<vmem>>, vector<256x128xf32>
    %c0_1 = arith.constant 0 : index
    %c0_2 = arith.constant 0 : index
    %1 = vector.load %arg2[%c0_1, %c0_2] : memref<1x128xf32, #tpu.memory_space<vmem>>, vector<1x128xf32>
    %2 = vector.broadcast %1 : vector<1x128xf32> to vector<256x128xf32>
    %3 = arith.mulf %0, %2 : vector<256x128xf32>
    %c0_3 = arith.constant 0 : index
    %c0_4 = arith.constant 0 : index
    %4 = vector.load %arg3[%c0_3, %c0_4] : memref<1x128xf32, #tpu.memory_space<vmem>>, vector<1x128xf32>
    %5 = vector.broadcast %4 : vector<1x128xf32> to vector<256x128xf32>
    %6 = arith.addf %3, %5 : vector<256x128xf32>
    %cst = arith.constant 0.000000e+00 : f32
    %7 = vector.broadcast %cst : f32 to vector<256x128xf32>
    %8 = arith.maximumf %6, %7 : vector<256x128xf32>
    %c0_5 = arith.constant 0 : index
    %c0_6 = arith.constant 0 : index
    %9 = vector.load %arg4[%c0_5, %c0_6] : memref<128x128xf32, #tpu.memory_space<vmem>>, vector<128x128xf32>
    %cst_7 = arith.constant dense<0.000000e+00> : vector<256x128xf32>
    %10 = tpu.matmul %8, %9, %cst_7 {dimension_numbers = #tpu.dot_dimension_numbers<[1], [0], [0], [1], [0, 0, 1, 1], [], []>} : vector<256x128xf32>, vector<128x128xf32>, vector<256x128xf32> -> vector<256x128xf32>
    %c0_8 = arith.constant 0 : index
    %c0_9 = arith.constant 0 : index
    %11 = vector.load %arg5[%c0_8, %c0_9] : memref<1x128xf32, #tpu.memory_space<vmem>>, vector<1x128xf32>
    %12 = vector.broadcast %11 : vector<1x128xf32> to vector<256x128xf32>
    %13 = arith.addf %10, %12 : vector<256x128xf32>
    %c0_10 = arith.constant 0 : index
    %c0_11 = arith.constant 0 : index
    %14 = vector.load %arg6[%c0_10, %c0_11] : memref<256x128xf32, #tpu.memory_space<vmem>>, vector<256x128xf32>
    tpu.vector_store %arg6[%c0_10, %c0_11], %13 {strides = array<i32>} : memref<256x128xf32, #tpu.memory_space<vmem>>, vector<256x128xf32>,
    %cst_12 = arith.constant dense<0.000000e+00> : vector<128xf32>
    %15 = vector.multi_reduction <add>, %13, %cst_12 [0] : vector<256x128xf32> to vector<128xf32>
    %16 = vector.shape_cast %15 : vector<128xf32> to vector<1x128xf32>
    %17 = arith.mulf %13, %13 : vector<256x128xf32>
    %cst_13 = arith.constant dense<0.000000e+00> : vector<128xf32>
    %18 = vector.multi_reduction <add>, %17, %cst_13 [0] : vector<256x128xf32> to vector<128xf32>
    %19 = vector.shape_cast %18 : vector<128xf32> to vector<1x128xf32>
    %20 = tpu.concatenate %16, %19 in 0 : vector<1x128xf32>, vector<1x128xf32> -> vector<2x128xf32>
    %21 = vector.shape_cast %20 : vector<2x128xf32> to vector<1x2x128xf32>
    %c0_14 = arith.constant 0 : index
    %c0_15 = arith.constant 0 : index
    %c0_16 = arith.constant 0 : index
    %22 = vector.load %arg7[%c0_14, %c0_15, %c0_16] : memref<1x2x128xf32, #tpu.memory_space<vmem>>, vector<1x2x128xf32>
    tpu.vector_store %arg7[%c0_14, %c0_15, %c0_16], %21 {strides = array<i32>} : memref<1x2x128xf32, #tpu.memory_space<vmem>>, vector<1x2x128xf32>,
    return
  }
  func.func @transform_0(%arg0: i32) -> (i32, i32) {
    %c0_i32 = arith.constant 0 : i32
    %c0_i32_0 = arith.constant 0 : i32
    return %arg0, %c0_i32 : i32, i32
  }
  func.func @transform_1(%arg0: i32) -> (i32, i32) {
    %c0_i32 = arith.constant 0 : i32
    %c0_i32_0 = arith.constant 0 : i32
    %c0_i32_1 = arith.constant 0 : i32
    return %c0_i32, %c0_i32_0 : i32, i32
  }
  func.func @transform_2(%arg0: i32) -> (i32, i32) {
    %c0_i32 = arith.constant 0 : i32
    %c0_i32_0 = arith.constant 0 : i32
    %c0_i32_1 = arith.constant 0 : i32
    return %c0_i32, %c0_i32_0 : i32, i32
  }
  func.func @transform_3(%arg0: i32) -> (i32, i32) {
    %c0_i32 = arith.constant 0 : i32
    %c0_i32_0 = arith.constant 0 : i32
    %c0_i32_1 = arith.constant 0 : i32
    return %c0_i32, %c0_i32_0 : i32, i32
  }
  func.func @transform_4(%arg0: i32) -> (i32, i32) {
    %c0_i32 = arith.constant 0 : i32
    %c0_i32_0 = arith.constant 0 : i32
    %c0_i32_1 = arith.constant 0 : i32
    return %c0_i32, %c0_i32_0 : i32, i32
  }
  func.func @transform_5(%arg0: i32) -> (i32, i32) {
    %c0_i32 = arith.constant 0 : i32
    %c0_i32_0 = arith.constant 0 : i32
    return %arg0, %c0_i32 : i32, i32
  }
  func.func @transform_6(%arg0: i32) -> (i32, i32, i32) {
    %c0_i32 = arith.constant 0 : i32
    %c0_i32_0 = arith.constant 0 : i32
    %c0_i32_1 = arith.constant 0 : i32
    return %arg0, %c0_i32, %c0_i32_0 : i32, i32, i32
  }
}

module attributes {stable_mosaic.version = 11 : i64} {
  func.func @_conv_bias_stats_kernel(%arg0: i32, %arg1: memref<256x1152xf32, #tpu.memory_space<vmem>>, %arg2: memref<1152x128xf32, #tpu.memory_space<vmem>>, %arg3: memref<1x128xf32, #tpu.memory_space<vmem>>, %arg4: memref<256x128xf32, #tpu.memory_space<vmem>>, %arg5: memref<1x2x128xf32, #tpu.memory_space<vmem>>) attributes {dimension_semantics = [#tpu.dimension_semantics<parallel>], iteration_bounds = array<i64: 2>, scalar_prefetch = 0 : i64, scratch_operands = 0 : i64, tpu.core_type = #tpu.core_type<tc>, window_params = [{transform_indices = @transform_0, window_bounds = array<i64: 256, 1152>}, {pipeline_mode = #tpu.pipeline_mode<synchronous>, transform_indices = @transform_1, window_bounds = array<i64: 1152, 128>}, {pipeline_mode = #tpu.pipeline_mode<synchronous>, transform_indices = @transform_2, window_bounds = array<i64: 1, 128>}, {transform_indices = @transform_3, window_bounds = array<i64: 256, 128>}, {transform_indices = @transform_4, window_bounds = array<i64: 1, 2, 128>}]} {
    %c0 = arith.constant 0 : index
    %c0_0 = arith.constant 0 : index
    %0 = vector.load %arg1[%c0, %c0_0] : memref<256x1152xf32, #tpu.memory_space<vmem>>, vector<256x1152xf32>
    %c0_1 = arith.constant 0 : index
    %c0_2 = arith.constant 0 : index
    %1 = vector.load %arg2[%c0_1, %c0_2] : memref<1152x128xf32, #tpu.memory_space<vmem>>, vector<1152x128xf32>
    %cst = arith.constant dense<0.000000e+00> : vector<256x128xf32>
    %2 = tpu.matmul %0, %1, %cst {dimension_numbers = #tpu.dot_dimension_numbers<[1], [0], [0], [1], [0, 0, 1, 1], [], []>} : vector<256x1152xf32>, vector<1152x128xf32>, vector<256x128xf32> -> vector<256x128xf32>
    %c0_3 = arith.constant 0 : index
    %c0_4 = arith.constant 0 : index
    %3 = vector.load %arg3[%c0_3, %c0_4] : memref<1x128xf32, #tpu.memory_space<vmem>>, vector<1x128xf32>
    %4 = vector.broadcast %3 : vector<1x128xf32> to vector<256x128xf32>
    %5 = arith.addf %2, %4 : vector<256x128xf32>
    %c0_5 = arith.constant 0 : index
    %c0_6 = arith.constant 0 : index
    %6 = vector.load %arg4[%c0_5, %c0_6] : memref<256x128xf32, #tpu.memory_space<vmem>>, vector<256x128xf32>
    tpu.vector_store %arg4[%c0_5, %c0_6], %5 {strides = array<i32>} : memref<256x128xf32, #tpu.memory_space<vmem>>, vector<256x128xf32>,
    %cst_7 = arith.constant dense<0.000000e+00> : vector<128xf32>
    %7 = vector.multi_reduction <add>, %5, %cst_7 [0] : vector<256x128xf32> to vector<128xf32>
    %8 = vector.shape_cast %7 : vector<128xf32> to vector<1x128xf32>
    %9 = arith.mulf %5, %5 : vector<256x128xf32>
    %cst_8 = arith.constant dense<0.000000e+00> : vector<128xf32>
    %10 = vector.multi_reduction <add>, %9, %cst_8 [0] : vector<256x128xf32> to vector<128xf32>
    %11 = vector.shape_cast %10 : vector<128xf32> to vector<1x128xf32>
    %12 = tpu.concatenate %8, %11 in 0 : vector<1x128xf32>, vector<1x128xf32> -> vector<2x128xf32>
    %13 = vector.shape_cast %12 : vector<2x128xf32> to vector<1x2x128xf32>
    %c0_9 = arith.constant 0 : index
    %c0_10 = arith.constant 0 : index
    %c0_11 = arith.constant 0 : index
    %14 = vector.load %arg5[%c0_9, %c0_10, %c0_11] : memref<1x2x128xf32, #tpu.memory_space<vmem>>, vector<1x2x128xf32>
    tpu.vector_store %arg5[%c0_9, %c0_10, %c0_11], %13 {strides = array<i32>} : memref<1x2x128xf32, #tpu.memory_space<vmem>>, vector<1x2x128xf32>,
    return
  }
  func.func @transform_0(%arg0: i32) -> (i32, i32) {
    %c0_i32 = arith.constant 0 : i32
    %c0_i32_0 = arith.constant 0 : i32
    return %arg0, %c0_i32 : i32, i32
  }
  func.func @transform_1(%arg0: i32) -> (i32, i32) {
    %c0_i32 = arith.constant 0 : i32
    %c0_i32_0 = arith.constant 0 : i32
    %c0_i32_1 = arith.constant 0 : i32
    return %c0_i32, %c0_i32_0 : i32, i32
  }
  func.func @transform_2(%arg0: i32) -> (i32, i32) {
    %c0_i32 = arith.constant 0 : i32
    %c0_i32_0 = arith.constant 0 : i32
    %c0_i32_1 = arith.constant 0 : i32
    return %c0_i32, %c0_i32_0 : i32, i32
  }
  func.func @transform_3(%arg0: i32) -> (i32, i32) {
    %c0_i32 = arith.constant 0 : i32
    %c0_i32_0 = arith.constant 0 : i32
    return %arg0, %c0_i32 : i32, i32
  }
  func.func @transform_4(%arg0: i32) -> (i32, i32, i32) {
    %c0_i32 = arith.constant 0 : i32
    %c0_i32_0 = arith.constant 0 : i32
    %c0_i32_1 = arith.constant 0 : i32
    return %arg0, %c0_i32, %c0_i32_0 : i32, i32, i32
  }
}

module attributes {stable_mosaic.version = 11 : i64} {
  func.func @_affine_add_relu_kernel(%arg0: i32, %arg1: memref<256x128xf32, #tpu.memory_space<vmem>>, %arg2: memref<256x128xf32, #tpu.memory_space<vmem>>, %arg3: memref<1x128xf32, #tpu.memory_space<vmem>>, %arg4: memref<1x128xf32, #tpu.memory_space<vmem>>, %arg5: memref<256x128xf32, #tpu.memory_space<vmem>>) attributes {dimension_semantics = [#tpu.dimension_semantics<parallel>], iteration_bounds = array<i64: 2>, scalar_prefetch = 0 : i64, scratch_operands = 0 : i64, tpu.core_type = #tpu.core_type<tc>, window_params = [{transform_indices = @transform_0, window_bounds = array<i64: 256, 128>}, {transform_indices = @transform_1, window_bounds = array<i64: 256, 128>}, {pipeline_mode = #tpu.pipeline_mode<synchronous>, transform_indices = @transform_2, window_bounds = array<i64: 1, 128>}, {pipeline_mode = #tpu.pipeline_mode<synchronous>, transform_indices = @transform_3, window_bounds = array<i64: 1, 128>}, {transform_indices = @transform_4, window_bounds = array<i64: 256, 128>}]} {
    %c0 = arith.constant 0 : index
    %c0_0 = arith.constant 0 : index
    %0 = vector.load %arg1[%c0, %c0_0] : memref<256x128xf32, #tpu.memory_space<vmem>>, vector<256x128xf32>
    %c0_1 = arith.constant 0 : index
    %c0_2 = arith.constant 0 : index
    %1 = vector.load %arg3[%c0_1, %c0_2] : memref<1x128xf32, #tpu.memory_space<vmem>>, vector<1x128xf32>
    %2 = vector.broadcast %1 : vector<1x128xf32> to vector<256x128xf32>
    %3 = arith.mulf %0, %2 : vector<256x128xf32>
    %c0_3 = arith.constant 0 : index
    %c0_4 = arith.constant 0 : index
    %4 = vector.load %arg4[%c0_3, %c0_4] : memref<1x128xf32, #tpu.memory_space<vmem>>, vector<1x128xf32>
    %5 = vector.broadcast %4 : vector<1x128xf32> to vector<256x128xf32>
    %6 = arith.addf %3, %5 : vector<256x128xf32>
    %c0_5 = arith.constant 0 : index
    %c0_6 = arith.constant 0 : index
    %7 = vector.load %arg2[%c0_5, %c0_6] : memref<256x128xf32, #tpu.memory_space<vmem>>, vector<256x128xf32>
    %8 = arith.addf %6, %7 : vector<256x128xf32>
    %cst = arith.constant 0.000000e+00 : f32
    %9 = vector.broadcast %cst : f32 to vector<256x128xf32>
    %10 = arith.maximumf %8, %9 : vector<256x128xf32>
    %c0_7 = arith.constant 0 : index
    %c0_8 = arith.constant 0 : index
    %11 = vector.load %arg5[%c0_7, %c0_8] : memref<256x128xf32, #tpu.memory_space<vmem>>, vector<256x128xf32>
    tpu.vector_store %arg5[%c0_7, %c0_8], %10 {strides = array<i32>} : memref<256x128xf32, #tpu.memory_space<vmem>>, vector<256x128xf32>,
    return
  }
  func.func @transform_0(%arg0: i32) -> (i32, i32) {
    %c0_i32 = arith.constant 0 : i32
    %c0_i32_0 = arith.constant 0 : i32
    return %arg0, %c0_i32 : i32, i32
  }
  func.func @transform_1(%arg0: i32) -> (i32, i32) {
    %c0_i32 = arith.constant 0 : i32
    %c0_i32_0 = arith.constant 0 : i32
    return %arg0, %c0_i32 : i32, i32
  }
  func.func @transform_2(%arg0: i32) -> (i32, i32) {
    %c0_i32 = arith.constant 0 : i32
    %c0_i32_0 = arith.constant 0 : i32
    %c0_i32_1 = arith.constant 0 : i32
    return %c0_i32, %c0_i32_0 : i32, i32
  }
  func.func @transform_3(%arg0: i32) -> (i32, i32) {
    %c0_i32 = arith.constant 0 : i32
    %c0_i32_0 = arith.constant 0 : i32
    %c0_i32_1 = arith.constant 0 : i32
    return %c0_i32, %c0_i32_0 : i32, i32
  }
  func.func @transform_4(%arg0: i32) -> (i32, i32) {
    %c0_i32 = arith.constant 0 : i32
    %c0_i32_0 = arith.constant 0 : i32
    return %arg0, %c0_i32 : i32, i32
  }
}

</mosaic_0001>

<bundles_post_ra>
// kernel: residual_forward.6
= control target key start
LH: loop header
LB: loop body
LE: loop exit
PB: predicated region body
PF: predicated region fallthrough
CT: control target
= control target key end

     0   :  { %s453_s12 = smov 0   ;;  %s612_s0 = inlined_call_operand.vmem [shape: f32[512,128], index: 0, kind: input, shape index: {}]   ;;  %s613_s1 = inlined_call_operand.vmem [shape: f32[1,128], index: 1, kind: input, shape index: {}]   ;;  %s614_s2 = inlined_call_operand.vmem [shape: f32[1,128], index: 2, kind: input, shape index: {}]   ;;  %s615_s3 = inlined_call_operand.vmem [shape: f32[512,128], index: 3, kind: output, shape index: {}]  }
   0x1 LB: > { %s404_s13 = sadd.s32 4294967295, %s431_s12   ;;  %p408_p0 = scmp.ge.s32.totalorder %s431_s12, 1  ;;  %s431_s12 = sphi %s453_s12, %s13_s12  }
   0x2   : > { %p138_p1 = scmp.lt.s32.totalorder %s431_s12, 3 }
   0x4   : > { %p139_p2 = pnand %p408_p0, %p138_p1 }
   0x5   : > { %s409_s14 = sshll.u32 (!%p139_p2), %s404_s13, 5  ;;  %v464_v0 = vld [vmem:[%s613_s1] ss:$0 sm:$0xff] (!%p139_p2) }
   0x6   : > { %142 = sbr.rel (%p139_p2) target bundleno = 46 (0x2e), region = 32  ;;  %p163_p3 = scmp.lt.s32.totalorder (!%p139_p2), %s409_s14, 63  ;;  %v474_v1 = vld [vmem:[%s614_s2] ss:$0 sm:$0xff] (!%p139_p2) }
   0xd   : > { %s617_s14 = smov (!%p163_p3, %s409_s14), 63 }
   0xe   : > { %s410_s15 = sshll.u32 %s617_s14, 3 }
   0xf   : > { %s469_s20 = scalar_lea.vmem %s612_s0, %s410_s15  ;;  %s497_s25 = scalar_lea.vmem %s615_s3, %s410_s15 }
  0x10   : > { %v174_v2 = vld [vmem:[%s469_s20] sm:$0xff]  ;;  %v175_v3 = vld [vmem:[%s469_s20 + $0x8] sm:$0xff]  ;;  %v176_v4 = vld [vmem:[%s469_s20 + $0x10] sm:$0xff] }
  0x11   : > { %v213_v5 = vmul.f32 %v464_v0, %v174_v2  ;;  %v214_v6 = vmul.f32 %v464_v0, %v175_v3  ;;  %v215_v7 = vmul.f32 %v464_v0, %v176_v4  ;;  %v177_v8 = vld [vmem:[%s469_s20 + $0x18] sm:$0xff]  ;;  %v178_v9 = vld [vmem:[%s469_s20 + $0x20] sm:$0xff]  ;;  %v179_v10 = vld [vmem:[%s469_s20 + $0x28] sm:$0xff] }
  0x12   : > { %v216_v11 = vmul.f32 %v464_v0, %v177_v8  ;;  %v217_v12 = vmul.f32 %v464_v0, %v178_v9  ;;  %v218_v13 = vmul.f32 %v464_v0, %v179_v10  ;;  %v180_v14 = vld [vmem:[%s469_s20 + $0x30] sm:$0xff]  ;;  %v181_v15 = vld [vmem:[%s469_s20 + $0x38] sm:$0xff]  ;;  %v182_v24 = vld [vmem:[%s469_s20 + $0x40] sm:$0xff] }
  0x13   : > { %v252_v16 = vadd.f32 %v474_v1, %v213_v5  ;;  %v253_v17 = vadd.f32 %v474_v1, %v214_v6  ;;  %v254_v18 = vadd.f32 %v474_v1, %v215_v7  ;;  %v219_v19 = vmul.f32 %v464_v0, %v180_v14  ;;  %v183_v25 = vld [vmem:[%s469_s20 + $0x48] sm:$0xff]  ;;  %v184_v26 = vld [vmem:[%s469_s20 + $0x50] sm:$0xff]  ;;  %v185_v31 = vld [vmem:[%s469_s20 + $0x58] sm:$0xff] }
  0x14   : > { %v255_v20 = vadd.f32 %v474_v1, %v216_v11  ;;  %v256_v21 = vadd.f32 %v474_v1, %v217_v12  ;;  %v257_v22 = vadd.f32 %v474_v1, %v218_v13  ;;  %v220_v23 = vmul.f32 %v464_v0, %v181_v15  ;;  %v186_v32 = vld [vmem:[%s469_s20 + $0x60] sm:$0xff]  ;;  %v187_v33 = vld [vmem:[%s469_s20 + $0x68] sm:$0xff]  ;;  %v188_v38 = vld [vmem:[%s469_s20 + $0x70] sm:$0xff] }
  0x15   : > { %v284_v27 = vmax.f32 %v252_v16, 0.0  ;;  %v285_v28 = vmax.f32 %v253_v17, 0.0  ;;  %v286_v29 = vmax.f32 %v254_v18, 0.0  ;;  %v258_v30 = vadd.f32 %v474_v1, %v219_v19  ;;  %v189_v43 = vld [vmem:[%s469_s20 + $0x78] sm:$0xff]  ;;  %v190_v56 = vld [vmem:[%s469_s20 + $0x80] sm:$0xff]  ;;  %v191_v57 = vld [vmem:[%s469_s20 + $0x88] sm:$0xff] }
  0x16   : > { %v287_v34 = vmax.f32 %v255_v20, 0.0  ;;  %v288_v35 = vmax.f32 %v256_v21, 0.0  ;;  %v289_v36 = vmax.f32 %v257_v22, 0.0  ;;  %v259_v37 = vadd.f32 %v474_v1, %v220_v23  ;;  %v192_v58 = vld [vmem:[%s469_s20 + $0x90] sm:$0xff]  ;;  %v193_v63 = vld [vmem:[%s469_s20 + $0x98] sm:$0xff]  ;;  %v194_v2 = vld [vmem:[%s469_s20 + $0xa0] sm:$0xff] }
  0x17   : > { %316 = vst [vmem:[%s497_s25] sm:$0xff] %v284_v27  ;;  %317 = vst [vmem:[%s497_s25 + $0x8] sm:$0xff] %v285_v28  ;;  %v290_v39 = vmax.f32 %v258_v30, 0.0  ;;  %v221_v40 = vmul.f32 %v464_v0, %v182_v24  ;;  %v222_v41 = vmul.f32 %v464_v0, %v183_v25  ;;  %v223_v42 = vmul.f32 %v464_v0, %v184_v26  ;;  %v195_v3 = vld [vmem:[%s469_s20 + $0xa8] sm:$0xff]  ;;  %v196_v8 = vld [vmem:[%s469_s20 + $0xb0] sm:$0xff] }
  0x18   : > { %318 = vst [vmem:[%s497_s25 + $0x10] sm:$0xff] %v286_v29  ;;  %319 = vst [vmem:[%s497_s25 + $0x18] sm:$0xff] %v287_v34  ;;  %v291_v44 = vmax.f32 %v259_v37, 0.0  ;;  %v224_v45 = vmul.f32 %v464_v0, %v185_v31  ;;  %v225_v46 = vmul.f32 %v464_v0, %v186_v32  ;;  %v226_v47 = vmul.f32 %v464_v0, %v187_v33  ;;  %v197_v13 = vld [vmem:[%s469_s20 + $0xb8] sm:$0xff]  ;;  %v198_v26 = vld [vmem:[%s469_s20 + $0xc0] sm:$0xff] }
  0x19   : > { %320 = vst [vmem:[%s497_s25 + $0x20] sm:$0xff] %v288_v35  ;;  %321 = vst [vmem:[%s497_s25 + $0x28] sm:$0xff] %v289_v36  ;;  %v260_v48 = vadd.f32 %v474_v1, %v221_v40  ;;  %v261_v49 = vadd.f32 %v474_v1, %v222_v41  ;;  %v262_v50 = vadd.f32 %v474_v1, %v223_v42  ;;  %v199_v27 = vld [vmem:[%s469_s20 + $0xc8] sm:$0xff]  ;;  %v200_v28 = vld [vmem:[%s469_s20 + $0xd0] sm:$0xff] }
  0x1a   : > { %322 = vst [vmem:[%s497_s25 + $0x30] sm:$0xff] %v290_v39  ;;  %v227_v51 = vmul.f32 %v464_v0, %v188_v38  ;;  %323 = vst [vmem:[%s497_s25 + $0x38] sm:$0xff] %v291_v44  ;;  %v263_v52 = vadd.f32 %v474_v1, %v224_v45  ;;  %v264_v53 = vadd.f32 %v474_v1, %v225_v46  ;;  %v201_v33 = vld [vmem:[%s469_s20 + $0xd8] sm:$0xff]  ;;  %v202_v34 = vld [vmem:[%s469_s20 + $0xe0] sm:$0xff] }
  0x1b   : > { %v265_v54 = vadd.f32 %v474_v1, %v226_v47  ;;  %v228_v55 = vmul.f32 %v464_v0, %v189_v43  ;;  %v292_v59 = vmax.f32 %v260_v48, 0.0  ;;  %v293_v60 = vmax.f32 %v261_v49, 0.0  ;;  %v203_v35 = vld [vmem:[%s469_s20 + $0xe8] sm:$0xff]  ;;  %v204_v40 = vld [vmem:[%s469_s20 + $0xf0] sm:$0xff]  ;;  %v205_v45 = vld [vmem:[%s469_s20 + $0xf8] sm:$0xff] }
  0x1c   : > { %v294_v61 = vmax.f32 %v262_v50, 0.0  ;;  %v266_v62 = vadd.f32 %v474_v1, %v227_v51  ;;  %v295_v4 = vmax.f32 %v263_v52, 0.0  ;;  %v296_v5 = vmax.f32 %v264_v53, 0.0 }
  0x1d   : > { %v297_v6 = vmax.f32 %v265_v54, 0.0  ;;  %v267_v7 = vadd.f32 %v474_v1, %v228_v55  ;;  %324 = vst [vmem:[%s497_s25 + $0x40] sm:$0xff] %v292_v59  ;;  %325 = vst [vmem:[%s497_s25 + $0x48] sm:$0xff] %v293_v60  ;;  %v229_v10 = vmul.f32 %v464_v0, %v190_v56  ;;  %v230_v11 = vmul.f32 %v464_v0, %v191_v57 }
  0x1e   : > { %326 = vst [vmem:[%s497_s25 + $0x50] sm:$0xff] %v294_v61  ;;  %v298_v9 = vmax.f32 %v266_v62, 0.0  ;;  %v231_v12 = vmul.f32 %v464_v0, %v192_v58  ;;  %327 = vst [vmem:[%s497_s25 + $0x58] sm:$0xff] %v295_v4  ;;  %v232_v15 = vmul.f32 %v464_v0, %v193_v63  ;;  %v233_v16 = vmul.f32 %v464_v0, %v194_v2 }
  0x1f   : > { %328 = vst [vmem:[%s497_s25 + $0x60] sm:$0xff] %v296_v5  ;;  %329 = vst [vmem:[%s497_s25 + $0x68] sm:$0xff] %v297_v6  ;;  %v299_v14 = vmax.f32 %v267_v7, 0.0  ;;  %v234_v17 = vmul.f32 %v464_v0, %v195_v3  ;;  %v268_v18 = vadd.f32 %v474_v1, %v229_v10  ;;  %v269_v19 = vadd.f32 %v474_v1, %v230_v11 }
  0x20   : > { %330 = vst [vmem:[%s497_s25 + $0x70] sm:$0xff] %v298_v9  ;;  %v270_v20 = vadd.f32 %v474_v1, %v231_v12  ;;  %v235_v21 = vmul.f32 %v464_v0, %v196_v8  ;;  %v271_v22 = vadd.f32 %v474_v1, %v232_v15  ;;  %v272_v23 = vadd.f32 %v474_v1, %v233_v16 }
  0x21   : > { %331 = vst [vmem:[%s497_s25 + $0x78] sm:$0xff] %v299_v14  ;;  %v273_v24 = vadd.f32 %v474_v1, %v234_v17  ;;  %v236_v25 = vmul.f32 %v464_v0, %v197_v13  ;;  %v300_v29 = vmax.f32 %v268_v18, 0.0  ;;  %v301_v30 = vmax.f32 %v269_v19, 0.0 }
  0x22   : > { %v302_v31 = vmax.f32 %v270_v20, 0.0  ;;  %v274_v32 = vadd.f32 %v474_v1, %v235_v21  ;;  %v303_v36 = vmax.f32 %v271_v22, 0.0  ;;  %v304_v37 = vmax.f32 %v272_v23, 0.0 }
  0x23   : > { %v305_v38 = vmax.f32 %v273_v24, 0.0  ;;  %v275_v39 = vadd.f32 %v474_v1, %v236_v25  ;;  %332 = vst [vmem:[%s497_s25 + $0x80] sm:$0xff] %v300_v29  ;;  %333 = vst [vmem:[%s497_s25 + $0x88] sm:$0xff] %v301_v30  ;;  %v237_v42 = vmul.f32 %v464_v0, %v198_v26  ;;  %v238_v43 = vmul.f32 %v464_v0, %v199_v27 }
  0x24   : > { %334 = vst [vmem:[%s497_s25 + $0x90] sm:$0xff] %v302_v31  ;;  %v306_v41 = vmax.f32 %v274_v32, 0.0  ;;  %v239_v44 = vmul.f32 %v464_v0, %v200_v28  ;;  %335 = vst [vmem:[%s497_s25 + $0x98] sm:$0xff] %v303_v36  ;;  %v240_v47 = vmul.f32 %v464_v0, %v201_v33  ;;  %v241_v48 = vmul.f32 %v464_v0, %v202_v34 }
  0x25   : > { %336 = vst [vmem:[%s497_s25 + $0xa0] sm:$0xff] %v304_v37  ;;  %337 = vst [vmem:[%s497_s25 + $0xa8] sm:$0xff] %v305_v38  ;;  %v307_v46 = vmax.f32 %v275_v39, 0.0  ;;  %v242_v49 = vmul.f32 %v464_v0, %v203_v35  ;;  %v276_v50 = vadd.f32 %v474_v1, %v237_v42  ;;  %v277_v51 = vadd.f32 %v474_v1, %v238_v43 }
  0x26   : > { %338 = vst [vmem:[%s497_s25 + $0xb0] sm:$0xff] %v306_v41  ;;  %v278_v52 = vadd.f32 %v474_v1, %v239_v44  ;;  %v243_v53 = vmul.f32 %v464_v0, %v204_v40  ;;  %v279_v54 = vadd.f32 %v474_v1, %v240_v47  ;;  %v280_v55 = vadd.f32 %v474_v1, %v241_v48 }
  0x27   : > { %339 = vst [vmem:[%s497_s25 + $0xb8] sm:$0xff] %v307_v46  ;;  %v281_v56 = vadd.f32 %v474_v1, %v242_v49  ;;  %v244_v57 = vmul.f32 %v464_v0, %v205_v45  ;;  %v308_v58 = vmax.f32 %v276_v50, 0.0  ;;  %v309_v59 = vmax.f32 %v277_v51, 0.0 }
  0x28   : > { %v310_v60 = vmax.f32 %v278_v52, 0.0  ;;  %v282_v61 = vadd.f32 %v474_v1, %v243_v53  ;;  %v311_v62 = vmax.f32 %v279_v54, 0.0  ;;  %v312_v63 = vmax.f32 %v280_v55, 0.0 }
  0x29   : > { %v313_v2 = vmax.f32 %v281_v56, 0.0  ;;  %v283_v3 = vadd.f32 %v474_v1, %v244_v57  ;;  %340 = vst [vmem:[%s497_s25 + $0xc0] sm:$0xff] %v308_v58  ;;  %341 = vst [vmem:[%s497_s25 + $0xc8] sm:$0xff] %v309_v59 }
  0x2a   : > { %342 = vst [vmem:[%s497_s25 + $0xd0] sm:$0xff] %v310_v60  ;;  %v314_v4 = vmax.f32 %v282_v61, 0.0  ;;  %343 = vst [vmem:[%s497_s25 + $0xd8] sm:$0xff] %v311_v62 }
  0x2b   : > { %344 = vst [vmem:[%s497_s25 + $0xe0] sm:$0xff] %v312_v63  ;;  %345 = vst [vmem:[%s497_s25 + $0xe8] sm:$0xff] %v313_v2  ;;  %v315_v0 = vmax.f32 %v283_v3, 0.0 }
  0x2c   : > { %346 = vst [vmem:[%s497_s25 + $0xf0] sm:$0xff] %v314_v4 }
  0x2d   : > { %347 = vst [vmem:[%s497_s25 + $0xf8] sm:$0xff] %v315_v0 }
  0x2e PF: > { %s13_s12 = sadd.s32 1, %s431_s12  }
  0x2f   : > { %p10_p4 = scmp.ge.s32.totalorder %s13_s12, 4  }
  0x31   :  { %12 = sbr.rel (!%p10_p4) target bundleno = 1 (0x1), region = 62 }

// kernel: residual_forward.5
= control target key start
LH: loop header
LB: loop body
LE: loop exit
PB: predicated region body
PF: predicated region fallthrough
CT: control target
= control target key end

     0   :  { %s950_s15 = smov 0   ;;  %s1219_s0 = inlined_call_operand.vmem [shape: f32[512,128], index: 0, kind: input, shape index: {}]   ;;  %s1220_s1 = inlined_call_operand.vmem [shape: f32[128,128], index: 1, kind: input, shape index: {}]   ;;  %s1221_s2 = inlined_call_operand.vmem [shape: f32[1,128], index: 2, kind: input, shape index: {}]   ;;  %s1222_s3 = inlined_call_operand.vmem [shape: f32[512,128], index: 3, kind: output, shape index: {0}]   ;;  %s1223_s4 = inlined_call_operand.vmem [shape: f32[2,2,128], index: 4, kind: output, shape index: {1}]  }
   0x1 LB: > { %s956_s16 = sadd.s32 4294967295, %s923_s15   ;;  %p724_p0 = scmp.ge.s32.totalorder %s923_s15, 1  ;;  %s923_s15 = sphi %s950_s15, %s15_s15  }
   0x2   : > { %p166_p1 = scmp.lt.s32.totalorder %s923_s15, 3 }
   0x4   : > { %p167_p2 = pnand %p724_p0, %p166_p1 }
   0x5   : > { %v244_v0 = vld [vmem:[%s1220_s1] sm:$0xff] (!%p167_p2)  ;;  %v245_v1 = vld [vmem:[%s1220_s1 + $0x8] sm:$0xff] (!%p167_p2)  ;;  %v246_v2 = vld [vmem:[%s1220_s1 + $0x10] sm:$0xff] (!%p167_p2)  ;;  %s725_s23 = sshll.u32 (!%p167_p2), %s956_s16, 5  ;;  %p208_p4 = scmp.lt.s32.totalorder (!%p167_p2), %s956_s16, 1  ;;  %vm630_vm0 = vcmask (!%p167_p2), 1040384  }
   0x6   : > { %170 = sbr.rel (%p167_p2) target bundleno = 335 (0x14f), region = 32  ;;  %v861_v3 = vpack.c.bf16 (!%p167_p2), %v245_v1, %v244_v0  ;;  %v247_v4 = vld [vmem:[%s1220_s1 + $0x18] sm:$0xff] (!%p167_p2)  ;;  %p197_p3 = scmp.lt.s32.totalorder (!%p167_p2), %s725_s23, 63  ;;  %v248_v6 = vld [vmem:[%s1220_s1 + $0x20] sm:$0xff] (!%p167_p2)  ;;  %v249_v7 = vld [vmem:[%s1220_s1 + $0x28] sm:$0xff] (!%p167_p2) }
   0x7   : > { %v865_v5 = vpack.c.bf16 (!%p167_p2), %v247_v4, %v246_v2  ;;  %v869_v8 = vpack.c.bf16 (!%p167_p2), %v249_v7, %v248_v6  ;;  %v250_v9 = vld [vmem:[%s1220_s1 + $0x30] sm:$0xff] (!%p167_p2)  ;;  %v251_v10 = vld [vmem:[%s1220_s1 + $0x38] sm:$0xff] (!%p167_p2)  ;;  %v252_v13 = vld [vmem:[%s1220_s1 + $0x40] sm:$0xff] (!%p167_p2) }
   0x8   : > { %862 = vmatprep.subr.bf16.mxu0 (!%p167_p2), %v861_v3  ;;  %893 = vmatprep.subr.bf16.mxu1 (!%p167_p2), %v861_v3  ;;  %v873_v12 = vpack.c.bf16 (!%p167_p2), %v251_v10, %v250_v9  ;;  %v253_v14 = vld [vmem:[%s1220_s1 + $0x48] sm:$0xff] (!%p167_p2)  ;;  %v254_v17 = vld [vmem:[%s1220_s1 + $0x50] sm:$0xff] (!%p167_p2)  ;;  %v255_v18 = vld [vmem:[%s1220_s1 + $0x58] sm:$0xff] (!%p167_p2) }
   0x9   : > { %864 = vmatpush3.bf16.msra.mxu0 (!%p167_p2), %v861_v3  ;;  %901 = vmatpush3.bf16.msra.mxu1 (!%p167_p2), %v861_v3  ;;  %v877_v16 = vpack.c.bf16 (!%p167_p2), %v253_v14, %v252_v13  ;;  %v881_v19 = vpack.c.bf16 (!%p167_p2), %v255_v18, %v254_v17  ;;  %v256_v20 = vld [vmem:[%s1220_s1 + $0x60] sm:$0xff] (!%p167_p2)  ;;  %v257_v21 = vld [vmem:[%s1220_s1 + $0x68] sm:$0xff] (!%p167_p2)  ;;  %v258_v23 = vld [vmem:[%s1220_s1 + $0x70] sm:$0xff] (!%p167_p2) }
   0xa   : > { %866 = vmatprep.subr.bf16.mxu0 (!%p167_p2), %v865_v5  ;;  %894 = vmatprep.subr.bf16.mxu1 (!%p167_p2), %v865_v5  ;;  %v885_v22 = vpack.c.bf16 (!%p167_p2), %v257_v21, %v256_v20  ;;  %v259_v24 = vld [vmem:[%s1220_s1 + $0x78] sm:$0xff] (!%p167_p2)  ;;  %v1054_v56 = vld [vmem:[%s1221_s2] ss:$0 sm:$0xff] (!%p167_p2) }
   0xb   : > { %v889_v25 = vpack.c.bf16 (!%p167_p2), %v259_v24, %v258_v23 }
   0xd   : > { %s1225_s23 = smov (!%p197_p3, %s725_s23), 63  ;;  %868 = vmatpush3.bf16.msra.mxu0 %v865_v5  ;;  %902 = vmatpush3.bf16.msra.mxu1 %v865_v5  ;;  %s1227_s16 = smov (!%p208_p4, %s956_s16), 1 }
   0xe   : > { %s726_s30 = sshll.u32 %s1225_s23, 3  ;;  %870 = vmatprep.subr.bf16.mxu0 %v869_v8  ;;  %895 = vmatprep.subr.bf16.mxu1 %v869_v8  ;;  %s729_s23 = sshll.u32 %s1227_s16, 1 }
   0xf   : > { %s993_s11 = scalar_lea.vmem %s1219_s0, %s726_s30  ;;  %s1061_s10 = scalar_lea.vmem %s1222_s3, %s726_s30 }
  0x10   : > { %v212_v11 = vld [vmem:[%s993_s11] sm:$0xff]  ;;  %v213_v26 = vld [vmem:[%s993_s11 + $0x8] sm:$0xff]  ;;  %v214_v27 = vld [vmem:[%s993_s11 + $0x10] sm:$0xff]  ;;  %s211_s12 = scalar_lea.vmem %s1223_s4, %s729_s23 }
  0x11   : > { %813 = vmatprep.mubr.f32.mxu0 %v212_v11  ;;  %872 = vmatpush3.bf16.msra.mxu0 %v869_v8  ;;  %v228_v15 = vld [vmem:[%s993_s11 + $0x80] sm:$0xff]  ;;  %v229_v28 = vld [vmem:[%s993_s11 + $0x88] sm:$0xff]  ;;  %v230_v29 = vld [vmem:[%s993_s11 + $0x90] sm:$0xff] }
  0x12   : > { %874 = vmatprep.subr.bf16.mxu0 %v873_v12  ;;  %903 = vmatpush3.bf16.msra.mxu1 %v869_v8  ;;  %v215_v30 = vld [vmem:[%s993_s11 + $0x18] sm:$0xff]  ;;  %v216_v31 = vld [vmem:[%s993_s11 + $0x20] sm:$0xff]  ;;  %v217_v34 = vld [vmem:[%s993_s11 + $0x28] sm:$0xff] }
  0x13   : > { %896 = vmatprep.subr.bf16.mxu1 %v873_v12  ;;  %837 = vmatprep.mubr.f32.mxu1 %v228_v15  ;;  %v231_v32 = vld [vmem:[%s993_s11 + $0x98] sm:$0xff]  ;;  %v232_v33 = vld [vmem:[%s993_s11 + $0xa0] sm:$0xff]  ;;  %v218_v35 = vld [vmem:[%s993_s11 + $0x30] sm:$0xff] }
  0x14   : > { %v233_v36 = vld [vmem:[%s993_s11 + $0xa8] sm:$0xff]  ;;  %v234_v37 = vld [vmem:[%s993_s11 + $0xb0] sm:$0xff]  ;;  %v219_v38 = vld [vmem:[%s993_s11 + $0x38] sm:$0xff] }
  0x15   : > { %876 = vmatpush3.bf16.msra.mxu0 %v873_v12  ;;  %v220_v39 = vld [vmem:[%s993_s11 + $0x40] sm:$0xff]  ;;  %v235_v40 = vld [vmem:[%s993_s11 + $0xb8] sm:$0xff]  ;;  %v221_v42 = vld [vmem:[%s993_s11 + $0x48] sm:$0xff] }
  0x16   : > { %878 = vmatprep.subr.bf16.mxu0 %v877_v16  ;;  %904 = vmatpush3.bf16.msra.mxu1 %v873_v12  ;;  %v236_v41 = vld [vmem:[%s993_s11 + $0xc0] sm:$0xff]  ;;  %v222_v43 = vld [vmem:[%s993_s11 + $0x50] sm:$0xff]  ;;  %v237_v44 = vld [vmem:[%s993_s11 + $0xc8] sm:$0xff] }
  0x17   : > { %897 = vmatprep.subr.bf16.mxu1 %v877_v16  ;;  %v238_v45 = vld [vmem:[%s993_s11 + $0xd0] sm:$0xff]  ;;  %v223_v46 = vld [vmem:[%s993_s11 + $0x58] sm:$0xff]  ;;  %v224_v47 = vld [vmem:[%s993_s11 + $0x60] sm:$0xff] }
  0x18   : > { %v239_v48 = vld [vmem:[%s993_s11 + $0xd8] sm:$0xff]  ;;  %v240_v49 = vld [vmem:[%s993_s11 + $0xe0] sm:$0xff]  ;;  %v225_v50 = vld [vmem:[%s993_s11 + $0x68] sm:$0xff] }
  0x19   : > { %880 = vmatpush3.bf16.msra.mxu0 %v877_v16  ;;  %v226_v51 = vld [vmem:[%s993_s11 + $0x70] sm:$0xff]  ;;  %v241_v52 = vld [vmem:[%s993_s11 + $0xe8] sm:$0xff]  ;;  %v227_v54 = vld [vmem:[%s993_s11 + $0x78] sm:$0xff] }
  0x1a   : > { %882 = vmatprep.subr.bf16.mxu0 %v881_v19  ;;  %905 = vmatpush3.bf16.msra.mxu1 %v877_v16  ;;  %v242_v53 = vld [vmem:[%s993_s11 + $0xf0] sm:$0xff]  ;;  %v243_v55 = vld [vmem:[%s993_s11 + $0xf8] sm:$0xff] }
  0x1b   : > { %898 = vmatprep.subr.bf16.mxu1 %v881_v19 }
  0x1d   : > { %884 = vmatpush3.bf16.msra.mxu0 %v881_v19 }
  0x1e   : > { %886 = vmatprep.subr.bf16.mxu0 %v885_v22  ;;  %906 = vmatpush3.bf16.msra.mxu1 %v881_v19 }
  0x1f   : > { %899 = vmatprep.subr.bf16.mxu1 %v885_v22 }
  0x21   : > { %888 = vmatpush3.bf16.msra.mxu0 %v885_v22 }
  0x22   : > { %890 = vmatprep.subr.bf16.mxu0 %v889_v25  ;;  %907 = vmatpush3.bf16.msra.mxu1 %v885_v22 }
  0x23   : > { %900 = vmatprep.subr.bf16.mxu1 %v889_v25 }
  0x25   : > { %892 = vmatpush3.bf16.msra.mxu0 %v889_v25 }
  0x26   : > { %908 = vmatpush3.bf16.msra.mxu1 %v889_v25 }
  0x28   : > { %814 = vmatmul.mubr.f32.vlgmr.msra.gmra.mrb[0].mxu0 %v213_v26 }
  0x29   : > { %816 = vmatprep.mubr.f32.mxu0 %v214_v27  ;;  %838 = vmatmul.mubr.f32.vlgmr.msra.gmra.mrb[0].mxu1 %v229_v28 }
  0x2a   : > { %840 = vmatprep.mubr.f32.mxu1 %v230_v29 }
  0x2c   : > { %817 = vmatmul.mubr.f32.gmra.mrb[2].mxu0 %v215_v30 }
  0x2d   : > { %819 = vmatprep.mubr.f32.mxu0 %v216_v31  ;;  %841 = vmatmul.mubr.f32.gmra.mrb[2].mxu1 %v231_v32 }
  0x2e   : > { %843 = vmatprep.mubr.f32.mxu1 %v232_v33 }
  0x30   : > { %820 = vmatmul.mubr.f32.gmra.mrb[4].mxu0 %v217_v34 }
  0x31   : > { %822 = vmatprep.mubr.f32.mxu0 %v218_v35  ;;  %844 = vmatmul.mubr.f32.gmra.mrb[4].mxu1 %v233_v36 }
  0x32   : > { %846 = vmatprep.mubr.f32.mxu1 %v234_v37 }
  0x34   : > { %823 = vmatmul.mubr.f32.gmra.mrb[6].mxu0 %v219_v38 }
  0x35   : > { %825 = vmatprep.mubr.f32.mxu0 %v220_v39  ;;  %847 = vmatmul.mubr.f32.gmra.mrb[6].mxu1 %v235_v40 }
  0x36   : > { %849 = vmatprep.mubr.f32.mxu1 %v236_v41 }
  0x38   : > { %826 = vmatmul.mubr.f32.gmra.mrb[8].mxu0 %v221_v42 }
  0x39   : > { %828 = vmatprep.mubr.f32.mxu0 %v222_v43  ;;  %850 = vmatmul.mubr.f32.gmra.mrb[8].mxu1 %v237_v44 }
  0x3a   : > { %852 = vmatprep.mubr.f32.mxu1 %v238_v45 }
  0x3c   : > { %829 = vmatmul.mubr.f32.gmra.mrb[10].mxu0 %v223_v46 }
  0x3d   : > { %831 = vmatprep.mubr.f32.mxu0 %v224_v47  ;;  %853 = vmatmul.mubr.f32.gmra.mrb[10].mxu1 %v239_v48 }
  0x3e   : > { %855 = vmatprep.mubr.f32.mxu1 %v240_v49 }
  0x40   : > { %832 = vmatmul.mubr.f32.gmra.mrb[12].mxu0 %v225_v50 }
  0x41   : > { %834 = vmatprep.mubr.f32.mxu0 %v226_v51  ;;  %856 = vmatmul.mubr.f32.gmra.mrb[12].mxu1 %v241_v52 }
  0x42   : > { %858 = vmatprep.mubr.f32.mxu1 %v242_v53 }
  0x44   : > { %835 = vmatmul.mubr.f32.gmra.mrb[14].mxu0 %v227_v54 }
  0x45   : > { %859 = vmatmul.mubr.f32.gmra.mrb[14].mxu1 %v243_v55 }
  0xfb   : > { %v815_v57 = vpop.f32.mrb[0].mxu0 }
  0xfc   : > { %v339_v58 = vadd.f32 %v815_v57, %v1054_v56  ;;  %v333_v59 = vpop.f32.mrb[1].mxu0  ;;  %v839_v60 = vpop.f32.mrb[0].mxu1 }
  0xfd   : > { %v334_v61 = vadd.f32 %v1054_v56, %v333_v59  ;;  %v1066_v62 = vadd.f32 %v839_v60, %v1054_v56  ;;  %v413_v63 = vpop.f32.mrb[1].mxu1 }
  0xfe   : > { %493 = vst [vmem:[%s1061_s10 + $0x8] sm:$0xff] %v339_v58  ;;  %v562_v0 = vmul.f32 %v339_v58, %v339_v58  ;;  %v1070_v1 = vadd.f32 %v1054_v56, %v413_v63 }
  0xff   : > { %492 = vst [vmem:[%s1061_s10] sm:$0xff] %v334_v61  ;;  %v524_v2 = vadd.f32 %v339_v58, %v334_v61  ;;  %v561_v3 = vmul.f32 %v334_v61, %v334_v61  ;;  %v818_v4 = vpop.f32.mrb[2].mxu0  ;;  %509 = vst [vmem:[%s1061_s10 + $0x88] sm:$0xff] %v1066_v62 }
 0x100   : > { %v349_v5 = vadd.f32 %v818_v4, %v1054_v56  ;;  %v343_v6 = vpop.f32.mrb[3].mxu0  ;;  %508 = vst [vmem:[%s1061_s10 + $0x80] sm:$0xff] %v1070_v1  ;;  %v842_v7 = vpop.f32.mrb[2].mxu1 }
 0x101   : > { %v593_v8 = vadd.f32 %v562_v0, %v561_v3  ;;  %v344_v9 = vadd.f32 %v1054_v56, %v343_v6  ;;  %v1080_v10 = vadd.f32 %v842_v7, %v1054_v56  ;;  %v423_v11 = vpop.f32.mrb[3].mxu1 }
 0x102   : > { %495 = vst [vmem:[%s1061_s10 + $0x18] sm:$0xff] %v349_v5  ;;  %v1084_v12 = vadd.f32 %v1054_v56, %v423_v11  ;;  %v564_v16 = vmul.f32 %v349_v5, %v349_v5 }
 0x103   : > { %494 = vst [vmem:[%s1061_s10 + $0x10] sm:$0xff] %v344_v9  ;;  %v525_v13 = vadd.f32 %v524_v2, %v344_v9  ;;  %v563_v14 = vmul.f32 %v344_v9, %v344_v9  ;;  %v821_v15 = vpop.f32.mrb[4].mxu0  ;;  %511 = vst [vmem:[%s1061_s10 + $0x98] sm:$0xff] %v1080_v10 }
 0x104   : > { %v359_v17 = vadd.f32 %v821_v15, %v1054_v56  ;;  %v353_v18 = vpop.f32.mrb[5].mxu0  ;;  %510 = vst [vmem:[%s1061_s10 + $0x90] sm:$0xff] %v1084_v12  ;;  %v845_v19 = vpop.f32.mrb[4].mxu1 }
 0x105   : > { %v594_v20 = vadd.f32 %v593_v8, %v563_v14  ;;  %v354_v21 = vadd.f32 %v1054_v56, %v353_v18  ;;  %v526_v22 = vadd.f32 %v525_v13, %v349_v5  ;;  %v1094_v23 = vadd.f32 %v845_v19, %v1054_v56  ;;  %v433_v24 = vpop.f32.mrb[5].mxu1 }
 0x106   : > { %497 = vst [vmem:[%s1061_s10 + $0x28] sm:$0xff] %v359_v17  ;;  %v1098_v25 = vadd.f32 %v1054_v56, %v433_v24  ;;  %v566_v30 = vmul.f32 %v359_v17, %v359_v17 }
 0x107   : > { %496 = vst [vmem:[%s1061_s10 + $0x20] sm:$0xff] %v354_v21  ;;  %v527_v26 = vadd.f32 %v526_v22, %v354_v21  ;;  %v565_v27 = vmul.f32 %v354_v21, %v354_v21  ;;  %v595_v28 = vadd.f32 %v594_v20, %v564_v16  ;;  %v824_v29 = vpop.f32.mrb[6].mxu0  ;;  %513 = vst [vmem:[%s1061_s10 + $0xa8] sm:$0xff] %v1094_v23 }
 0x108   : > { %v369_v31 = vadd.f32 %v824_v29, %v1054_v56  ;;  %v363_v32 = vpop.f32.mrb[7].mxu0  ;;  %512 = vst [vmem:[%s1061_s10 + $0xa0] sm:$0xff] %v1098_v25  ;;  %v848_v33 = vpop.f32.mrb[6].mxu1 }
 0x109   : > { %v596_v34 = vadd.f32 %v595_v28, %v565_v27  ;;  %v364_v35 = vadd.f32 %v1054_v56, %v363_v32  ;;  %v528_v36 = vadd.f32 %v527_v26, %v359_v17  ;;  %v1108_v37 = vadd.f32 %v848_v33, %v1054_v56  ;;  %v443_v38 = vpop.f32.mrb[7].mxu1 }
 0x10a   : > { %499 = vst [vmem:[%s1061_s10 + $0x38] sm:$0xff] %v369_v31  ;;  %v1112_v39 = vadd.f32 %v1054_v56, %v443_v38  ;;  %v568_v44 = vmul.f32 %v369_v31, %v369_v31 }
 0x10b   : > { %498 = vst [vmem:[%s1061_s10 + $0x30] sm:$0xff] %v364_v35  ;;  %v529_v40 = vadd.f32 %v528_v36, %v364_v35  ;;  %v567_v41 = vmul.f32 %v364_v35, %v364_v35  ;;  %v597_v42 = vadd.f32 %v596_v34, %v566_v30  ;;  %v827_v43 = vpop.f32.mrb[8].mxu0  ;;  %515 = vst [vmem:[%s1061_s10 + $0xb8] sm:$0xff] %v1108_v37 }
 0x10c   : > { %v379_v45 = vadd.f32 %v827_v43, %v1054_v56  ;;  %v373_v46 = vpop.f32.mrb[9].mxu0  ;;  %514 = vst [vmem:[%s1061_s10 + $0xb0] sm:$0xff] %v1112_v39  ;;  %v851_v47 = vpop.f32.mrb[8].mxu1 }
 0x10d   : > { %v598_v48 = vadd.f32 %v597_v42, %v567_v41  ;;  %v374_v49 = vadd.f32 %v1054_v56, %v373_v46  ;;  %v530_v50 = vadd.f32 %v529_v40, %v369_v31  ;;  %v1122_v51 = vadd.f32 %v851_v47, %v1054_v56  ;;  %v453_v52 = vpop.f32.mrb[9].mxu1 }
 0x10e   : > { %501 = vst [vmem:[%s1061_s10 + $0x48] sm:$0xff] %v379_v45  ;;  %v1126_v53 = vadd.f32 %v1054_v56, %v453_v52  ;;  %v570_v59 = vmul.f32 %v379_v45, %v379_v45  ;;  %v577_v47 = vmul.f32 %v1070_v1, %v1070_v1 }
 0x10f   : > { %500 = vst [vmem:[%s1061_s10 + $0x40] sm:$0xff] %v374_v49  ;;  %v531_v54 = vadd.f32 %v530_v50, %v374_v49  ;;  %v569_v55 = vmul.f32 %v374_v49, %v374_v49  ;;  %v599_v57 = vadd.f32 %v598_v48, %v568_v44  ;;  %v830_v58 = vpop.f32.mrb[10].mxu0  ;;  %517 = vst [vmem:[%s1061_s10 + $0xc8] sm:$0xff] %v1122_v51 }
 0x110   : > { %v389_v60 = vadd.f32 %v830_v58, %v1054_v56  ;;  %v383_v61 = vpop.f32.mrb[11].mxu0  ;;  %516 = vst [vmem:[%s1061_s10 + $0xc0] sm:$0xff] %v1126_v53  ;;  %v854_v63 = vpop.f32.mrb[10].mxu1  ;;  %v578_v50 = vmul.f32 %v1066_v62, %v1066_v62  ;;  %v580_v58 = vmul.f32 %v1080_v10, %v1080_v10 }
 0x111   : > { %v600_v0 = vadd.f32 %v599_v57, %v569_v55  ;;  %v384_v2 = vadd.f32 %v1054_v56, %v383_v61  ;;  %v532_v3 = vadd.f32 %v531_v54, %v379_v45  ;;  %v1136_v4 = vadd.f32 %v854_v63, %v1054_v56  ;;  %v463_v5 = vpop.f32.mrb[11].mxu1 }
 0x112   : > { %503 = vst [vmem:[%s1061_s10 + $0x58] sm:$0xff] %v389_v60  ;;  %v1140_v6 = vadd.f32 %v1054_v56, %v463_v5  ;;  %v572_v13 = vmul.f32 %v389_v60, %v389_v60  ;;  %v579_v54 = vmul.f32 %v1084_v12, %v1084_v12 }
 0x113   : > { %502 = vst [vmem:[%s1061_s10 + $0x50] sm:$0xff] %v384_v2  ;;  %v533_v7 = vadd.f32 %v532_v3, %v384_v2  ;;  %v571_v8 = vmul.f32 %v384_v2, %v384_v2  ;;  %v601_v9 = vadd.f32 %v600_v0, %v570_v59  ;;  %v833_v11 = vpop.f32.mrb[12].mxu0  ;;  %519 = vst [vmem:[%s1061_s10 + $0xd8] sm:$0xff] %v1136_v4 }
 0x114   : > { %v399_v14 = vadd.f32 %v833_v11, %v1054_v56  ;;  %v393_v15 = vpop.f32.mrb[13].mxu0  ;;  %518 = vst [vmem:[%s1061_s10 + $0xd0] sm:$0xff] %v1140_v6  ;;  %v857_v16 = vpop.f32.mrb[12].mxu1 }
 0x115   : > { %v602_v17 = vadd.f32 %v601_v9, %v571_v8  ;;  %v394_v18 = vadd.f32 %v1054_v56, %v393_v15  ;;  %v534_v19 = vadd.f32 %v533_v7, %v389_v60  ;;  %v1150_v20 = vadd.f32 %v857_v16, %v1054_v56  ;;  %v473_v21 = vpop.f32.mrb[13].mxu1 }
 0x116   : > { %505 = vst [vmem:[%s1061_s10 + $0x68] sm:$0xff] %v399_v14  ;;  %v1154_v22 = vadd.f32 %v1054_v56, %v473_v21  ;;  %v574_v29 = vmul.f32 %v399_v14, %v399_v14 }
 0x117   : > { %504 = vst [vmem:[%s1061_s10 + $0x60] sm:$0xff] %v394_v18  ;;  %v535_v24 = vadd.f32 %v534_v19, %v394_v18  ;;  %v573_v26 = vmul.f32 %v394_v18, %v394_v18  ;;  %v603_v27 = vadd.f32 %v602_v17, %v572_v13  ;;  %v836_v28 = vpop.f32.mrb[14].mxu0  ;;  %521 = vst [vmem:[%s1061_s10 + $0xe8] sm:$0xff] %v1150_v20 }
 0x118   : > { %v409_v30 = vadd.f32 %v836_v28, %v1054_v56  ;;  %v403_v31 = vpop.f32.mrb[15].mxu0  ;;  %520 = vst [vmem:[%s1061_s10 + $0xe0] sm:$0xff] %v1154_v22  ;;  %v860_v32 = vpop.f32.mrb[14].mxu1  ;;  %v589_v18 = vmul.f32 %v1154_v22, %v1154_v22 }
 0x119   : > { %v604_v33 = vadd.f32 %v603_v27, %v573_v26  ;;  %v404_v34 = vadd.f32 %v1054_v56, %v403_v31  ;;  %v536_v35 = vadd.f32 %v535_v24, %v399_v14  ;;  %v489_v36 = vadd.f32 %v860_v32, %v1054_v56  ;;  %v483_v38 = vpop.f32.mrb[15].mxu1 }
 0x11a   : > { %507 = vst [vmem:[%s1061_s10 + $0x78] sm:$0xff] %v409_v30  ;;  %v484_v40 = vadd.f32 %v1054_v56, %v483_v38  ;;  %v576_v44 = vmul.f32 %v409_v30, %v409_v30 }
 0x11b   : > { %506 = vst [vmem:[%s1061_s10 + $0x70] sm:$0xff] %v404_v34  ;;  %v537_v41 = vadd.f32 %v536_v35, %v404_v34  ;;  %v575_v42 = vmul.f32 %v404_v34, %v404_v34  ;;  %v605_v43 = vadd.f32 %v604_v33, %v574_v29  ;;  %523 = vst [vmem:[%s1061_s10 + $0xf8] sm:$0xff] %v489_v36 }
 0x11c   : > { %522 = vst [vmem:[%s1061_s10 + $0xf0] sm:$0xff] %v484_v40  ;;  %v591_v26 = vmul.f32 %v484_v40, %v484_v40  ;;  %v592_v29 = vmul.f32 %v489_v36, %v489_v36 }
 0x11d   : > { %v606_v45 = vadd.f32 %v605_v43, %v575_v42  ;;  %v538_v46 = vadd.f32 %v537_v41, %v409_v30 }
 0x11f   : > { %v539_v48 = vadd.f32 %v538_v46, %v1070_v1  ;;  %v607_v49 = vadd.f32 %v606_v45, %v576_v44  ;;  %v581_v1 = vmul.f32 %v1098_v25, %v1098_v25 }
 0x121   : > { %v608_v52 = vadd.f32 %v607_v49, %v577_v47  ;;  %v540_v56 = vadd.f32 %v539_v48, %v1066_v62  ;;  %v582_v62 = vmul.f32 %v1094_v23, %v1094_v23 }
 0x123   : > { %v541_v55 = vadd.f32 %v540_v56, %v1084_v12  ;;  %v609_v57 = vadd.f32 %v608_v52, %v578_v50  ;;  %v583_v12 = vmul.f32 %v1112_v39, %v1112_v39 }
 0x125   : > { %v610_v59 = vadd.f32 %v609_v57, %v579_v54  ;;  %v542_v60 = vadd.f32 %v541_v55, %v1080_v10  ;;  %v584_v10 = vmul.f32 %v1108_v37, %v1108_v37 }
 0x127   : > { %v543_v61 = vadd.f32 %v542_v60, %v1098_v25  ;;  %v611_v63 = vadd.f32 %v610_v59, %v580_v58  ;;  %v585_v25 = vmul.f32 %v1126_v53, %v1126_v53 }
 0x129   : > { %v612_v0 = vadd.f32 %v611_v63, %v581_v1  ;;  %v544_v2 = vadd.f32 %v543_v61, %v1094_v23  ;;  %v586_v23 = vmul.f32 %v1122_v51, %v1122_v51 }
 0x12b   : > { %v545_v3 = vadd.f32 %v544_v2, %v1112_v39  ;;  %v613_v5 = vadd.f32 %v612_v0, %v582_v62  ;;  %v587_v39 = vmul.f32 %v1140_v6, %v1140_v6 }
 0x12d   : > { %v614_v7 = vadd.f32 %v613_v5, %v583_v12  ;;  %v546_v8 = vadd.f32 %v545_v3, %v1108_v37  ;;  %v588_v37 = vmul.f32 %v1136_v4, %v1136_v4 }
 0x12f   : > { %v547_v9 = vadd.f32 %v546_v8, %v1126_v53  ;;  %v615_v11 = vadd.f32 %v614_v7, %v584_v10 }
 0x131   : > { %v616_v13 = vadd.f32 %v615_v11, %v585_v25  ;;  %v548_v14 = vadd.f32 %v547_v9, %v1122_v51  ;;  %v590_v51 = vmul.f32 %v1150_v20, %v1150_v20 }
 0x133   : > { %v549_v15 = vadd.f32 %v548_v14, %v1140_v6  ;;  %v617_v16 = vadd.f32 %v616_v13, %v586_v23 }
 0x135   : > { %v618_v17 = vadd.f32 %v617_v16, %v587_v39  ;;  %v550_v53 = vadd.f32 %v549_v15, %v1136_v4 }
 0x137   : > { %v551_v19 = vadd.f32 %v550_v53, %v1154_v22  ;;  %v619_v21 = vadd.f32 %v618_v17, %v588_v37 }
 0x139   : > { %v620_v24 = vadd.f32 %v619_v21, %v589_v18  ;;  %v552_v6 = vadd.f32 %v551_v19, %v1150_v20 }
 0x13b   : > { %v553_v27 = vadd.f32 %v552_v6, %v484_v40  ;;  %v621_v28 = vadd.f32 %v620_v24, %v590_v51 }
 0x13d   : > { %v554_v30 = vadd.f32 %v553_v27, %v489_v36  ;;  %v622_v31 = vadd.f32 %v621_v28, %v591_v26 }
 0x13f   : > { %v555_v4 = vrot.slane %v554_v30, 4  ;;  %v623_v32 = vadd.f32 %v622_v31, %v592_v29 }
 0x141   : > { %v556_v33 = vadd.f32 %v555_v4, %v554_v30  ;;  %v624_v34 = vrot.slane %v623_v32, 4 }
 0x143   : > { %v557_v22 = vrot.slane %v556_v33, 2  ;;  %v625_v35 = vadd.f32 %v624_v34, %v623_v32 }
 0x145   : > { %v558_v38 = vadd.f32 %v557_v22, %v556_v33  ;;  %v626_v41 = vrot.slane %v625_v35, 2 }
 0x147   : > { %v559_v42 = vrot.slane %v558_v38, 1  ;;  %v627_v43 = vadd.f32 %v626_v41, %v625_v35 }
 0x149   : > { %v628_v20 = vrot.slane %v627_v43, 1  ;;  %v560_v36 = vadd.f32 %v559_v42, %v558_v38 }
 0x14b   : > { %v629_v40 = vadd.f32 %v628_v20, %v627_v43 }
 0x14d   : > { %v631_v44 = vsel %vm630_vm0, %v560_v36, %v629_v40 }
 0x14e   : > { %632 = vst [vmem:[%s211_s12] sm:$0x3] %v631_v44 }
 0x14f PF: > { %s15_s15 = sadd.s32 1, %s923_s15  }
 0x150   : > { %p12_p5 = scmp.ge.s32.totalorder %s15_s15, 4  }
 0x152   :  { %14 = sbr.rel (!%p12_p5) target bundleno = 1 (0x1), region = 74 }

// kernel: residual_forward.9
= control target key start
LH: loop header
LB: loop body
LE: loop exit
PB: predicated region body
PF: predicated region fallthrough
CT: control target
= control target key end

     0   :  { %s585_s15 = smov 0   ;;  %s786_s0 = inlined_call_operand.vmem [shape: f32[512,128], index: 0, kind: input, shape index: {}]   ;;  %s787_s1 = inlined_call_operand.vmem [shape: f32[512,128], index: 1, kind: input, shape index: {}]   ;;  %s788_s2 = inlined_call_operand.vmem [shape: f32[1,128], index: 2, kind: input, shape index: {}]   ;;  %s789_s3 = inlined_call_operand.vmem [shape: f32[1,128], index: 3, kind: input, shape index: {}]   ;;  %s790_s4 = inlined_call_operand.vmem [shape: f32[512,128], index: 4, kind: output, shape index: {}]  }
   0x1 LB: > { %s529_s16 = sadd.s32 4294967295, %s558_s15   ;;  %p533_p0 = scmp.ge.s32.totalorder %s558_s15, 1  ;;  %s558_s15 = sphi %s585_s15, %s14_s15  }
   0x2   : > { %p174_p1 = scmp.lt.s32.totalorder %s558_s15, 3 }
   0x4   : > { %p175_p2 = pnand %p533_p0, %p174_p1 }
   0x5   : > { %s534_s17 = sshll.u32 (!%p175_p2), %s529_s16, 5  ;;  %v598_v0 = vld [vmem:[%s788_s2] ss:$0 sm:$0xff] (!%p175_p2) }
   0x6   : > { %178 = sbr.rel (%p175_p2) target bundleno = 55 (0x37), region = 36  ;;  %p206_p3 = scmp.lt.s32.totalorder (!%p175_p2), %s534_s17, 63  ;;  %v616_v2 = vld [vmem:[%s789_s3] ss:$0 sm:$0xff] (!%p175_p2) }
   0xd   : > { %s792_s17 = smov (!%p206_p3, %s534_s17), 63 }
   0xe   : > { %s593_s18 = sshll.u32 %s792_s17, 3 }
   0xf   : > { %s604_s23 = scalar_lea.vmem %s786_s0, %s593_s18  ;;  %s610_s26 = scalar_lea.vmem %s787_s1, %s593_s18 }
  0x10   : > { %v223_v1 = vld [vmem:[%s604_s23] sm:$0xff]  ;;  %v224_v3 = vld [vmem:[%s604_s23 + $0x8] sm:$0xff]  ;;  %v225_v7 = vld [vmem:[%s604_s23 + $0x10] sm:$0xff]  ;;  %s646_s5 = scalar_lea.vmem %s790_s4, %s593_s18 }
  0x11   : > { %v262_v4 = vmul.f32 %v598_v0, %v223_v1  ;;  %v333_v5 = vld [vmem:[%s610_s26] sm:$0xff]  ;;  %v263_v6 = vmul.f32 %v598_v0, %v224_v3  ;;  %v334_v8 = vld [vmem:[%s610_s26 + $0x8] sm:$0xff]  ;;  %v264_v9 = vmul.f32 %v598_v0, %v225_v7  ;;  %v226_v10 = vld [vmem:[%s604_s23 + $0x18] sm:$0xff] }
  0x12   : > { %v227_v11 = vld [vmem:[%s604_s23 + $0x20] sm:$0xff]  ;;  %v335_v14 = vld [vmem:[%s610_s26 + $0x10] sm:$0xff]  ;;  %v265_v15 = vmul.f32 %v598_v0, %v226_v10  ;;  %v336_v16 = vld [vmem:[%s610_s26 + $0x18] sm:$0xff] }
  0x13   : > { %v301_v12 = vadd.f32 %v616_v2, %v262_v4  ;;  %v302_v13 = vadd.f32 %v616_v2, %v263_v6  ;;  %v266_v17 = vmul.f32 %v598_v0, %v227_v11  ;;  %v228_v18 = vld [vmem:[%s604_s23 + $0x28] sm:$0xff]  ;;  %v303_v19 = vadd.f32 %v616_v2, %v264_v9  ;;  %v337_v20 = vld [vmem:[%s610_s26 + $0x20] sm:$0xff]  ;;  %v229_v22 = vld [vmem:[%s604_s23 + $0x30] sm:$0xff] }
  0x14   : > { %v267_v21 = vmul.f32 %v598_v0, %v228_v18  ;;  %v230_v23 = vld [vmem:[%s604_s23 + $0x38] sm:$0xff]  ;;  %v304_v26 = vadd.f32 %v616_v2, %v265_v15  ;;  %v338_v28 = vld [vmem:[%s610_s26 + $0x28] sm:$0xff]  ;;  %v268_v31 = vmul.f32 %v598_v0, %v229_v22  ;;  %v231_v33 = vld [vmem:[%s604_s23 + $0x40] sm:$0xff] }
  0x15   : > { %v365_v24 = vadd.f32 %v333_v5, %v301_v12  ;;  %v366_v25 = vadd.f32 %v334_v8, %v302_v13  ;;  %v305_v27 = vadd.f32 %v616_v2, %v266_v17  ;;  %v367_v29 = vadd.f32 %v335_v14, %v303_v19  ;;  %v232_v34 = vld [vmem:[%s604_s23 + $0x48] sm:$0xff]  ;;  %v339_v39 = vld [vmem:[%s610_s26 + $0x30] sm:$0xff]  ;;  %v340_v40 = vld [vmem:[%s610_s26 + $0x38] sm:$0xff] }
  0x16   : > { %v306_v30 = vadd.f32 %v616_v2, %v267_v21  ;;  %v269_v32 = vmul.f32 %v598_v0, %v230_v23  ;;  %v368_v37 = vadd.f32 %v336_v16, %v304_v26  ;;  %v233_v41 = vld [vmem:[%s604_s23 + $0x50] sm:$0xff]  ;;  %v307_v44 = vadd.f32 %v616_v2, %v268_v31  ;;  %v234_v46 = vld [vmem:[%s604_s23 + $0x58] sm:$0xff]  ;;  %v235_v47 = vld [vmem:[%s604_s23 + $0x60] sm:$0xff] }
  0x17   : > { %v397_v35 = vmax.f32 %v365_v24, 0.0  ;;  %v398_v36 = vmax.f32 %v366_v25, 0.0  ;;  %v369_v38 = vadd.f32 %v337_v20, %v305_v27  ;;  %v399_v42 = vmax.f32 %v367_v29, 0.0  ;;  %v236_v52 = vld [vmem:[%s604_s23 + $0x68] sm:$0xff]  ;;  %v341_v56 = vld [vmem:[%s610_s26 + $0x40] sm:$0xff]  ;;  %v343_v61 = vld [vmem:[%s610_s26 + $0x50] sm:$0xff] }
  0x18   : > { %v370_v43 = vadd.f32 %v338_v28, %v306_v30  ;;  %v308_v45 = vadd.f32 %v616_v2, %v269_v32  ;;  %v400_v48 = vmax.f32 %v368_v37, 0.0  ;;  %v270_v50 = vmul.f32 %v598_v0, %v231_v33  ;;  %v342_v57 = vld [vmem:[%s610_s26 + $0x48] sm:$0xff]  ;;  %v237_v1 = vld [vmem:[%s604_s23 + $0x70] sm:$0xff]  ;;  %v238_v3 = vld [vmem:[%s604_s23 + $0x78] sm:$0xff] }
  0x19   : > { %429 = vst [vmem:[%s646_s5] sm:$0xff] %v397_v35  ;;  %430 = vst [vmem:[%s646_s5 + $0x8] sm:$0xff] %v398_v36  ;;  %v401_v49 = vmax.f32 %v369_v38, 0.0  ;;  %v271_v51 = vmul.f32 %v598_v0, %v232_v34  ;;  %v371_v54 = vadd.f32 %v339_v39, %v307_v44  ;;  %v272_v58 = vmul.f32 %v598_v0, %v233_v41  ;;  %v344_v7 = vld [vmem:[%s610_s26 + $0x58] sm:$0xff]  ;;  %v345_v8 = vld [vmem:[%s610_s26 + $0x60] sm:$0xff] }
  0x1a   : > { %431 = vst [vmem:[%s646_s5 + $0x10] sm:$0xff] %v399_v42  ;;  %v402_v53 = vmax.f32 %v370_v43, 0.0  ;;  %v372_v55 = vadd.f32 %v340_v40, %v308_v45  ;;  %432 = vst [vmem:[%s646_s5 + $0x18] sm:$0xff] %v400_v48  ;;  %v309_v59 = vadd.f32 %v616_v2, %v270_v50  ;;  %v273_v62 = vmul.f32 %v598_v0, %v234_v46  ;;  %v346_v14 = vld [vmem:[%s610_s26 + $0x68] sm:$0xff]  ;;  %v239_v19 = vld [vmem:[%s604_s23 + $0x80] sm:$0xff] }
  0x1b   : > { %433 = vst [vmem:[%s646_s5 + $0x20] sm:$0xff] %v401_v49  ;;  %v310_v60 = vadd.f32 %v616_v2, %v271_v51  ;;  %v274_v63 = vmul.f32 %v598_v0, %v235_v47  ;;  %v403_v4 = vmax.f32 %v371_v54, 0.0  ;;  %v311_v6 = vadd.f32 %v616_v2, %v272_v58  ;;  %v240_v20 = vld [vmem:[%s604_s23 + $0x88] sm:$0xff]  ;;  %v347_v25 = vld [vmem:[%s610_s26 + $0x70] sm:$0xff]  ;;  %v348_v26 = vld [vmem:[%s610_s26 + $0x78] sm:$0xff] }
  0x1c   : > { %434 = vst [vmem:[%s646_s5 + $0x28] sm:$0xff] %v402_v53  ;;  %v404_v5 = vmax.f32 %v372_v55, 0.0  ;;  %v275_v9 = vmul.f32 %v598_v0, %v236_v52  ;;  %v373_v10 = vadd.f32 %v341_v56, %v309_v59  ;;  %v312_v12 = vadd.f32 %v616_v2, %v273_v62  ;;  %v241_v27 = vld [vmem:[%s604_s23 + $0x90] sm:$0xff]  ;;  %v242_v32 = vld [vmem:[%s604_s23 + $0x98] sm:$0xff]  ;;  %v243_v33 = vld [vmem:[%s604_s23 + $0xa0] sm:$0xff] }
  0x1d   : > { %v374_v11 = vadd.f32 %v342_v57, %v310_v60  ;;  %v313_v13 = vadd.f32 %v616_v2, %v274_v63  ;;  %435 = vst [vmem:[%s646_s5 + $0x30] sm:$0xff] %v403_v4  ;;  %v375_v15 = vadd.f32 %v343_v61, %v311_v6  ;;  %v276_v17 = vmul.f32 %v598_v0, %v237_v1  ;;  %v244_v38 = vld [vmem:[%s604_s23 + $0xa8] sm:$0xff]  ;;  %v349_v42 = vld [vmem:[%s610_s26 + $0x80] sm:$0xff]  ;;  %v351_v47 = vld [vmem:[%s610_s26 + $0x90] sm:$0xff] }
  0x1e   : > { %436 = vst [vmem:[%s646_s5 + $0x38] sm:$0xff] %v404_v5  ;;  %v314_v16 = vadd.f32 %v616_v2, %v275_v9  ;;  %v277_v18 = vmul.f32 %v598_v0, %v238_v3  ;;  %v405_v21 = vmax.f32 %v373_v10, 0.0  ;;  %v376_v23 = vadd.f32 %v344_v7, %v312_v12  ;;  %v350_v43 = vld [vmem:[%s610_s26 + $0x88] sm:$0xff]  ;;  %v245_v50 = vld [vmem:[%s604_s23 + $0xb0] sm:$0xff]  ;;  %v246_v51 = vld [vmem:[%s604_s23 + $0xb8] sm:$0xff] }
  0x1f   : > { %v406_v22 = vmax.f32 %v374_v11, 0.0  ;;  %v377_v24 = vadd.f32 %v345_v8, %v313_v13  ;;  %v407_v28 = vmax.f32 %v375_v15, 0.0  ;;  %v315_v30 = vadd.f32 %v616_v2, %v276_v17  ;;  %v352_v55 = vld [vmem:[%s610_s26 + $0x98] sm:$0xff]  ;;  %v353_v56 = vld [vmem:[%s610_s26 + $0xa0] sm:$0xff]  ;;  %v354_v62 = vld [vmem:[%s610_s26 + $0xa8] sm:$0xff] }
  0x20   : > { %v378_v29 = vadd.f32 %v346_v14, %v314_v16  ;;  %v316_v31 = vadd.f32 %v616_v2, %v277_v18  ;;  %437 = vst [vmem:[%s646_s5 + $0x40] sm:$0xff] %v405_v21  ;;  %v408_v34 = vmax.f32 %v376_v23, 0.0  ;;  %v278_v36 = vmul.f32 %v598_v0, %v239_v19  ;;  %v247_v5 = vld [vmem:[%s604_s23 + $0xc0] sm:$0xff]  ;;  %v248_v6 = vld [vmem:[%s604_s23 + $0xc8] sm:$0xff]  ;;  %v355_v11 = vld [vmem:[%s610_s26 + $0xb0] sm:$0xff] }
  0x21   : > { %438 = vst [vmem:[%s646_s5 + $0x48] sm:$0xff] %v406_v22  ;;  %v409_v35 = vmax.f32 %v377_v24, 0.0  ;;  %v279_v37 = vmul.f32 %v598_v0, %v240_v20  ;;  %439 = vst [vmem:[%s646_s5 + $0x50] sm:$0xff] %v407_v28  ;;  %v379_v40 = vadd.f32 %v347_v25, %v315_v30  ;;  %v280_v44 = vmul.f32 %v598_v0, %v241_v27  ;;  %v356_v12 = vld [vmem:[%s610_s26 + $0xb8] sm:$0xff]  ;;  %v249_v13 = vld [vmem:[%s604_s23 + $0xd0] sm:$0xff] }
  0x22   : > { %v410_v39 = vmax.f32 %v378_v29, 0.0  ;;  %v380_v41 = vadd.f32 %v348_v26, %v316_v31  ;;  %440 = vst [vmem:[%s646_s5 + $0x58] sm:$0xff] %v408_v34  ;;  %v317_v45 = vadd.f32 %v616_v2, %v278_v36  ;;  %v281_v48 = vmul.f32 %v598_v0, %v242_v32  ;;  %v250_v18 = vld [vmem:[%s604_s23 + $0xd8] sm:$0xff]  ;;  %v251_v19 = vld [vmem:[%s604_s23 + $0xe0] sm:$0xff]  ;;  %v252_v24 = vld [vmem:[%s604_s23 + $0xe8] sm:$0xff] }
  0x23   : > { %441 = vst [vmem:[%s646_s5 + $0x60] sm:$0xff] %v409_v35  ;;  %v318_v46 = vadd.f32 %v616_v2, %v279_v37  ;;  %v282_v49 = vmul.f32 %v598_v0, %v243_v33  ;;  %v411_v52 = vmax.f32 %v379_v40, 0.0  ;;  %v319_v54 = vadd.f32 %v616_v2, %v280_v44  ;;  %v357_v28 = vld [vmem:[%s610_s26 + $0xc0] sm:$0xff]  ;;  %v358_v29 = vld [vmem:[%s610_s26 + $0xc8] sm:$0xff]  ;;  %v359_v33 = vld [vmem:[%s610_s26 + $0xd0] sm:$0xff] }
  0x24   : > { %442 = vst [vmem:[%s646_s5 + $0x68] sm:$0xff] %v410_v39  ;;  %v412_v53 = vmax.f32 %v380_v41, 0.0  ;;  %v283_v57 = vmul.f32 %v598_v0, %v244_v38  ;;  %v381_v58 = vadd.f32 %v349_v42, %v317_v45  ;;  %v320_v60 = vadd.f32 %v616_v2, %v281_v48  ;;  %v253_v36 = vld [vmem:[%s604_s23 + $0xf0] sm:$0xff]  ;;  %v254_v37 = vld [vmem:[%s604_s23 + $0xf8] sm:$0xff]  ;;  %v361_v42 = vld [vmem:[%s610_s26 + $0xe0] sm:$0xff] }
  0x25   : > { %v382_v59 = vadd.f32 %v350_v43, %v318_v46  ;;  %v321_v61 = vadd.f32 %v616_v2, %v282_v49  ;;  %443 = vst [vmem:[%s646_s5 + $0x70] sm:$0xff] %v411_v52  ;;  %v383_v63 = vadd.f32 %v351_v47, %v319_v54  ;;  %v284_v3 = vmul.f32 %v598_v0, %v245_v50  ;;  %v360_v41 = vld [vmem:[%s610_s26 + $0xd8] sm:$0xff]  ;;  %v362_v48 = vld [vmem:[%s610_s26 + $0xe8] sm:$0xff] }
  0x26   : > { %444 = vst [vmem:[%s646_s5 + $0x78] sm:$0xff] %v412_v53  ;;  %v322_v1 = vadd.f32 %v616_v2, %v283_v57  ;;  %v285_v4 = vmul.f32 %v598_v0, %v246_v51  ;;  %v413_v7 = vmax.f32 %v381_v58, 0.0  ;;  %v384_v9 = vadd.f32 %v352_v55, %v320_v60  ;;  %v363_v57 = vld [vmem:[%s610_s26 + $0xf0] sm:$0xff]  ;;  %v364_v58 = vld [vmem:[%s610_s26 + $0xf8] sm:$0xff] }
  0x27   : > { %v414_v8 = vmax.f32 %v382_v59, 0.0  ;;  %v385_v10 = vadd.f32 %v353_v56, %v321_v61  ;;  %v415_v14 = vmax.f32 %v383_v63, 0.0  ;;  %v323_v16 = vadd.f32 %v616_v2, %v284_v3 }
  0x28   : > { %v386_v15 = vadd.f32 %v354_v62, %v322_v1  ;;  %v324_v17 = vadd.f32 %v616_v2, %v285_v4  ;;  %445 = vst [vmem:[%s646_s5 + $0x80] sm:$0xff] %v413_v7  ;;  %v416_v20 = vmax.f32 %v384_v9, 0.0  ;;  %v286_v22 = vmul.f32 %v598_v0, %v247_v5 }
  0x29   : > { %446 = vst [vmem:[%s646_s5 + $0x88] sm:$0xff] %v414_v8  ;;  %v417_v21 = vmax.f32 %v385_v10, 0.0  ;;  %v287_v23 = vmul.f32 %v598_v0, %v248_v6  ;;  %447 = vst [vmem:[%s646_s5 + $0x90] sm:$0xff] %v415_v14  ;;  %v387_v26 = vadd.f32 %v355_v11, %v323_v16  ;;  %v288_v30 = vmul.f32 %v598_v0, %v249_v13 }
  0x2a   : > { %v418_v25 = vmax.f32 %v386_v15, 0.0  ;;  %v388_v27 = vadd.f32 %v356_v12, %v324_v17  ;;  %448 = vst [vmem:[%s646_s5 + $0x98] sm:$0xff] %v416_v20  ;;  %v325_v31 = vadd.f32 %v616_v2, %v286_v22  ;;  %v289_v34 = vmul.f32 %v598_v0, %v250_v18 }
  0x2b   : > { %449 = vst [vmem:[%s646_s5 + $0xa0] sm:$0xff] %v417_v21  ;;  %v326_v32 = vadd.f32 %v616_v2, %v287_v23  ;;  %v290_v35 = vmul.f32 %v598_v0, %v251_v19  ;;  %v419_v38 = vmax.f32 %v387_v26, 0.0  ;;  %v327_v40 = vadd.f32 %v616_v2, %v288_v30 }
  0x2c   : > { %450 = vst [vmem:[%s646_s5 + $0xa8] sm:$0xff] %v418_v25  ;;  %v420_v39 = vmax.f32 %v388_v27, 0.0  ;;  %v291_v43 = vmul.f32 %v598_v0, %v252_v24  ;;  %v389_v44 = vadd.f32 %v357_v28, %v325_v31  ;;  %v328_v46 = vadd.f32 %v616_v2, %v289_v34 }
  0x2d   : > { %v390_v45 = vadd.f32 %v358_v29, %v326_v32  ;;  %v329_v47 = vadd.f32 %v616_v2, %v290_v35  ;;  %451 = vst [vmem:[%s646_s5 + $0xb0] sm:$0xff] %v419_v38  ;;  %v391_v49 = vadd.f32 %v359_v33, %v327_v40  ;;  %v292_v51 = vmul.f32 %v598_v0, %v253_v36 }
  0x2e   : > { %452 = vst [vmem:[%s646_s5 + $0xb8] sm:$0xff] %v420_v39  ;;  %v330_v50 = vadd.f32 %v616_v2, %v291_v43  ;;  %v293_v52 = vmul.f32 %v598_v0, %v254_v37  ;;  %v421_v53 = vmax.f32 %v389_v44, 0.0  ;;  %v392_v55 = vadd.f32 %v360_v41, %v328_v46 }
  0x2f   : > { %v422_v54 = vmax.f32 %v390_v45, 0.0  ;;  %v393_v56 = vadd.f32 %v361_v42, %v329_v47  ;;  %v423_v59 = vmax.f32 %v391_v49, 0.0  ;;  %v331_v61 = vadd.f32 %v616_v2, %v292_v51 }
  0x30   : > { %v394_v60 = vadd.f32 %v362_v48, %v330_v50  ;;  %v332_v62 = vadd.f32 %v616_v2, %v293_v52  ;;  %453 = vst [vmem:[%s646_s5 + $0xc0] sm:$0xff] %v421_v53  ;;  %v424_v0 = vmax.f32 %v392_v55, 0.0 }
  0x31   : > { %454 = vst [vmem:[%s646_s5 + $0xc8] sm:$0xff] %v422_v54  ;;  %v425_v63 = vmax.f32 %v393_v56, 0.0  ;;  %455 = vst [vmem:[%s646_s5 + $0xd0] sm:$0xff] %v423_v59  ;;  %v395_v3 = vadd.f32 %v363_v57, %v331_v61 }
  0x32   : > { %v426_v1 = vmax.f32 %v394_v60, 0.0  ;;  %v396_v4 = vadd.f32 %v364_v58, %v332_v62  ;;  %456 = vst [vmem:[%s646_s5 + $0xd8] sm:$0xff] %v424_v0 }
  0x33   : > { %457 = vst [vmem:[%s646_s5 + $0xe0] sm:$0xff] %v425_v63  ;;  %v427_v5 = vmax.f32 %v395_v3, 0.0 }
  0x34   : > { %458 = vst [vmem:[%s646_s5 + $0xe8] sm:$0xff] %v426_v1  ;;  %v428_v6 = vmax.f32 %v396_v4, 0.0 }
  0x35   : > { %459 = vst [vmem:[%s646_s5 + $0xf0] sm:$0xff] %v427_v5 }
  0x36   : > { %460 = vst [vmem:[%s646_s5 + $0xf8] sm:$0xff] %v428_v6 }
  0x37 PF: > { %s14_s15 = sadd.s32 1, %s558_s15  }
  0x38   : > { %p11_p4 = scmp.ge.s32.totalorder %s14_s15, 4  }
  0x3a   :  { %13 = sbr.rel (!%p11_p4) target bundleno = 1 (0x1), region = 69 }

// kernel: residual_forward.8
= control target key start
LH: loop header
LB: loop body
LE: loop exit
PB: predicated region body
PF: predicated region fallthrough
CT: control target
= control target key end

     0   :  { %s1126_s21 = smov 0   ;;  %s1469_s0 = inlined_call_operand.vmem [shape: f32[512,128], index: 0, kind: input, shape index: {}]   ;;  %s1470_s1 = inlined_call_operand.vmem [shape: f32[1,128], index: 1, kind: input, shape index: {}]   ;;  %s1471_s2 = inlined_call_operand.vmem [shape: f32[1,128], index: 2, kind: input, shape index: {}]   ;;  %s1472_s3 = inlined_call_operand.vmem [shape: f32[128,128], index: 3, kind: input, shape index: {}]   ;;  %s1473_s4 = inlined_call_operand.vmem [shape: f32[1,128], index: 4, kind: input, shape index: {}]   ;;  %s1474_s5 = inlined_call_operand.vmem [shape: f32[512,128], index: 5, kind: output, shape index: {0}]   ;;  %s1475_s6 = inlined_call_operand.vmem [shape: f32[2,2,128], index: 6, kind: output, shape index: {1}]  }
   0x1 LB: > { %s1132_s22 = sadd.s32 4294967295, %s1089_s21   ;;  %p888_p0 = scmp.ge.s32.totalorder %s1089_s21, 1  ;;  %s1089_s21 = sphi %s1126_s21, %s17_s21  }
   0x2   : > { %p216_p1 = scmp.lt.s32.totalorder %s1089_s21, 3 }
   0x4   : > { %p217_p2 = pnand %p888_p0, %p216_p1 }
   0x5   : > { %v408_v0 = vld [vmem:[%s1472_s3] sm:$0xff] (!%p217_p2)  ;;  %v409_v1 = vld [vmem:[%s1472_s3 + $0x8] sm:$0xff] (!%p217_p2)  ;;  %v410_v2 = vld [vmem:[%s1472_s3 + $0x10] sm:$0xff] (!%p217_p2)  ;;  %s889_s29 = sshll.u32 (!%p217_p2), %s1132_s22, 5  ;;  %p262_p4 = scmp.lt.s32.totalorder (!%p217_p2), %s1132_s22, 1  ;;  %vm794_vm0 = vcmask (!%p217_p2), 1040384  }
   0x6   : > { %220 = sbr.rel (%p217_p2) target bundleno = 335 (0x14f), region = 40  ;;  %v1027_v3 = vpack.c.bf16 (!%p217_p2), %v409_v1, %v408_v0  ;;  %v411_v4 = vld [vmem:[%s1472_s3 + $0x18] sm:$0xff] (!%p217_p2)  ;;  %p251_p3 = scmp.lt.s32.totalorder (!%p217_p2), %s889_s29, 63  ;;  %v412_v6 = vld [vmem:[%s1472_s3 + $0x20] sm:$0xff] (!%p217_p2)  ;;  %v413_v7 = vld [vmem:[%s1472_s3 + $0x28] sm:$0xff] (!%p217_p2) }
   0x7   : > { %v1031_v5 = vpack.c.bf16 (!%p217_p2), %v411_v4, %v410_v2  ;;  %v1035_v8 = vpack.c.bf16 (!%p217_p2), %v413_v7, %v412_v6  ;;  %v1161_v9 = vld [vmem:[%s1470_s1] ss:$0 sm:$0xff] (!%p217_p2)  ;;  %v414_v10 = vld [vmem:[%s1472_s3 + $0x30] sm:$0xff] (!%p217_p2)  ;;  %v415_v11 = vld [vmem:[%s1472_s3 + $0x38] sm:$0xff] (!%p217_p2) }
   0x8   : > { %1028 = vmatprep.subr.bf16.mxu0 (!%p217_p2), %v1027_v3  ;;  %1059 = vmatprep.subr.bf16.mxu1 (!%p217_p2), %v1027_v3  ;;  %v1180_v13 = vld [vmem:[%s1471_s2] ss:$0 sm:$0xff] (!%p217_p2)  ;;  %v1039_v15 = vpack.c.bf16 (!%p217_p2), %v415_v11, %v414_v10  ;;  %v417_v17 = vld [vmem:[%s1472_s3 + $0x48] sm:$0xff] (!%p217_p2)  ;;  %v418_v21 = vld [vmem:[%s1472_s3 + $0x50] sm:$0xff] (!%p217_p2) }
   0x9   : > { %1030 = vmatpush3.bf16.msra.mxu0 (!%p217_p2), %v1027_v3  ;;  %1067 = vmatpush3.bf16.msra.mxu1 (!%p217_p2), %v1027_v3  ;;  %v416_v16 = vld [vmem:[%s1472_s3 + $0x40] sm:$0xff] (!%p217_p2)  ;;  %v419_v22 = vld [vmem:[%s1472_s3 + $0x58] sm:$0xff] (!%p217_p2)  ;;  %v421_v26 = vld [vmem:[%s1472_s3 + $0x68] sm:$0xff] (!%p217_p2) }
   0xa   : > { %1032 = vmatprep.subr.bf16.mxu0 (!%p217_p2), %v1031_v5  ;;  %1060 = vmatprep.subr.bf16.mxu1 (!%p217_p2), %v1031_v5  ;;  %v1043_v20 = vpack.c.bf16 (!%p217_p2), %v417_v17, %v416_v16  ;;  %v1047_v23 = vpack.c.bf16 (!%p217_p2), %v419_v22, %v418_v21  ;;  %v420_v25 = vld [vmem:[%s1472_s3 + $0x60] sm:$0xff] (!%p217_p2)  ;;  %v422_v33 = vld [vmem:[%s1472_s3 + $0x70] sm:$0xff] (!%p217_p2)  ;;  %v423_v34 = vld [vmem:[%s1472_s3 + $0x78] sm:$0xff] (!%p217_p2) }
   0xb   : > { %v1051_v30 = vpack.c.bf16 (!%p217_p2), %v421_v26, %v420_v25  ;;  %v1055_v44 = vpack.c.bf16 (!%p217_p2), %v423_v34, %v422_v33 }
   0xd   : > { %s1477_s29 = smov (!%p251_p3, %s889_s29), 63  ;;  %1034 = vmatpush3.bf16.msra.mxu0 %v1031_v5  ;;  %1068 = vmatpush3.bf16.msra.mxu1 %v1031_v5  ;;  %s1479_s22 = smov (!%p262_p4, %s1132_s22), 1 }
   0xe   : > { %s890_s12 = sshll.u32 %s1477_s29, 3  ;;  %1036 = vmatprep.subr.bf16.mxu0 %v1035_v8  ;;  %1061 = vmatprep.subr.bf16.mxu1 %v1035_v8  ;;  %s893_s29 = sshll.u32 %s1479_s22, 1 }
   0xf   : > { %s1174_s23 = scalar_lea.vmem %s1469_s0, %s890_s12  ;;  %s1311_s26 = scalar_lea.vmem %s1474_s5, %s890_s12 }
  0x10   : > { %v266_v12 = vld [vmem:[%s1174_s23] sm:$0xff]  ;;  %v267_v27 = vld [vmem:[%s1174_s23 + $0x8] sm:$0xff]  ;;  %v268_v31 = vld [vmem:[%s1174_s23 + $0x10] sm:$0xff]  ;;  %s265_s28 = scalar_lea.vmem %s1475_s6, %s893_s29 }
  0x11   : > { %v305_v14 = vmul.f32 %v1161_v9, %v266_v12  ;;  %1038 = vmatpush3.bf16.msra.mxu0 %v1035_v8  ;;  %1069 = vmatpush3.bf16.msra.mxu1 %v1035_v8  ;;  %v282_v24 = vld [vmem:[%s1174_s23 + $0x80] sm:$0xff]  ;;  %v283_v29 = vld [vmem:[%s1174_s23 + $0x88] sm:$0xff]  ;;  %v284_v32 = vld [vmem:[%s1174_s23 + $0x90] sm:$0xff]  ;;  %v306_v36 = vmul.f32 %v1161_v9, %v267_v27  ;;  %v307_v40 = vmul.f32 %v1161_v9, %v268_v31 }
  0x12   : > { %1040 = vmatprep.subr.bf16.mxu0 %v1039_v15  ;;  %1062 = vmatprep.subr.bf16.mxu1 %v1039_v15  ;;  %v321_v28 = vmul.f32 %v1161_v9, %v282_v24  ;;  %v269_v37 = vld [vmem:[%s1174_s23 + $0x18] sm:$0xff]  ;;  %v270_v38 = vld [vmem:[%s1174_s23 + $0x20] sm:$0xff]  ;;  %v322_v39 = vmul.f32 %v1161_v9, %v283_v29  ;;  %v323_v42 = vmul.f32 %v1161_v9, %v284_v32  ;;  %v271_v49 = vld [vmem:[%s1174_s23 + $0x28] sm:$0xff] }
  0x13   : > { %v344_v18 = vadd.f32 %v1180_v13, %v305_v14  ;;  %v285_v43 = vld [vmem:[%s1174_s23 + $0x98] sm:$0xff]  ;;  %v286_v45 = vld [vmem:[%s1174_s23 + $0xa0] sm:$0xff]  ;;  %v308_v46 = vmul.f32 %v1161_v9, %v269_v37  ;;  %v309_v47 = vmul.f32 %v1161_v9, %v270_v38  ;;  %v345_v48 = vadd.f32 %v1180_v13, %v306_v36  ;;  %v272_v50 = vld [vmem:[%s1174_s23 + $0x30] sm:$0xff] }
  0x14   : > { %v360_v35 = vadd.f32 %v1180_v13, %v321_v28  ;;  %v361_v51 = vadd.f32 %v1180_v13, %v322_v39  ;;  %v324_v52 = vmul.f32 %v1161_v9, %v285_v43  ;;  %v346_v53 = vadd.f32 %v1180_v13, %v307_v40  ;;  %v287_v56 = vld [vmem:[%s1174_s23 + $0xa8] sm:$0xff]  ;;  %v288_v57 = vld [vmem:[%s1174_s23 + $0xb0] sm:$0xff]  ;;  %v273_v63 = vld [vmem:[%s1174_s23 + $0x38] sm:$0xff] }
  0x15   : > { %v376_v19 = vmax.f32 %v344_v18, 0.0  ;;  %1042 = vmatpush3.bf16.msra.mxu0 %v1039_v15  ;;  %1070 = vmatpush3.bf16.msra.mxu1 %v1039_v15  ;;  %v362_v54 = vadd.f32 %v1180_v13, %v323_v42  ;;  %v325_v55 = vmul.f32 %v1161_v9, %v286_v45  ;;  %v347_v58 = vadd.f32 %v1180_v13, %v308_v46  ;;  %v289_v7 = vld [vmem:[%s1174_s23 + $0xb8] sm:$0xff]  ;;  %v274_v8 = vld [vmem:[%s1174_s23 + $0x40] sm:$0xff]  ;;  %v275_v17 = vld [vmem:[%s1174_s23 + $0x48] sm:$0xff] }
  0x16   : > { %1044 = vmatprep.subr.bf16.mxu0 %v1043_v20  ;;  %1063 = vmatprep.subr.bf16.mxu1 %v1043_v20  ;;  %v392_v41 = vmax.f32 %v360_v35, 0.0  ;;  %v348_v59 = vadd.f32 %v1180_v13, %v309_v47  ;;  %v310_v60 = vmul.f32 %v1161_v9, %v271_v49  ;;  %v311_v61 = vmul.f32 %v1161_v9, %v272_v50  ;;  %v290_v10 = vld [vmem:[%s1174_s23 + $0xc0] sm:$0xff]  ;;  %v276_v22 = vld [vmem:[%s1174_s23 + $0x50] sm:$0xff]  ;;  %v291_v26 = vld [vmem:[%s1174_s23 + $0xc8] sm:$0xff] }
  0x17   : > { %979 = vmatprep.mubr.f32.mxu0 %v376_v19  ;;  %v377_v62 = vmax.f32 %v345_v48, 0.0  ;;  %v393_v0 = vmax.f32 %v361_v51, 0.0  ;;  %v363_v1 = vadd.f32 %v1180_v13, %v324_v52  ;;  %v326_v2 = vmul.f32 %v1161_v9, %v287_v56  ;;  %v292_v27 = vld [vmem:[%s1174_s23 + $0xd0] sm:$0xff]  ;;  %v277_v33 = vld [vmem:[%s1174_s23 + $0x58] sm:$0xff]  ;;  %v278_v34 = vld [vmem:[%s1174_s23 + $0x60] sm:$0xff] }
  0x18   : > { %1003 = vmatprep.mubr.f32.mxu1 %v392_v41  ;;  %v378_v3 = vmax.f32 %v346_v53, 0.0  ;;  %v394_v4 = vmax.f32 %v362_v54, 0.0  ;;  %v364_v5 = vadd.f32 %v1180_v13, %v325_v55  ;;  %v327_v6 = vmul.f32 %v1161_v9, %v288_v57  ;;  %v293_v42 = vld [vmem:[%s1174_s23 + $0xd8] sm:$0xff]  ;;  %v294_v43 = vld [vmem:[%s1174_s23 + $0xe0] sm:$0xff]  ;;  %v279_v49 = vld [vmem:[%s1174_s23 + $0x68] sm:$0xff] }
  0x19   : > { %1046 = vmatpush3.bf16.msra.mxu0 %v1043_v20  ;;  %1071 = vmatpush3.bf16.msra.mxu1 %v1043_v20  ;;  %v379_v11 = vmax.f32 %v347_v58, 0.0  ;;  %v349_v12 = vadd.f32 %v1180_v13, %v310_v60  ;;  %v350_v14 = vadd.f32 %v1180_v13, %v311_v61  ;;  %v312_v15 = vmul.f32 %v1161_v9, %v273_v63  ;;  %v295_v57 = vld [vmem:[%s1174_s23 + $0xe8] sm:$0xff]  ;;  %v280_v58 = vld [vmem:[%s1174_s23 + $0x70] sm:$0xff] }
  0x1a   : > { %1048 = vmatprep.subr.bf16.mxu0 %v1047_v23  ;;  %1064 = vmatprep.subr.bf16.mxu1 %v1047_v23  ;;  %v380_v16 = vmax.f32 %v348_v59, 0.0  ;;  %v395_v18 = vmax.f32 %v363_v1, 0.0  ;;  %v365_v19 = vadd.f32 %v1180_v13, %v326_v2  ;;  %v328_v20 = vmul.f32 %v1161_v9, %v289_v7  ;;  %v296_v59 = vld [vmem:[%s1174_s23 + $0xf0] sm:$0xff] }
  0x1b   : > { %v313_v21 = vmul.f32 %v1161_v9, %v274_v8  ;;  %v366_v24 = vadd.f32 %v1180_v13, %v327_v6  ;;  %v329_v25 = vmul.f32 %v1161_v9, %v290_v10  ;;  %v381_v28 = vmax.f32 %v349_v12, 0.0  ;;  %v297_v10 = vld [vmem:[%s1174_s23 + $0xf8] sm:$0xff] }
  0x1c   : > { %v382_v29 = vmax.f32 %v350_v14, 0.0  ;;  %v314_v31 = vmul.f32 %v1161_v9, %v275_v17  ;;  %v315_v32 = vmul.f32 %v1161_v9, %v276_v22  ;;  %v397_v35 = vmax.f32 %v365_v19, 0.0 }
  0x1d   : > { %1050 = vmatpush3.bf16.msra.mxu0 %v1047_v23  ;;  %1072 = vmatpush3.bf16.msra.mxu1 %v1047_v23  ;;  %v396_v23 = vmax.f32 %v364_v5, 0.0  ;;  %v367_v36 = vadd.f32 %v1180_v13, %v328_v20  ;;  %v330_v37 = vmul.f32 %v1161_v9, %v291_v26  ;;  %v352_v38 = vadd.f32 %v1180_v13, %v313_v21  ;;  %v281_v5 = vld [vmem:[%s1174_s23 + $0x78] sm:$0xff] }
  0x1e   : > { %1052 = vmatprep.subr.bf16.mxu0 %v1051_v30  ;;  %1065 = vmatprep.subr.bf16.mxu1 %v1051_v30  ;;  %v398_v39 = vmax.f32 %v366_v24, 0.0  ;;  %v368_v40 = vadd.f32 %v1180_v13, %v329_v25  ;;  %v331_v41 = vmul.f32 %v1161_v9, %v292_v27  ;;  %v353_v45 = vadd.f32 %v1180_v13, %v314_v31 }
  0x1f   : > { %v316_v46 = vmul.f32 %v1161_v9, %v277_v33  ;;  %v317_v47 = vmul.f32 %v1161_v9, %v278_v34  ;;  %v354_v48 = vadd.f32 %v1180_v13, %v315_v32  ;;  %v399_v50 = vmax.f32 %v367_v36, 0.0 }
  0x20   : > { %v369_v51 = vadd.f32 %v1180_v13, %v330_v37  ;;  %v332_v52 = vmul.f32 %v1161_v9, %v293_v42  ;;  %v384_v53 = vmax.f32 %v352_v38, 0.0  ;;  %v400_v54 = vmax.f32 %v368_v40, 0.0 }
  0x21   : > { %1054 = vmatpush3.bf16.msra.mxu0 %v1051_v30  ;;  %1073 = vmatpush3.bf16.msra.mxu1 %v1051_v30  ;;  %v351_v30 = vadd.f32 %v1180_v13, %v312_v15  ;;  %v370_v55 = vadd.f32 %v1180_v13, %v331_v41  ;;  %v333_v56 = vmul.f32 %v1161_v9, %v294_v43  ;;  %v385_v60 = vmax.f32 %v353_v45, 0.0 }
  0x22   : > { %1056 = vmatprep.subr.bf16.mxu0 %v1055_v44  ;;  %1066 = vmatprep.subr.bf16.mxu1 %v1055_v44  ;;  %v355_v61 = vadd.f32 %v1180_v13, %v316_v46  ;;  %v318_v63 = vmul.f32 %v1161_v9, %v279_v49  ;;  %v401_v1 = vmax.f32 %v369_v51, 0.0  ;;  %v371_v2 = vadd.f32 %v1180_v13, %v332_v52 }
  0x23   : > { %v402_v6 = vmax.f32 %v370_v55, 0.0  ;;  %v372_v7 = vadd.f32 %v1180_v13, %v333_v56  ;;  %v335_v8 = vmul.f32 %v1161_v9, %v296_v59  ;;  %v320_v14 = vmul.f32 %v1161_v9, %v281_v5 }
  0x24   : > { %v357_v12 = vadd.f32 %v1180_v13, %v318_v63  ;;  %v403_v15 = vmax.f32 %v371_v2, 0.0  ;;  %v336_v17 = vmul.f32 %v1161_v9, %v297_v10 }
  0x25   : > { %1058 = vmatpush3.bf16.msra.mxu0 %v1055_v44  ;;  %1074 = vmatpush3.bf16.msra.mxu1 %v1055_v44  ;;  %v383_v44 = vmax.f32 %v351_v30, 0.0  ;;  %v404_v20 = vmax.f32 %v372_v7, 0.0  ;;  %v374_v21 = vadd.f32 %v1180_v13, %v335_v8 }
  0x26   : > { %v389_v22 = vmax.f32 %v357_v12, 0.0  ;;  %v375_v25 = vadd.f32 %v1180_v13, %v336_v17 }
  0x28   : > { %980 = vmatmul.mubr.f32.vlgmr.msra.gmra.mrb[0].mxu0 %v377_v62  ;;  %1004 = vmatmul.mubr.f32.vlgmr.msra.gmra.mrb[0].mxu1 %v393_v0  ;;  %v356_v62 = vadd.f32 %v1180_v13, %v317_v47  ;;  %v386_v0 = vmax.f32 %v354_v48, 0.0 }
  0x29   : > { %982 = vmatprep.mubr.f32.mxu0 %v378_v3  ;;  %1006 = vmatprep.mubr.f32.mxu1 %v394_v4  ;;  %v334_v3 = vmul.f32 %v1161_v9, %v295_v57  ;;  %v319_v4 = vmul.f32 %v1161_v9, %v280_v58  ;;  %v406_v9 = vmax.f32 %v374_v21, 0.0 }
  0x2b   : > { %v358_v19 = vadd.f32 %v1180_v13, %v319_v4 }
  0x2c   : > { %983 = vmatmul.mubr.f32.gmra.mrb[2].mxu0 %v379_v11  ;;  %1007 = vmatmul.mubr.f32.gmra.mrb[2].mxu1 %v395_v18  ;;  %v387_v11 = vmax.f32 %v355_v61, 0.0  ;;  %v388_v18 = vmax.f32 %v356_v62, 0.0 }
  0x2d   : > { %985 = vmatprep.mubr.f32.mxu0 %v380_v16  ;;  %1009 = vmatprep.mubr.f32.mxu1 %v396_v23  ;;  %v373_v16 = vadd.f32 %v1180_v13, %v334_v3  ;;  %v359_v23 = vadd.f32 %v1180_v13, %v320_v14  ;;  %v390_v26 = vmax.f32 %v358_v19, 0.0 }
  0x2f   : > { %v405_v24 = vmax.f32 %v373_v16, 0.0  ;;  %v391_v27 = vmax.f32 %v359_v23, 0.0 }
  0x30   : > { %986 = vmatmul.mubr.f32.gmra.mrb[4].mxu0 %v381_v28  ;;  %1010 = vmatmul.mubr.f32.gmra.mrb[4].mxu1 %v397_v35  ;;  %v407_v28 = vmax.f32 %v375_v25, 0.0 }
  0x31   : > { %988 = vmatprep.mubr.f32.mxu0 %v382_v29  ;;  %1012 = vmatprep.mubr.f32.mxu1 %v398_v39  ;;  %v1304_v29 = vld [vmem:[%s1473_s4] ss:$0 sm:$0xff] }
  0x34   : > { %989 = vmatmul.mubr.f32.gmra.mrb[6].mxu0 %v383_v44  ;;  %1013 = vmatmul.mubr.f32.gmra.mrb[6].mxu1 %v399_v50 }
  0x35   : > { %991 = vmatprep.mubr.f32.mxu0 %v384_v53  ;;  %1015 = vmatprep.mubr.f32.mxu1 %v400_v54 }
  0x38   : > { %992 = vmatmul.mubr.f32.gmra.mrb[8].mxu0 %v385_v60  ;;  %1016 = vmatmul.mubr.f32.gmra.mrb[8].mxu1 %v401_v1 }
  0x39   : > { %994 = vmatprep.mubr.f32.mxu0 %v386_v0  ;;  %1018 = vmatprep.mubr.f32.mxu1 %v402_v6 }
  0x3c   : > { %995 = vmatmul.mubr.f32.gmra.mrb[10].mxu0 %v387_v11  ;;  %1019 = vmatmul.mubr.f32.gmra.mrb[10].mxu1 %v403_v15 }
  0x3d   : > { %997 = vmatprep.mubr.f32.mxu0 %v388_v18  ;;  %1021 = vmatprep.mubr.f32.mxu1 %v404_v20 }
  0x40   : > { %998 = vmatmul.mubr.f32.gmra.mrb[12].mxu0 %v389_v22  ;;  %1022 = vmatmul.mubr.f32.gmra.mrb[12].mxu1 %v405_v24 }
  0x41   : > { %1000 = vmatprep.mubr.f32.mxu0 %v390_v26  ;;  %1024 = vmatprep.mubr.f32.mxu1 %v406_v9 }
  0x44   : > { %1001 = vmatmul.mubr.f32.gmra.mrb[14].mxu0 %v391_v27  ;;  %1025 = vmatmul.mubr.f32.gmra.mrb[14].mxu1 %v407_v28 }
  0xfb   : > { %v981_v13 = vpop.f32.mrb[0].mxu0  ;;  %v1005_v30 = vpop.f32.mrb[0].mxu1 }
  0xfc   : > { %v503_v31 = vadd.f32 %v981_v13, %v1304_v29  ;;  %v497_v32 = vpop.f32.mrb[1].mxu0  ;;  %v1315_v33 = vadd.f32 %v1005_v30, %v1304_v29  ;;  %v577_v34 = vpop.f32.mrb[1].mxu1 }
  0xfd   : > { %v498_v35 = vadd.f32 %v1304_v29, %v497_v32  ;;  %v1319_v36 = vadd.f32 %v1304_v29, %v577_v34 }
  0xfe   : > { %657 = vst [vmem:[%s1311_s26 + $0x8] sm:$0xff] %v503_v31  ;;  %v726_v37 = vmul.f32 %v503_v31, %v503_v31  ;;  %673 = vst [vmem:[%s1311_s26 + $0x88] sm:$0xff] %v1315_v33 }
  0xff   : > { %656 = vst [vmem:[%s1311_s26] sm:$0xff] %v498_v35  ;;  %v688_v38 = vadd.f32 %v503_v31, %v498_v35  ;;  %v725_v39 = vmul.f32 %v498_v35, %v498_v35  ;;  %v984_v40 = vpop.f32.mrb[2].mxu0  ;;  %672 = vst [vmem:[%s1311_s26 + $0x80] sm:$0xff] %v1319_v36  ;;  %v1008_v41 = vpop.f32.mrb[2].mxu1 }
 0x100   : > { %v513_v42 = vadd.f32 %v984_v40, %v1304_v29  ;;  %v507_v43 = vpop.f32.mrb[3].mxu0  ;;  %v1329_v44 = vadd.f32 %v1008_v41, %v1304_v29  ;;  %v587_v45 = vpop.f32.mrb[3].mxu1 }
 0x101   : > { %v757_v46 = vadd.f32 %v726_v37, %v725_v39  ;;  %v508_v47 = vadd.f32 %v1304_v29, %v507_v43  ;;  %v1333_v48 = vadd.f32 %v1304_v29, %v587_v45 }
 0x102   : > { %659 = vst [vmem:[%s1311_s26 + $0x18] sm:$0xff] %v513_v42  ;;  %675 = vst [vmem:[%s1311_s26 + $0x98] sm:$0xff] %v1329_v44  ;;  %v728_v53 = vmul.f32 %v513_v42, %v513_v42 }
 0x103   : > { %658 = vst [vmem:[%s1311_s26 + $0x10] sm:$0xff] %v508_v47  ;;  %v689_v49 = vadd.f32 %v688_v38, %v508_v47  ;;  %v727_v50 = vmul.f32 %v508_v47, %v508_v47  ;;  %v987_v51 = vpop.f32.mrb[4].mxu0  ;;  %674 = vst [vmem:[%s1311_s26 + $0x90] sm:$0xff] %v1333_v48  ;;  %v1011_v52 = vpop.f32.mrb[4].mxu1 }
 0x104   : > { %v523_v54 = vadd.f32 %v987_v51, %v1304_v29  ;;  %v517_v55 = vpop.f32.mrb[5].mxu0  ;;  %v1343_v56 = vadd.f32 %v1011_v52, %v1304_v29  ;;  %v597_v57 = vpop.f32.mrb[5].mxu1 }
 0x105   : > { %v758_v58 = vadd.f32 %v757_v46, %v727_v50  ;;  %v518_v59 = vadd.f32 %v1304_v29, %v517_v55  ;;  %v690_v60 = vadd.f32 %v689_v49, %v513_v42  ;;  %v1347_v61 = vadd.f32 %v1304_v29, %v597_v57 }
 0x106   : > { %661 = vst [vmem:[%s1311_s26 + $0x28] sm:$0xff] %v523_v54  ;;  %677 = vst [vmem:[%s1311_s26 + $0xa8] sm:$0xff] %v1343_v56  ;;  %v730_v3 = vmul.f32 %v523_v54, %v523_v54 }
 0x107   : > { %660 = vst [vmem:[%s1311_s26 + $0x20] sm:$0xff] %v518_v59  ;;  %v691_v62 = vadd.f32 %v690_v60, %v518_v59  ;;  %v729_v63 = vmul.f32 %v518_v59, %v518_v59  ;;  %v759_v0 = vadd.f32 %v758_v58, %v728_v53  ;;  %v990_v1 = vpop.f32.mrb[6].mxu0  ;;  %676 = vst [vmem:[%s1311_s26 + $0xa0] sm:$0xff] %v1347_v61  ;;  %v1014_v2 = vpop.f32.mrb[6].mxu1 }
 0x108   : > { %v533_v4 = vadd.f32 %v990_v1, %v1304_v29  ;;  %v527_v5 = vpop.f32.mrb[7].mxu0  ;;  %v1357_v6 = vadd.f32 %v1014_v2, %v1304_v29  ;;  %v607_v7 = vpop.f32.mrb[7].mxu1 }
 0x109   : > { %v760_v8 = vadd.f32 %v759_v0, %v729_v63  ;;  %v528_v10 = vadd.f32 %v1304_v29, %v527_v5  ;;  %v692_v11 = vadd.f32 %v691_v62, %v523_v54  ;;  %v1361_v12 = vadd.f32 %v1304_v29, %v607_v7 }
 0x10a   : > { %663 = vst [vmem:[%s1311_s26 + $0x38] sm:$0xff] %v533_v4  ;;  %679 = vst [vmem:[%s1311_s26 + $0xb8] sm:$0xff] %v1357_v6  ;;  %v732_v19 = vmul.f32 %v533_v4, %v533_v4 }
 0x10b   : > { %662 = vst [vmem:[%s1311_s26 + $0x30] sm:$0xff] %v528_v10  ;;  %v693_v14 = vadd.f32 %v692_v11, %v528_v10  ;;  %v731_v15 = vmul.f32 %v528_v10, %v528_v10  ;;  %v761_v16 = vadd.f32 %v760_v8, %v730_v3  ;;  %v993_v17 = vpop.f32.mrb[8].mxu0  ;;  %678 = vst [vmem:[%s1311_s26 + $0xb0] sm:$0xff] %v1361_v12  ;;  %v1017_v18 = vpop.f32.mrb[8].mxu1 }
 0x10c   : > { %v543_v20 = vadd.f32 %v993_v17, %v1304_v29  ;;  %v537_v21 = vpop.f32.mrb[9].mxu0  ;;  %v1371_v22 = vadd.f32 %v1017_v18, %v1304_v29  ;;  %v617_v23 = vpop.f32.mrb[9].mxu1 }
 0x10d   : > { %v762_v24 = vadd.f32 %v761_v16, %v731_v15  ;;  %v538_v25 = vadd.f32 %v1304_v29, %v537_v21  ;;  %v694_v26 = vadd.f32 %v693_v14, %v533_v4  ;;  %v1375_v9 = vadd.f32 %v1304_v29, %v617_v23 }
 0x10e   : > { %665 = vst [vmem:[%s1311_s26 + $0x48] sm:$0xff] %v543_v20  ;;  %681 = vst [vmem:[%s1311_s26 + $0xc8] sm:$0xff] %v1371_v22  ;;  %v734_v32 = vmul.f32 %v543_v20, %v543_v20  ;;  %v741_v21 = vmul.f32 %v1319_v36, %v1319_v36 }
 0x10f   : > { %664 = vst [vmem:[%s1311_s26 + $0x40] sm:$0xff] %v538_v25  ;;  %v695_v27 = vadd.f32 %v694_v26, %v538_v25  ;;  %v733_v28 = vmul.f32 %v538_v25, %v538_v25  ;;  %v763_v13 = vadd.f32 %v762_v24, %v732_v19  ;;  %v996_v30 = vpop.f32.mrb[10].mxu0  ;;  %680 = vst [vmem:[%s1311_s26 + $0xc0] sm:$0xff] %v1375_v9  ;;  %v1020_v31 = vpop.f32.mrb[10].mxu1 }
 0x110   : > { %v553_v34 = vadd.f32 %v996_v30, %v1304_v29  ;;  %v547_v35 = vpop.f32.mrb[11].mxu0  ;;  %v1385_v37 = vadd.f32 %v1020_v31, %v1304_v29  ;;  %v627_v38 = vpop.f32.mrb[11].mxu1  ;;  %v742_v25 = vmul.f32 %v1315_v33, %v1315_v33  ;;  %v744_v30 = vmul.f32 %v1329_v44, %v1329_v44 }
 0x111   : > { %v764_v39 = vadd.f32 %v763_v13, %v733_v28  ;;  %v548_v40 = vadd.f32 %v1304_v29, %v547_v35  ;;  %v696_v41 = vadd.f32 %v695_v27, %v543_v20  ;;  %v1389_v42 = vadd.f32 %v1304_v29, %v627_v38 }
 0x112   : > { %667 = vst [vmem:[%s1311_s26 + $0x58] sm:$0xff] %v553_v34  ;;  %683 = vst [vmem:[%s1311_s26 + $0xd8] sm:$0xff] %v1385_v37  ;;  %v736_v50 = vmul.f32 %v553_v34, %v553_v34  ;;  %v743_v27 = vmul.f32 %v1333_v48, %v1333_v48 }
 0x113   : > { %666 = vst [vmem:[%s1311_s26 + $0x50] sm:$0xff] %v548_v40  ;;  %v697_v43 = vadd.f32 %v696_v41, %v548_v40  ;;  %v735_v45 = vmul.f32 %v548_v40, %v548_v40  ;;  %v765_v46 = vadd.f32 %v764_v39, %v734_v32  ;;  %v999_v47 = vpop.f32.mrb[12].mxu0  ;;  %682 = vst [vmem:[%s1311_s26 + $0xd0] sm:$0xff] %v1389_v42  ;;  %v1023_v49 = vpop.f32.mrb[12].mxu1 }
 0x114   : > { %v563_v51 = vadd.f32 %v999_v47, %v1304_v29  ;;  %v557_v52 = vpop.f32.mrb[13].mxu0  ;;  %v1399_v53 = vadd.f32 %v1023_v49, %v1304_v29  ;;  %v637_v54 = vpop.f32.mrb[13].mxu1 }
 0x115   : > { %v766_v55 = vadd.f32 %v765_v46, %v735_v45  ;;  %v558_v57 = vadd.f32 %v1304_v29, %v557_v52  ;;  %v698_v58 = vadd.f32 %v697_v43, %v553_v34  ;;  %v1403_v59 = vadd.f32 %v1304_v29, %v637_v54 }
 0x116   : > { %669 = vst [vmem:[%s1311_s26 + $0x68] sm:$0xff] %v563_v51  ;;  %685 = vst [vmem:[%s1311_s26 + $0xe8] sm:$0xff] %v1399_v53  ;;  %v738_v2 = vmul.f32 %v563_v51, %v563_v51 }
 0x117   : > { %668 = vst [vmem:[%s1311_s26 + $0x60] sm:$0xff] %v558_v57  ;;  %v699_v60 = vadd.f32 %v698_v58, %v558_v57  ;;  %v737_v62 = vmul.f32 %v558_v57, %v558_v57  ;;  %v767_v63 = vadd.f32 %v766_v55, %v736_v50  ;;  %v1002_v0 = vpop.f32.mrb[14].mxu0  ;;  %684 = vst [vmem:[%s1311_s26 + $0xe0] sm:$0xff] %v1403_v59  ;;  %v1026_v1 = vpop.f32.mrb[14].mxu1 }
 0x118   : > { %v573_v3 = vadd.f32 %v1002_v0, %v1304_v29  ;;  %v567_v4 = vpop.f32.mrb[15].mxu0  ;;  %v653_v5 = vadd.f32 %v1026_v1, %v1304_v29  ;;  %v647_v7 = vpop.f32.mrb[15].mxu1  ;;  %v753_v55 = vmul.f32 %v1403_v59, %v1403_v59 }
 0x119   : > { %v768_v8 = vadd.f32 %v767_v63, %v737_v62  ;;  %v568_v10 = vadd.f32 %v1304_v29, %v567_v4  ;;  %v700_v11 = vadd.f32 %v699_v60, %v563_v51  ;;  %v648_v14 = vadd.f32 %v1304_v29, %v647_v7 }
 0x11a   : > { %671 = vst [vmem:[%s1311_s26 + $0x78] sm:$0xff] %v573_v3  ;;  %687 = vst [vmem:[%s1311_s26 + $0xf8] sm:$0xff] %v653_v5  ;;  %v740_v18 = vmul.f32 %v573_v3, %v573_v3  ;;  %v756_v1 = vmul.f32 %v653_v5, %v653_v5 }
 0x11b   : > { %670 = vst [vmem:[%s1311_s26 + $0x70] sm:$0xff] %v568_v10  ;;  %v701_v15 = vadd.f32 %v700_v11, %v568_v10  ;;  %v739_v16 = vmul.f32 %v568_v10, %v568_v10  ;;  %v769_v17 = vadd.f32 %v768_v8, %v738_v2  ;;  %686 = vst [vmem:[%s1311_s26 + $0xf0] sm:$0xff] %v648_v14 }
 0x11c   : > { %v755_v62 = vmul.f32 %v648_v14, %v648_v14 }
 0x11d   : > { %v770_v19 = vadd.f32 %v769_v17, %v739_v16  ;;  %v702_v20 = vadd.f32 %v701_v15, %v573_v3 }
 0x11f   : > { %v703_v23 = vadd.f32 %v702_v20, %v1319_v36  ;;  %v771_v24 = vadd.f32 %v770_v19, %v740_v18  ;;  %v745_v36 = vmul.f32 %v1347_v61, %v1347_v61 }
 0x121   : > { %v772_v29 = vadd.f32 %v771_v24, %v741_v21  ;;  %v704_v26 = vadd.f32 %v703_v23, %v1315_v33  ;;  %v746_v33 = vmul.f32 %v1343_v56, %v1343_v56 }
 0x123   : > { %v705_v28 = vadd.f32 %v704_v26, %v1333_v48  ;;  %v773_v13 = vadd.f32 %v772_v29, %v742_v25  ;;  %v747_v48 = vmul.f32 %v1361_v12, %v1361_v12 }
 0x125   : > { %v774_v31 = vadd.f32 %v773_v13, %v743_v27  ;;  %v706_v32 = vadd.f32 %v705_v28, %v1329_v44  ;;  %v748_v44 = vmul.f32 %v1357_v6, %v1357_v6 }
 0x127   : > { %v707_v34 = vadd.f32 %v706_v32, %v1347_v61  ;;  %v775_v35 = vadd.f32 %v774_v31, %v744_v30  ;;  %v749_v61 = vmul.f32 %v1375_v9, %v1375_v9 }
 0x129   : > { %v776_v38 = vadd.f32 %v775_v35, %v745_v36  ;;  %v708_v39 = vadd.f32 %v707_v34, %v1343_v56  ;;  %v750_v56 = vmul.f32 %v1371_v22, %v1371_v22 }
 0x12b   : > { %v709_v40 = vadd.f32 %v708_v39, %v1361_v12  ;;  %v777_v41 = vadd.f32 %v776_v38, %v746_v33  ;;  %v751_v12 = vmul.f32 %v1389_v42, %v1389_v42 }
 0x12d   : > { %v778_v43 = vadd.f32 %v777_v41, %v747_v48  ;;  %v710_v45 = vadd.f32 %v709_v40, %v1357_v6  ;;  %v752_v6 = vmul.f32 %v1385_v37, %v1385_v37 }
 0x12f   : > { %v711_v46 = vadd.f32 %v710_v45, %v1375_v9  ;;  %v779_v47 = vadd.f32 %v778_v43, %v748_v44 }
 0x131   : > { %v780_v49 = vadd.f32 %v779_v47, %v749_v61  ;;  %v712_v50 = vadd.f32 %v711_v46, %v1371_v22  ;;  %v754_v22 = vmul.f32 %v1399_v53, %v1399_v53 }
 0x133   : > { %v713_v51 = vadd.f32 %v712_v50, %v1389_v42  ;;  %v781_v52 = vadd.f32 %v780_v49, %v750_v56 }
 0x135   : > { %v782_v54 = vadd.f32 %v781_v52, %v751_v12  ;;  %v714_v9 = vadd.f32 %v713_v51, %v1385_v37 }
 0x137   : > { %v715_v57 = vadd.f32 %v714_v9, %v1403_v59  ;;  %v783_v58 = vadd.f32 %v782_v54, %v752_v6 }
 0x139   : > { %v784_v60 = vadd.f32 %v783_v58, %v753_v55  ;;  %v716_v42 = vadd.f32 %v715_v57, %v1399_v53 }
 0x13b   : > { %v717_v63 = vadd.f32 %v716_v42, %v648_v14  ;;  %v785_v0 = vadd.f32 %v784_v60, %v754_v22 }
 0x13d   : > { %v718_v2 = vadd.f32 %v717_v63, %v653_v5  ;;  %v786_v3 = vadd.f32 %v785_v0, %v755_v62 }
 0x13f   : > { %v719_v37 = vrot.slane %v718_v2, 4  ;;  %v787_v4 = vadd.f32 %v786_v3, %v756_v1 }
 0x141   : > { %v720_v7 = vadd.f32 %v719_v37, %v718_v2  ;;  %v788_v8 = vrot.slane %v787_v4, 4 }
 0x143   : > { %v721_v59 = vrot.slane %v720_v7, 2  ;;  %v789_v10 = vadd.f32 %v788_v8, %v787_v4 }
 0x145   : > { %v722_v11 = vadd.f32 %v721_v59, %v720_v7  ;;  %v790_v15 = vrot.slane %v789_v10, 2 }
 0x147   : > { %v723_v16 = vrot.slane %v722_v11, 1  ;;  %v791_v17 = vadd.f32 %v790_v15, %v789_v10 }
 0x149   : > { %v792_v53 = vrot.slane %v791_v17, 1  ;;  %v724_v5 = vadd.f32 %v723_v16, %v722_v11 }
 0x14b   : > { %v793_v14 = vadd.f32 %v792_v53, %v791_v17 }
 0x14d   : > { %v795_v18 = vsel %vm794_vm0, %v724_v5, %v793_v14 }
 0x14e   : > { %796 = vst [vmem:[%s265_s28] sm:$0x3] %v795_v18 }
 0x14f PF: > { %s17_s21 = sadd.s32 1, %s1089_s21  }
 0x150   : > { %p14_p5 = scmp.ge.s32.totalorder %s17_s21, 4  }
 0x152   :  { %16 = sbr.rel (!%p14_p5) target bundleno = 1 (0x1), region = 82 }

// kernel: residual_forward.7
= control target key start
LH: loop header
LB: loop body
LE: loop exit
PB: predicated region body
PF: predicated region fallthrough
CT: control target
= control target key end

     0   :  { %s2616_s15 = smov 0   ;;  %s3955_s0 = inlined_call_operand.vmem [shape: f32[512,1152], index: 0, kind: input, shape index: {}]   ;;  %s3956_s1 = inlined_call_operand.vmem [shape: f32[1152,128], index: 1, kind: input, shape index: {}]   ;;  %s3957_s2 = inlined_call_operand.vmem [shape: f32[1,128], index: 2, kind: input, shape index: {}]   ;;  %s3958_s3 = inlined_call_operand.vmem [shape: f32[512,128], index: 3, kind: output, shape index: {0}]   ;;  %s3959_s4 = inlined_call_operand.vmem [shape: f32[2,2,128], index: 4, kind: output, shape index: {1}]  }
   0x1 LB: > { %s2622_s16 = sadd.s32 4294967295, %s2588_s15   ;;  %p2011_p0 = scmp.ge.s32.totalorder %s2588_s15, 1  ;;  %s2588_s15 = sphi %s2616_s15, %s15_s15  }
   0x2   : > { %p167_p1 = scmp.lt.s32.totalorder %s2588_s15, 3 }
   0x4   : > { %p168_p2 = pnand %p2011_p0, %p167_p1 }
   0x5   : > { %v503_v0 = vld [vmem:[%s3956_s1] sm:$0xff] (!%p168_p2)  ;;  %v504_v1 = vld [vmem:[%s3956_s1 + $0x8] sm:$0xff] (!%p168_p2)  ;;  %v2590_v3 = vmov (!%p168_p2), 0.0|0.0   ;;  %v505_v6 = vld [vmem:[%s3956_s1 + $0x10] sm:$0xff] (!%p168_p2)  ;;  %s2012_s7 = sshll.u32 (!%p168_p2), %s2622_s16, 5  ;;  %p211_p4 = scmp.lt.s32.totalorder (!%p168_p2), %s2622_s16, 1 }
   0x6   : > { %171 = sbr.rel (%p168_p2) target bundleno = 638 (0x27e), region = 32  ;;  %v535_v2 = vld [vmem:[%s3956_s1 + $0x100] sm:$0xff] (!%p168_p2)  ;;  %2148 = vmatprep.subr.bf16.mxu1 (!%p168_p2), %v2590_v3  ;;  %2196 = vmatprep.subr.bf16.mxu0 (!%p168_p2), %v2590_v3  ;;  %v2149_v4 = vpack.c.bf16 (!%p168_p2), %v504_v1, %v503_v0  ;;  %v536_v5 = vld [vmem:[%s3956_s1 + $0x108] sm:$0xff] (!%p168_p2)  ;;  %v506_v7 = vld [vmem:[%s3956_s1 + $0x18] sm:$0xff] (!%p168_p2)  ;;  %p199_p3 = scmp.lt.s32.totalorder (!%p168_p2), %s2012_s7, 63  ;;  %vm1917_vm0 = vcmask (!%p168_p2), 1040384  }
   0x7   : > { %v2197_v8 = vpack.c.bf16 (!%p168_p2), %v536_v5, %v535_v2  ;;  %v537_v9 = vld [vmem:[%s3956_s1 + $0x110] sm:$0xff] (!%p168_p2)  ;;  %v538_v10 = vld [vmem:[%s3956_s1 + $0x118] sm:$0xff] (!%p168_p2)  ;;  %v2152_v11 = vpack.c.bf16 (!%p168_p2), %v506_v7, %v505_v6  ;;  %v507_v13 = vld [vmem:[%s3956_s1 + $0x20] sm:$0xff] (!%p168_p2) }
   0x8   : > { %2150 = vmatpush1.bf16.msra.mxu1 (!%p168_p2), %v2149_v4  ;;  %v2200_v12 = vpack.c.bf16 (!%p168_p2), %v538_v10, %v537_v9  ;;  %v508_v14 = vld [vmem:[%s3956_s1 + $0x28] sm:$0xff] (!%p168_p2)  ;;  %v539_v15 = vld [vmem:[%s3956_s1 + $0x120] sm:$0xff] (!%p168_p2)  ;;  %v509_v19 = vld [vmem:[%s3956_s1 + $0x30] sm:$0xff] (!%p168_p2) }
   0x9   : > { %2198 = vmatpush1.bf16.msra.mxu0 (!%p168_p2), %v2197_v8  ;;  %2151 = vmatprep.subr.bf16.mxu1 (!%p168_p2), %v2590_v3  ;;  %v540_v16 = vld [vmem:[%s3956_s1 + $0x128] sm:$0xff] (!%p168_p2)  ;;  %v2155_v17 = vpack.c.bf16 (!%p168_p2), %v508_v14, %v507_v13  ;;  %v510_v20 = vld [vmem:[%s3956_s1 + $0x38] sm:$0xff] (!%p168_p2)  ;;  %v541_v21 = vld [vmem:[%s3956_s1 + $0x130] sm:$0xff] (!%p168_p2) }
   0xa   : > { %2199 = vmatprep.subr.bf16.mxu0 (!%p168_p2), %v2590_v3  ;;  %v2203_v18 = vpack.c.bf16 (!%p168_p2), %v540_v16, %v539_v15  ;;  %v542_v22 = vld [vmem:[%s3956_s1 + $0x138] sm:$0xff] (!%p168_p2)  ;;  %v2158_v23 = vpack.c.bf16 (!%p168_p2), %v510_v20, %v509_v19  ;;  %v511_v25 = vld [vmem:[%s3956_s1 + $0x40] sm:$0xff] (!%p168_p2)  ;;  %v512_v26 = vld [vmem:[%s3956_s1 + $0x48] sm:$0xff] (!%p168_p2) }
   0xb   : > { %v2206_v24 = vpack.c.bf16 (!%p168_p2), %v542_v22, %v541_v21  ;;  %v543_v27 = vld [vmem:[%s3956_s1 + $0x140] sm:$0xff] (!%p168_p2)  ;;  %v544_v28 = vld [vmem:[%s3956_s1 + $0x148] sm:$0xff] (!%p168_p2)  ;;  %v2161_v29 = vpack.c.bf16 (!%p168_p2), %v512_v26, %v511_v25  ;;  %v513_v31 = vld [vmem:[%s3956_s1 + $0x50] sm:$0xff] (!%p168_p2) }
   0xc   : > { %2153 = vmatpush1.bf16.msra.mxu1 (!%p168_p2), %v2152_v11  ;;  %v2209_v30 = vpack.c.bf16 (!%p168_p2), %v544_v28, %v543_v27  ;;  %v514_v32 = vld [vmem:[%s3956_s1 + $0x58] sm:$0xff] (!%p168_p2)  ;;  %v545_v33 = vld [vmem:[%s3956_s1 + $0x150] sm:$0xff] (!%p168_p2)  ;;  %v515_v37 = vld [vmem:[%s3956_s1 + $0x60] sm:$0xff] (!%p168_p2) }
   0xd   : > { %2201 = vmatpush1.bf16.msra.mxu0 %v2200_v12  ;;  %2154 = vmatprep.subr.bf16.mxu1 %v2590_v3  ;;  %s3961_s7 = smov (!%p199_p3, %s2012_s7), 63  ;;  %v546_v34 = vld [vmem:[%s3956_s1 + $0x158] sm:$0xff]  ;;  %v2164_v35 = vpack.c.bf16 %v514_v32, %v513_v31  ;;  %v516_v38 = vld [vmem:[%s3956_s1 + $0x68] sm:$0xff]  ;;  %v547_v39 = vld [vmem:[%s3956_s1 + $0x160] sm:$0xff]  ;;  %s3963_s16 = smov (!%p211_p4, %s2622_s16), 1 }
   0xe   : > { %2202 = vmatprep.subr.bf16.mxu0 %v2590_v3  ;;  %s2572_s9 = smul.u32 72, %s3961_s7  ;;  %v2212_v36 = vpack.c.bf16 %v546_v34, %v545_v33  ;;  %v548_v40 = vld [vmem:[%s3956_s1 + $0x168] sm:$0xff]  ;;  %v2167_v43 = vpack.c.bf16 %v516_v38, %v515_v37  ;;  %v517_v45 = vld [vmem:[%s3956_s1 + $0x70] sm:$0xff]  ;;  %v518_v46 = vld [vmem:[%s3956_s1 + $0x78] sm:$0xff]  ;;  %s2015_s21 = sshll.u32 %s3961_s7, 3 }
   0xf   : > { %v2215_v44 = vpack.c.bf16 %v548_v40, %v547_v39  ;;  %v549_v47 = vld [vmem:[%s3956_s1 + $0x170] sm:$0xff]  ;;  %v550_v48 = vld [vmem:[%s3956_s1 + $0x178] sm:$0xff]  ;;  %v2170_v49 = vpack.c.bf16 %v518_v46, %v517_v45  ;;  %v519_v51 = vld [vmem:[%s3956_s1 + $0x80] sm:$0xff]  ;;  %s3700_s25 = scalar_lea.vmem %s3958_s3, %s2015_s21  ;;  %s2016_s7 = sshll.u32 %s3963_s16, 1 }
  0x10   : > { %2156 = vmatpush1.bf16.msra.mxu1 %v2155_v17  ;;  %s2715_s22 = scalar_lea.vmem %s3955_s0, %s2572_s9  ;;  %v2218_v50 = vpack.c.bf16 %v550_v48, %v549_v47  ;;  %v520_v52 = vld [vmem:[%s3956_s1 + $0x88] sm:$0xff]  ;;  %v551_v53 = vld [vmem:[%s3956_s1 + $0x180] sm:$0xff]  ;;  %v521_v57 = vld [vmem:[%s3956_s1 + $0x90] sm:$0xff]  ;;  %s214_s28 = scalar_lea.vmem %s3959_s4, %s2016_s7 }
  0x11   : > { %2204 = vmatpush1.bf16.msra.mxu0 %v2203_v18  ;;  %2157 = vmatprep.subr.bf16.mxu1 %v2590_v3  ;;  %v216_v41 = vld [vmem:[%s2715_s22 + $0x8] sm:$0xff]  ;;  %v218_v42 = vld [vmem:[%s2715_s22 + $0x18] sm:$0xff]  ;;  %v2173_v55 = vpack.c.bf16 %v520_v52, %v519_v51  ;;  %v553_v59 = vld [vmem:[%s3956_s1 + $0x190] sm:$0xff] }
  0x12   : > { %2205 = vmatprep.subr.bf16.mxu0 %v2590_v3  ;;  %718 = vmatprep.mubr.f32.mxu1 %v216_v41  ;;  %v552_v54 = vld [vmem:[%s3956_s1 + $0x188] sm:$0xff]  ;;  %v522_v58 = vld [vmem:[%s3956_s1 + $0x98] sm:$0xff]  ;;  %v523_v63 = vld [vmem:[%s3956_s1 + $0xa0] sm:$0xff] }
  0x13   : > { %943 = vmatprep.mubr.f32.mxu0 %v218_v42  ;;  %v2221_v56 = vpack.c.bf16 %v552_v54, %v551_v53  ;;  %v554_v60 = vld [vmem:[%s3956_s1 + $0x198] sm:$0xff]  ;;  %v2176_v61 = vpack.c.bf16 %v522_v58, %v521_v57  ;;  %v524_v0 = vld [vmem:[%s3956_s1 + $0xa8] sm:$0xff]  ;;  %v555_v1 = vld [vmem:[%s3956_s1 + $0x1a0] sm:$0xff] }
  0x14   : > { %2159 = vmatpush1.bf16.msra.mxu1 %v2158_v23  ;;  %v2224_v62 = vpack.c.bf16 %v554_v60, %v553_v59  ;;  %v556_v2 = vld [vmem:[%s3956_s1 + $0x1a8] sm:$0xff]  ;;  %v2179_v4 = vpack.c.bf16 %v524_v0, %v523_v63  ;;  %v525_v6 = vld [vmem:[%s3956_s1 + $0xb0] sm:$0xff]  ;;  %v526_v7 = vld [vmem:[%s3956_s1 + $0xb8] sm:$0xff] }
  0x15   : > { %2207 = vmatpush1.bf16.msra.mxu0 %v2206_v24  ;;  %2160 = vmatprep.subr.bf16.mxu1 %v2590_v3  ;;  %v2227_v5 = vpack.c.bf16 %v556_v2, %v555_v1  ;;  %v557_v8 = vld [vmem:[%s3956_s1 + $0x1b0] sm:$0xff]  ;;  %v558_v9 = vld [vmem:[%s3956_s1 + $0x1b8] sm:$0xff]  ;;  %v2182_v10 = vpack.c.bf16 %v526_v7, %v525_v6  ;;  %v527_v12 = vld [vmem:[%s3956_s1 + $0xc0] sm:$0xff] }
  0x16   : > { %2208 = vmatprep.subr.bf16.mxu0 %v2590_v3  ;;  %v2230_v11 = vpack.c.bf16 %v558_v9, %v557_v8  ;;  %v528_v13 = vld [vmem:[%s3956_s1 + $0xc8] sm:$0xff]  ;;  %v559_v14 = vld [vmem:[%s3956_s1 + $0x1c0] sm:$0xff]  ;;  %v529_v18 = vld [vmem:[%s3956_s1 + $0xd0] sm:$0xff] }
  0x17   : > { %v560_v15 = vld [vmem:[%s3956_s1 + $0x1c8] sm:$0xff]  ;;  %v2185_v16 = vpack.c.bf16 %v528_v13, %v527_v12  ;;  %v530_v19 = vld [vmem:[%s3956_s1 + $0xd8] sm:$0xff]  ;;  %v561_v20 = vld [vmem:[%s3956_s1 + $0x1d0] sm:$0xff] }
  0x18   : > { %2162 = vmatpush1.bf16.msra.mxu1 %v2161_v29  ;;  %v2233_v17 = vpack.c.bf16 %v560_v15, %v559_v14  ;;  %v562_v21 = vld [vmem:[%s3956_s1 + $0x1d8] sm:$0xff]  ;;  %v2188_v22 = vpack.c.bf16 %v530_v19, %v529_v18  ;;  %v531_v24 = vld [vmem:[%s3956_s1 + $0xe0] sm:$0xff]  ;;  %v532_v25 = vld [vmem:[%s3956_s1 + $0xe8] sm:$0xff] }
  0x19   : > { %2210 = vmatpush1.bf16.msra.mxu0 %v2209_v30  ;;  %2163 = vmatprep.subr.bf16.mxu1 %v2590_v3  ;;  %v2236_v23 = vpack.c.bf16 %v562_v21, %v561_v20  ;;  %v563_v26 = vld [vmem:[%s3956_s1 + $0x1e0] sm:$0xff]  ;;  %v564_v27 = vld [vmem:[%s3956_s1 + $0x1e8] sm:$0xff]  ;;  %v2191_v28 = vpack.c.bf16 %v532_v25, %v531_v24  ;;  %v533_v30 = vld [vmem:[%s3956_s1 + $0xf0] sm:$0xff] }
  0x1a   : > { %2211 = vmatprep.subr.bf16.mxu0 %v2590_v3  ;;  %v2239_v29 = vpack.c.bf16 %v564_v27, %v563_v26  ;;  %v534_v31 = vld [vmem:[%s3956_s1 + $0xf8] sm:$0xff]  ;;  %v565_v32 = vld [vmem:[%s3956_s1 + $0x1f0] sm:$0xff]  ;;  %v568_v37 = vld [vmem:[%s3956_s1 + $0x208] sm:$0xff] }
  0x1b   : > { %v566_v33 = vld [vmem:[%s3956_s1 + $0x1f8] sm:$0xff]  ;;  %v2194_v34 = vpack.c.bf16 %v534_v31, %v533_v30  ;;  %v599_v38 = vld [vmem:[%s3956_s1 + $0x300] sm:$0xff]  ;;  %v600_v39 = vld [vmem:[%s3956_s1 + $0x308] sm:$0xff] }
  0x1c   : > { %2165 = vmatpush1.bf16.msra.mxu1 %v2164_v35  ;;  %v2242_v35 = vpack.c.bf16 %v566_v33, %v565_v32  ;;  %v215_v40 = vld [vmem:[%s2715_s22] sm:$0xff]  ;;  %v217_v41 = vld [vmem:[%s2715_s22 + $0x10] sm:$0xff]  ;;  %v570_v46 = vld [vmem:[%s3956_s1 + $0x218] sm:$0xff]  ;;  %v2885_v47 = vpack.c.bf16 %v600_v39, %v599_v38 }
  0x1d   : > { %2213 = vmatpush1.bf16.msra.mxu0 %v2212_v36  ;;  %2166 = vmatprep.subr.bf16.mxu1 %v2590_v3  ;;  %v567_v36 = vld [vmem:[%s3956_s1 + $0x200] sm:$0xff]  ;;  %v569_v45 = vld [vmem:[%s3956_s1 + $0x210] sm:$0xff]  ;;  %v226_v51 = vld [vmem:[%s2715_s22 + $0x58] sm:$0xff] }
  0x1e   : > { %2214 = vmatprep.subr.bf16.mxu0 %v2590_v3  ;;  %v2245_v42 = vpack.c.bf16 %v568_v37, %v567_v36  ;;  %v601_v48 = vld [vmem:[%s3956_s1 + $0x310] sm:$0xff]  ;;  %v234_v52 = vld [vmem:[%s2715_s22 + $0x98] sm:$0xff]  ;;  %v2248_v53 = vpack.c.bf16 %v570_v46, %v569_v45  ;;  %v236_v54 = vld [vmem:[%s2715_s22 + $0xa8] sm:$0xff] }
  0x1f   : > { %v603_v58 = vld [vmem:[%s3956_s1 + $0x320] sm:$0xff]  ;;  %v604_v59 = vld [vmem:[%s3956_s1 + $0x328] sm:$0xff]  ;;  %v233_v60 = vld [vmem:[%s2715_s22 + $0x90] sm:$0xff] }
  0x20   : > { %2168 = vmatpush1.bf16.msra.mxu1 %v2167_v43  ;;  %v225_v43 = vld [vmem:[%s2715_s22 + $0x50] sm:$0xff]  ;;  %v574_v2 = vld [vmem:[%s3956_s1 + $0x238] sm:$0xff]  ;;  %v244_v8 = vld [vmem:[%s2715_s22 + $0xe8] sm:$0xff] }
  0x21   : > { %2216 = vmatpush1.bf16.msra.mxu0 %v2215_v44  ;;  %2169 = vmatprep.subr.bf16.mxu1 %v2590_v3  ;;  %v227_v44 = vld [vmem:[%s2715_s22 + $0x60] sm:$0xff]  ;;  %v245_v0 = vld [vmem:[%s2715_s22 + $0xf0] sm:$0xff]  ;;  %v606_v6 = vld [vmem:[%s3956_s1 + $0x338] sm:$0xff] }
  0x22   : > { %2217 = vmatprep.subr.bf16.mxu0 %v2590_v3  ;;  %v573_v1 = vld [vmem:[%s3956_s1 + $0x230] sm:$0xff]  ;;  %v242_v7 = vld [vmem:[%s2715_s22 + $0xd8] sm:$0xff]  ;;  %v252_v9 = vld [vmem:[%s2715_s22 + $0x128] sm:$0xff] }
  0x23   : > { %v575_v12 = vld [vmem:[%s3956_s1 + $0x240] sm:$0xff]  ;;  %v576_v13 = vld [vmem:[%s3956_s1 + $0x248] sm:$0xff]  ;;  %v253_v18 = vld [vmem:[%s2715_s22 + $0x130] sm:$0xff] }
  0x24   : > { %2171 = vmatpush1.bf16.msra.mxu1 %v2170_v49  ;;  %v602_v49 = vld [vmem:[%s3956_s1 + $0x318] sm:$0xff]  ;;  %v607_v15 = vld [vmem:[%s3956_s1 + $0x340] sm:$0xff]  ;;  %v261_v19 = vld [vmem:[%s2715_s22 + $0x170] sm:$0xff]  ;;  %v2257_v20 = vpack.c.bf16 %v576_v13, %v575_v12 }
  0x25   : > { %2219 = vmatpush1.bf16.msra.mxu0 %v2218_v50  ;;  %2172 = vmatprep.subr.bf16.mxu1 %v2590_v3  ;;  %v224_v50 = vld [vmem:[%s2715_s22 + $0x48] sm:$0xff]  ;;  %v2905_v57 = vpack.c.bf16 %v602_v49, %v601_v48  ;;  %v263_v21 = vld [vmem:[%s2715_s22 + $0x180] sm:$0xff]  ;;  %v609_v25 = vld [vmem:[%s3956_s1 + $0x350] sm:$0xff] }
  0x26   : > { %2220 = vmatprep.subr.bf16.mxu0 %v2590_v3  ;;  %v610_v26 = vld [vmem:[%s3956_s1 + $0x358] sm:$0xff]  ;;  %v260_v27 = vld [vmem:[%s2715_s22 + $0x168] sm:$0xff]  ;;  %v579_v32 = vld [vmem:[%s3956_s1 + $0x260] sm:$0xff] }
  0x27   : > { %v272_v31 = vld [vmem:[%s2715_s22 + $0x1c8] sm:$0xff]  ;;  %v269_v37 = vld [vmem:[%s2715_s22 + $0x1b0] sm:$0xff]  ;;  %v271_v38 = vld [vmem:[%s2715_s22 + $0x1c0] sm:$0xff] }
  0x28   : > { %2174 = vmatpush1.bf16.msra.mxu1 %v2173_v55  ;;  %v571_v55 = vld [vmem:[%s3956_s1 + $0x220] sm:$0xff]  ;;  %v580_v33 = vld [vmem:[%s3956_s1 + $0x268] sm:$0xff]  ;;  %v613_v45 = vld [vmem:[%s3956_s1 + $0x370] sm:$0xff] }
  0x29   : > { %2222 = vmatpush1.bf16.msra.mxu0 %v2221_v56  ;;  %2175 = vmatprep.subr.bf16.mxu1 %v2590_v3  ;;  %v572_v56 = vld [vmem:[%s3956_s1 + $0x228] sm:$0xff]  ;;  %v279_v39 = vld [vmem:[%s2715_s22 + $0x200] sm:$0xff]  ;;  %v614_v46 = vld [vmem:[%s3956_s1 + $0x378] sm:$0xff] }
  0x2a   : > { %2223 = vmatprep.subr.bf16.mxu0 %v2590_v3  ;;  %v2251_v63 = vpack.c.bf16 %v572_v56, %v571_v55  ;;  %v612_v36 = vld [vmem:[%s3956_s1 + $0x368] sm:$0xff]  ;;  %v278_v48 = vld [vmem:[%s2715_s22 + $0x1f8] sm:$0xff]  ;;  %v3031_v55 = vpack.c.bf16 %v614_v46, %v613_v45  ;;  %v615_v56 = vld [vmem:[%s3956_s1 + $0x380] sm:$0xff] }
  0x2b   : > { %v280_v49 = vld [vmem:[%s2715_s22 + $0x208] sm:$0xff]  ;;  %v587_v12 = vld [vmem:[%s3956_s1 + $0x2a0] sm:$0xff]  ;;  %v593_v46 = vld [vmem:[%s3956_s1 + $0x2d0] sm:$0xff] }
  0x2c   : > { %2177 = vmatpush1.bf16.msra.mxu1 %v2176_v61  ;;  %v235_v61 = vld [vmem:[%s2715_s22 + $0xa0] sm:$0xff]  ;;  %v588_v13 = vld [vmem:[%s3956_s1 + $0x2a8] sm:$0xff] }
  0x2d   : > { %2225 = vmatpush1.bf16.msra.mxu0 %v2224_v62  ;;  %2178 = vmatprep.subr.bf16.mxu1 %v2590_v3  ;;  %v243_v62 = vld [vmem:[%s2715_s22 + $0xe0] sm:$0xff] }
  0x2e   : > { %2226 = vmatprep.subr.bf16.mxu0 %v2590_v3  ;;  %v335_v45 = vld [vmem:[%s2715_s22 + $0x3c0] sm:$0xff] }
  0x30   : > { %2180 = vmatpush1.bf16.msra.mxu1 %v2179_v4  ;;  %v2926_v4 = vpack.c.bf16 %v604_v59, %v603_v58  ;;  %v616_v58 = vld [vmem:[%s3956_s1 + $0x388] sm:$0xff]  ;;  %v287_v59 = vld [vmem:[%s2715_s22 + $0x240] sm:$0xff] }
  0x31   : > { %2228 = vmatpush1.bf16.msra.mxu0 %v2227_v5  ;;  %2181 = vmatprep.subr.bf16.mxu1 %v2590_v3  ;;  %v605_v5 = vld [vmem:[%s3956_s1 + $0x330] sm:$0xff] }
  0x32   : > { %2229 = vmatprep.subr.bf16.mxu0 %v2590_v3  ;;  %v2947_v14 = vpack.c.bf16 %v606_v6, %v605_v5  ;;  %v617_v5 = vld [vmem:[%s3956_s1 + $0x390] sm:$0xff]  ;;  %v618_v6 = vld [vmem:[%s3956_s1 + $0x398] sm:$0xff] }
  0x34   : > { %2183 = vmatpush1.bf16.msra.mxu1 %v2182_v10  ;;  %v2254_v10 = vpack.c.bf16 %v574_v2, %v573_v1  ;;  %v586_v1 = vld [vmem:[%s3956_s1 + $0x298] sm:$0xff]  ;;  %v3052_v2 = vpack.c.bf16 %v616_v58, %v615_v56  ;;  %v344_v58 = vld [vmem:[%s2715_s22 + $0x408] sm:$0xff] }
  0x35   : > { %2231 = vmatpush1.bf16.msra.mxu0 %v2230_v11  ;;  %2184 = vmatprep.subr.bf16.mxu1 %v2590_v3  ;;  %v254_v11 = vld [vmem:[%s2715_s22 + $0x138] sm:$0xff] }
  0x36   : > { %2232 = vmatprep.subr.bf16.mxu0 %v2590_v3 }
  0x38   : > { %2186 = vmatpush1.bf16.msra.mxu1 %v2185_v16  ;;  %v608_v16 = vld [vmem:[%s3956_s1 + $0x348] sm:$0xff] }
  0x39   : > { %2234 = vmatpush1.bf16.msra.mxu0 %v2233_v17  ;;  %2187 = vmatprep.subr.bf16.mxu1 %v2590_v3  ;;  %v251_v17 = vld [vmem:[%s2715_s22 + $0x120] sm:$0xff]  ;;  %v2968_v24 = vpack.c.bf16 %v608_v16, %v607_v15  ;;  %v3073_v15 = vpack.c.bf16 %v618_v6, %v617_v5 }
  0x3a   : > { %2235 = vmatprep.subr.bf16.mxu0 %v2590_v3  ;;  %v619_v16 = vld [vmem:[%s3956_s1 + $0x3a0] sm:$0xff] }
  0x3b   : > { %v351_v5 = vld [vmem:[%s2715_s22 + $0x440] sm:$0xff] }
  0x3c   : > { %2189 = vmatpush1.bf16.msra.mxu1 %v2188_v22  ;;  %v577_v22 = vld [vmem:[%s3956_s1 + $0x250] sm:$0xff] }
  0x3d   : > { %2237 = vmatpush1.bf16.msra.mxu0 %v2236_v23  ;;  %2190 = vmatprep.subr.bf16.mxu1 %v2590_v3  ;;  %v578_v23 = vld [vmem:[%s3956_s1 + $0x258] sm:$0xff] }
  0x3e   : > { %2238 = vmatprep.subr.bf16.mxu0 %v2590_v3  ;;  %v2260_v30 = vpack.c.bf16 %v578_v23, %v577_v22  ;;  %v317_v22 = vld [vmem:[%s2715_s22 + $0x330] sm:$0xff] }
  0x3f   : > { %v589_v23 = vld [vmem:[%s3956_s1 + $0x2b0] sm:$0xff] }
  0x40   : > { %2192 = vmatpush1.bf16.msra.mxu1 %v2191_v28  ;;  %v262_v28 = vld [vmem:[%s2715_s22 + $0x178] sm:$0xff] }
  0x41   : > { %2240 = vmatpush1.bf16.msra.mxu0 %v2239_v29  ;;  %2193 = vmatprep.subr.bf16.mxu1 %v2590_v3  ;;  %v270_v29 = vld [vmem:[%s2715_s22 + $0x1b8] sm:$0xff] }
  0x42   : > { %2241 = vmatprep.subr.bf16.mxu0 %v2590_v3 }
  0x44   : > { %2195 = vmatpush1.bf16.msra.mxu1 %v2194_v34  ;;  %v2989_v34 = vpack.c.bf16 %v610_v26, %v609_v25  ;;  %v590_v25 = vld [vmem:[%s3956_s1 + $0x2b8] sm:$0xff] }
  0x45   : > { %2243 = vmatpush1.bf16.msra.mxu0 %v2242_v35  ;;  %2372 = vmatprep.subr.bf16.mxu1 %v2590_v3  ;;  %v611_v35 = vld [vmem:[%s3956_s1 + $0x360] sm:$0xff] }
  0x46   : > { %2244 = vmatprep.subr.bf16.mxu0 %v2590_v3 }
  0x47   : > { %719 = vmatmul.mubr.f32.vlgmr.msra.gmra.mrb[0].mxu1 %v215_v40  ;;  %v2263_v40 = vpack.c.bf16 %v580_v33, %v579_v32  ;;  %v2278_v32 = vpack.c.bf16 %v590_v25, %v589_v23  ;;  %v326_v33 = vld [vmem:[%s2715_s22 + $0x378] sm:$0xff]  ;;  %v359_v25 = vld [vmem:[%s2715_s22 + $0x480] sm:$0xff] }
  0x48   : > { %944 = vmatmul.mubr.f32.vlgmr.msra.gmra.mrb[0].mxu0 %v217_v41  ;;  %723 = vmatprep.mubr.f32.mxu1 %v225_v43  ;;  %v281_v41 = vld [vmem:[%s2715_s22 + $0x210] sm:$0xff]  ;;  %v582_v43 = vld [vmem:[%s3956_s1 + $0x278] sm:$0xff] }
  0x49   : > { %2246 = vmatpush1.bf16.msra.mxu0 %v2245_v42  ;;  %948 = vmatprep.mubr.f32.mxu0 %v227_v44  ;;  %v581_v42 = vld [vmem:[%s3956_s1 + $0x270] sm:$0xff]  ;;  %v3010_v44 = vpack.c.bf16 %v612_v36, %v611_v35  ;;  %v591_v35 = vld [vmem:[%s3956_s1 + $0x2c0] sm:$0xff]  ;;  %v592_v36 = vld [vmem:[%s3956_s1 + $0x2c8] sm:$0xff] }
  0x4a   : > { %2247 = vmatprep.subr.bf16.mxu0 %v2590_v3  ;;  %2388 = vmatpush1.bf16.msra.mxu1 %v2885_v47 }
  0x4b   : > { %724 = vmatmul.mubr.f32.gmra.mrb[2].mxu1 %v224_v50  ;;  %2373 = vmatprep.subr.bf16.mxu1 %v2590_v3  ;;  %v288_v50 = vld [vmem:[%s2715_s22 + $0x248] sm:$0xff] }
  0x4c   : > { %949 = vmatmul.mubr.f32.gmra.mrb[2].mxu0 %v226_v51  ;;  %728 = vmatprep.mubr.f32.mxu1 %v234_v52  ;;  %v2266_v51 = vpack.c.bf16 %v582_v43, %v581_v42  ;;  %v290_v52 = vld [vmem:[%s2715_s22 + $0x258] sm:$0xff]  ;;  %v333_v42 = vld [vmem:[%s2715_s22 + $0x3b0] sm:$0xff]  ;;  %v2281_v43 = vpack.c.bf16 %v592_v36, %v591_v35  ;;  %v379_v36 = vld [vmem:[%s2715_s22 + $0x520] sm:$0xff] }
  0x4d   : > { %953 = vmatprep.mubr.f32.mxu0 %v236_v54  ;;  %2249 = vmatpush1.bf16.msra.mxu0 %v2248_v53  ;;  %v583_v53 = vld [vmem:[%s3956_s1 + $0x280] sm:$0xff]  ;;  %v584_v54 = vld [vmem:[%s3956_s1 + $0x288] sm:$0xff]  ;;  %v377_v35 = vld [vmem:[%s2715_s22 + $0x510] sm:$0xff] }
  0x4e   : > { %2250 = vmatprep.subr.bf16.mxu0 %v2590_v3  ;;  %2389 = vmatpush1.bf16.msra.mxu1 %v2905_v57 }
  0x4f   : > { %729 = vmatmul.mubr.f32.gmra.mrb[4].mxu1 %v233_v60  ;;  %2374 = vmatprep.subr.bf16.mxu1 %v2590_v3  ;;  %v289_v60 = vld [vmem:[%s2715_s22 + $0x250] sm:$0xff] }
  0x50   : > { %954 = vmatmul.mubr.f32.gmra.mrb[4].mxu0 %v235_v61  ;;  %733 = vmatprep.mubr.f32.mxu1 %v243_v62  ;;  %v297_v61 = vld [vmem:[%s2715_s22 + $0x290] sm:$0xff]  ;;  %v2269_v62 = vpack.c.bf16 %v584_v54, %v583_v53  ;;  %v334_v53 = vld [vmem:[%s2715_s22 + $0x3b8] sm:$0xff] }
  0x51   : > { %958 = vmatprep.mubr.f32.mxu0 %v245_v0  ;;  %2252 = vmatpush1.bf16.msra.mxu0 %v2251_v63  ;;  %v299_v63 = vld [vmem:[%s2715_s22 + $0x2a0] sm:$0xff]  ;;  %v585_v0 = vld [vmem:[%s3956_s1 + $0x290] sm:$0xff]  ;;  %v342_v54 = vld [vmem:[%s2715_s22 + $0x3f8] sm:$0xff] }
  0x52   : > { %2253 = vmatprep.subr.bf16.mxu0 %v2590_v3  ;;  %2390 = vmatpush1.bf16.msra.mxu1 %v2926_v4 }
  0x53   : > { %734 = vmatmul.mubr.f32.gmra.mrb[6].mxu1 %v242_v7  ;;  %2375 = vmatprep.subr.bf16.mxu1 %v2590_v3  ;;  %v296_v7 = vld [vmem:[%s2715_s22 + $0x288] sm:$0xff] }
  0x54   : > { %959 = vmatmul.mubr.f32.gmra.mrb[6].mxu0 %v244_v8  ;;  %738 = vmatprep.mubr.f32.mxu1 %v252_v9  ;;  %v298_v8 = vld [vmem:[%s2715_s22 + $0x298] sm:$0xff] }
  0x55   : > { %963 = vmatprep.mubr.f32.mxu0 %v254_v11  ;;  %2255 = vmatpush1.bf16.msra.mxu0 %v2254_v10  ;;  %v306_v9 = vld [vmem:[%s2715_s22 + $0x2d8] sm:$0xff]  ;;  %v2272_v10 = vpack.c.bf16 %v586_v1, %v585_v0  ;;  %v308_v11 = vld [vmem:[%s2715_s22 + $0x2e8] sm:$0xff]  ;;  %v341_v0 = vld [vmem:[%s2715_s22 + $0x3f0] sm:$0xff] }
  0x56   : > { %2256 = vmatprep.subr.bf16.mxu0 %v2590_v3  ;;  %2391 = vmatpush1.bf16.msra.mxu1 %v2947_v14  ;;  %v343_v1 = vld [vmem:[%s2715_s22 + $0x400] sm:$0xff] }
  0x57   : > { %739 = vmatmul.mubr.f32.gmra.mrb[8].mxu1 %v251_v17  ;;  %2376 = vmatprep.subr.bf16.mxu1 %v2590_v3  ;;  %v620_v17 = vld [vmem:[%s3956_s1 + $0x3a8] sm:$0xff] }
  0x58   : > { %964 = vmatmul.mubr.f32.gmra.mrb[8].mxu0 %v253_v18  ;;  %743 = vmatprep.mubr.f32.mxu1 %v261_v19  ;;  %v305_v18 = vld [vmem:[%s2715_s22 + $0x2d0] sm:$0xff]  ;;  %v307_v19 = vld [vmem:[%s2715_s22 + $0x2e0] sm:$0xff]  ;;  %v3094_v26 = vpack.c.bf16 %v620_v17, %v619_v16  ;;  %v632_v17 = vld [vmem:[%s3956_s1 + $0x408] sm:$0xff] }
  0x59   : > { %968 = vmatprep.mubr.f32.mxu0 %v263_v21  ;;  %2258 = vmatpush1.bf16.msra.mxu0 %v2257_v20  ;;  %v315_v20 = vld [vmem:[%s2715_s22 + $0x320] sm:$0xff]  ;;  %v2275_v21 = vpack.c.bf16 %v588_v13, %v587_v12  ;;  %v630_v12 = vld [vmem:[%s3956_s1 + $0x3f8] sm:$0xff] }
  0x5a   : > { %2259 = vmatprep.subr.bf16.mxu0 %v2590_v3  ;;  %2392 = vmatpush1.bf16.msra.mxu1 %v2968_v24  ;;  %v350_v13 = vld [vmem:[%s2715_s22 + $0x438] sm:$0xff]  ;;  %v631_v16 = vld [vmem:[%s3956_s1 + $0x400] sm:$0xff] }
  0x5b   : > { %744 = vmatmul.mubr.f32.gmra.mrb[10].mxu1 %v260_v27  ;;  %2377 = vmatprep.subr.bf16.mxu1 %v2590_v3  ;;  %v621_v27 = vld [vmem:[%s3956_s1 + $0x3b0] sm:$0xff]  ;;  %v3202_v23 = vpack.c.bf16 %v632_v17, %v631_v16  ;;  %v451_v17 = vld [vmem:[%s2715_s22 + $0x760] sm:$0xff] }
  0x5c   : > { %969 = vmatmul.mubr.f32.gmra.mrb[10].mxu0 %v262_v28  ;;  %748 = vmatprep.mubr.f32.mxu1 %v270_v29  ;;  %v622_v28 = vld [vmem:[%s3956_s1 + $0x3b8] sm:$0xff]  ;;  %v449_v16 = vld [vmem:[%s2715_s22 + $0x750] sm:$0xff] }
  0x5d   : > { %973 = vmatprep.mubr.f32.mxu0 %v272_v31  ;;  %2261 = vmatpush1.bf16.msra.mxu0 %v2260_v30  ;;  %v314_v29 = vld [vmem:[%s2715_s22 + $0x318] sm:$0xff]  ;;  %v316_v30 = vld [vmem:[%s2715_s22 + $0x328] sm:$0xff] }
  0x5e   : > { %2262 = vmatprep.subr.bf16.mxu0 %v2590_v3  ;;  %2393 = vmatpush1.bf16.msra.mxu1 %v2989_v34  ;;  %v324_v31 = vld [vmem:[%s2715_s22 + $0x368] sm:$0xff] }
  0x5f   : > { %749 = vmatmul.mubr.f32.gmra.mrb[12].mxu1 %v269_v37  ;;  %2378 = vmatprep.subr.bf16.mxu1 %v2590_v3  ;;  %v3115_v37 = vpack.c.bf16 %v622_v28, %v621_v27  ;;  %v361_v27 = vld [vmem:[%s2715_s22 + $0x490] sm:$0xff] }
  0x60   : > { %974 = vmatmul.mubr.f32.gmra.mrb[12].mxu0 %v271_v38  ;;  %753 = vmatprep.mubr.f32.mxu1 %v279_v39  ;;  %v623_v38 = vld [vmem:[%s3956_s1 + $0x3c0] sm:$0xff]  ;;  %v624_v39 = vld [vmem:[%s3956_s1 + $0x3c8] sm:$0xff]  ;;  %v369_v28 = vld [vmem:[%s2715_s22 + $0x4d0] sm:$0xff] }
  0x61   : > { %978 = vmatprep.mubr.f32.mxu0 %v281_v41  ;;  %2264 = vmatpush1.bf16.msra.mxu0 %v2263_v40  ;;  %v323_v40 = vld [vmem:[%s2715_s22 + $0x360] sm:$0xff]  ;;  %v325_v41 = vld [vmem:[%s2715_s22 + $0x370] sm:$0xff] }
  0x62   : > { %2265 = vmatprep.subr.bf16.mxu0 %v2590_v3  ;;  %2394 = vmatpush1.bf16.msra.mxu1 %v3010_v44 }
  0x63   : > { %754 = vmatmul.mubr.f32.gmra.mrb[14].mxu1 %v278_v48  ;;  %2379 = vmatprep.subr.bf16.mxu1 %v2590_v3  ;;  %v594_v48 = vld [vmem:[%s3956_s1 + $0x2d8] sm:$0xff] }
  0x64   : > { %979 = vmatmul.mubr.f32.gmra.mrb[14].mxu0 %v280_v49  ;;  %758 = vmatprep.mubr.f32.mxu1 %v288_v50  ;;  %v3136_v49 = vpack.c.bf16 %v624_v39, %v623_v38  ;;  %v625_v50 = vld [vmem:[%s3956_s1 + $0x3d0] sm:$0xff]  ;;  %v2284_v56 = vpack.c.bf16 %v594_v48, %v593_v46  ;;  %v387_v38 = vld [vmem:[%s2715_s22 + $0x560] sm:$0xff] }
  0x65   : > { %983 = vmatprep.mubr.f32.mxu0 %v290_v52  ;;  %2267 = vmatpush1.bf16.msra.mxu0 %v2266_v51  ;;  %v626_v51 = vld [vmem:[%s3956_s1 + $0x3d8] sm:$0xff]  ;;  %v332_v52 = vld [vmem:[%s2715_s22 + $0x3a8] sm:$0xff]  ;;  %v389_v39 = vld [vmem:[%s2715_s22 + $0x570] sm:$0xff] }
  0x66   : > { %2268 = vmatprep.subr.bf16.mxu0 %v2590_v3  ;;  %2395 = vmatpush1.bf16.msra.mxu1 %v3031_v55  ;;  %v397_v46 = vld [vmem:[%s2715_s22 + $0x5b0] sm:$0xff] }
  0x67   : > { %759 = vmatmul.mubr.f32.gmra.mrb[16].mxu1 %v287_v59  ;;  %2380 = vmatprep.subr.bf16.mxu1 %v2590_v3  ;;  %v595_v59 = vld [vmem:[%s3956_s1 + $0x2e0] sm:$0xff]  ;;  %v405_v48 = vld [vmem:[%s2715_s22 + $0x5f0] sm:$0xff] }
  0x68   : > { %984 = vmatmul.mubr.f32.gmra.mrb[16].mxu0 %v289_v60  ;;  %763 = vmatprep.mubr.f32.mxu1 %v297_v61  ;;  %v596_v60 = vld [vmem:[%s3956_s1 + $0x2e8] sm:$0xff]  ;;  %v3157_v61 = vpack.c.bf16 %v626_v51, %v625_v50  ;;  %v407_v50 = vld [vmem:[%s2715_s22 + $0x600] sm:$0xff] }
  0x69   : > { %988 = vmatprep.mubr.f32.mxu0 %v299_v63  ;;  %2270 = vmatpush1.bf16.msra.mxu0 %v2269_v62  ;;  %v627_v62 = vld [vmem:[%s3956_s1 + $0x3e0] sm:$0xff]  ;;  %v628_v63 = vld [vmem:[%s3956_s1 + $0x3e8] sm:$0xff]  ;;  %v2287_v6 = vpack.c.bf16 %v596_v60, %v595_v59  ;;  %v425_v60 = vld [vmem:[%s2715_s22 + $0x690] sm:$0xff] }
  0x6a   : > { %2271 = vmatprep.subr.bf16.mxu0 %v2590_v3  ;;  %2396 = vmatpush1.bf16.msra.mxu1 %v3052_v2  ;;  %v404_v51 = vld [vmem:[%s2715_s22 + $0x5e8] sm:$0xff]  ;;  %v423_v59 = vld [vmem:[%s2715_s22 + $0x680] sm:$0xff] }
  0x6b   : > { %764 = vmatmul.mubr.f32.gmra.mrb[18].mxu1 %v296_v7  ;;  %2381 = vmatprep.subr.bf16.mxu1 %v2590_v3  ;;  %v353_v7 = vld [vmem:[%s2715_s22 + $0x450] sm:$0xff] }
  0x6c   : > { %989 = vmatmul.mubr.f32.gmra.mrb[18].mxu0 %v298_v8  ;;  %768 = vmatprep.mubr.f32.mxu1 %v306_v9  ;;  %v597_v8 = vld [vmem:[%s3956_s1 + $0x2f0] sm:$0xff]  ;;  %v598_v9 = vld [vmem:[%s3956_s1 + $0x2f8] sm:$0xff] }
  0x6d   : > { %993 = vmatprep.mubr.f32.mxu0 %v308_v11  ;;  %2273 = vmatpush1.bf16.msra.mxu0 %v2272_v10  ;;  %v3178_v10 = vpack.c.bf16 %v628_v63, %v627_v62  ;;  %v629_v11 = vld [vmem:[%s3956_s1 + $0x3f0] sm:$0xff]  ;;  %v422_v62 = vld [vmem:[%s2715_s22 + $0x678] sm:$0xff]  ;;  %v424_v63 = vld [vmem:[%s2715_s22 + $0x688] sm:$0xff] }
  0x6e   : > { %2274 = vmatprep.subr.bf16.mxu0 %v2590_v3  ;;  %2397 = vmatpush1.bf16.msra.mxu1 %v3073_v15 }
  0x6f   : > { %769 = vmatmul.mubr.f32.gmra.mrb[20].mxu1 %v305_v18  ;;  %2382 = vmatprep.subr.bf16.mxu1 %v2590_v3  ;;  %v352_v18 = vld [vmem:[%s2715_s22 + $0x448] sm:$0xff] }
  0x70   : > { %994 = vmatmul.mubr.f32.gmra.mrb[20].mxu0 %v307_v19  ;;  %773 = vmatprep.mubr.f32.mxu1 %v315_v20  ;;  %v360_v19 = vld [vmem:[%s2715_s22 + $0x488] sm:$0xff]  ;;  %v2290_v20 = vpack.c.bf16 %v598_v9, %v597_v8  ;;  %v443_v8 = vld [vmem:[%s2715_s22 + $0x720] sm:$0xff] }
  0x71   : > { %998 = vmatprep.mubr.f32.mxu0 %v317_v22  ;;  %2276 = vmatpush1.bf16.msra.mxu0 %v2275_v21  ;;  %v362_v21 = vld [vmem:[%s2715_s22 + $0x498] sm:$0xff]  ;;  %v3199_v22 = vpack.c.bf16 %v630_v12, %v629_v11  ;;  %v440_v9 = vld [vmem:[%s2715_s22 + $0x708] sm:$0xff] }
  0x72   : > { %2277 = vmatprep.subr.bf16.mxu0 %v2590_v3  ;;  %2398 = vmatpush1.bf16.msra.mxu1 %v3094_v26  ;;  %v442_v11 = vld [vmem:[%s2715_s22 + $0x718] sm:$0xff] }
  0x73   : > { %774 = vmatmul.mubr.f32.gmra.mrb[22].mxu1 %v314_v29  ;;  %2383 = vmatprep.subr.bf16.mxu1 %v2590_v3  ;;  %v371_v29 = vld [vmem:[%s2715_s22 + $0x4e0] sm:$0xff]  ;;  %v450_v12 = vld [vmem:[%s2715_s22 + $0x758] sm:$0xff] }
  0x74   : > { %999 = vmatmul.mubr.f32.gmra.mrb[22].mxu0 %v316_v30  ;;  %778 = vmatprep.mubr.f32.mxu1 %v324_v31  ;;  %v368_v30 = vld [vmem:[%s2715_s22 + $0x4c8] sm:$0xff]  ;;  %v370_v31 = vld [vmem:[%s2715_s22 + $0x4d8] sm:$0xff] }
  0x75   : > { %1003 = vmatprep.mubr.f32.mxu0 %v326_v33  ;;  %2279 = vmatpush1.bf16.msra.mxu0 %v2278_v32  ;;  %v378_v32 = vld [vmem:[%s2715_s22 + $0x518] sm:$0xff]  ;;  %v380_v33 = vld [vmem:[%s2715_s22 + $0x528] sm:$0xff] }
  0x76   : > { %2280 = vmatprep.subr.bf16.mxu0 %v2590_v3  ;;  %2399 = vmatpush1.bf16.msra.mxu1 %v3115_v37 }
  0x77   : > { %779 = vmatmul.mubr.f32.gmra.mrb[24].mxu1 %v323_v40  ;;  %2384 = vmatprep.subr.bf16.mxu1 %v2590_v3  ;;  %v386_v40 = vld [vmem:[%s2715_s22 + $0x558] sm:$0xff] }
  0x78   : > { %1004 = vmatmul.mubr.f32.gmra.mrb[24].mxu0 %v325_v41  ;;  %783 = vmatprep.mubr.f32.mxu1 %v333_v42  ;;  %v388_v41 = vld [vmem:[%s2715_s22 + $0x568] sm:$0xff] }
  0x79   : > { %1008 = vmatprep.mubr.f32.mxu0 %v335_v45  ;;  %2282 = vmatpush1.bf16.msra.mxu0 %v2281_v43  ;;  %v396_v42 = vld [vmem:[%s2715_s22 + $0x5a8] sm:$0xff]  ;;  %v398_v43 = vld [vmem:[%s2715_s22 + $0x5b8] sm:$0xff]  ;;  %v395_v45 = vld [vmem:[%s2715_s22 + $0x5a0] sm:$0xff] }
  0x7a   : > { %2283 = vmatprep.subr.bf16.mxu0 %v2590_v3  ;;  %2400 = vmatpush1.bf16.msra.mxu1 %v3136_v49 }
  0x7b   : > { %784 = vmatmul.mubr.f32.gmra.mrb[26].mxu1 %v332_v52  ;;  %2385 = vmatprep.subr.bf16.mxu1 %v2590_v3  ;;  %v406_v52 = vld [vmem:[%s2715_s22 + $0x5f8] sm:$0xff] }
  0x7c   : > { %1009 = vmatmul.mubr.f32.gmra.mrb[26].mxu0 %v334_v53  ;;  %788 = vmatprep.mubr.f32.mxu1 %v342_v54  ;;  %v414_v53 = vld [vmem:[%s2715_s22 + $0x638] sm:$0xff]  ;;  %v416_v54 = vld [vmem:[%s2715_s22 + $0x648] sm:$0xff] }
  0x7d   : > { %1013 = vmatprep.mubr.f32.mxu0 %v344_v58  ;;  %2285 = vmatpush1.bf16.msra.mxu0 %v2284_v56  ;;  %v413_v56 = vld [vmem:[%s2715_s22 + $0x630] sm:$0xff]  ;;  %v415_v58 = vld [vmem:[%s2715_s22 + $0x640] sm:$0xff] }
  0x7e   : > { %2286 = vmatprep.subr.bf16.mxu0 %v2590_v3  ;;  %2401 = vmatpush1.bf16.msra.mxu1 %v3157_v61 }
  0x7f   : > { %789 = vmatmul.mubr.f32.gmra.mrb[28].mxu1 %v341_v0  ;;  %2386 = vmatprep.subr.bf16.mxu1 %v2590_v3  ;;  %v432_v0 = vld [vmem:[%s2715_s22 + $0x6c8] sm:$0xff] }
  0x80   : > { %1014 = vmatmul.mubr.f32.gmra.mrb[28].mxu0 %v343_v1  ;;  %793 = vmatprep.mubr.f32.mxu1 %v351_v5  ;;  %v434_v1 = vld [vmem:[%s2715_s22 + $0x6d8] sm:$0xff]  ;;  %v431_v5 = vld [vmem:[%s2715_s22 + $0x6c0] sm:$0xff] }
  0x81   : > { %1018 = vmatprep.mubr.f32.mxu0 %v353_v7  ;;  %2288 = vmatpush1.bf16.msra.mxu0 %v2287_v6  ;;  %v433_v6 = vld [vmem:[%s2715_s22 + $0x6d0] sm:$0xff] }
  0x82   : > { %2289 = vmatprep.subr.bf16.mxu0 %v2590_v3  ;;  %2402 = vmatpush1.bf16.msra.mxu1 %v3178_v10  ;;  %v441_v7 = vld [vmem:[%s2715_s22 + $0x710] sm:$0xff] }
  0x83   : > { %794 = vmatmul.mubr.f32.gmra.mrb[30].mxu1 %v350_v13  ;;  %2387 = vmatprep.subr.bf16.mxu1 %v2590_v3  ;;  %v452_v13 = vld [vmem:[%s2715_s22 + $0x768] sm:$0xff] }
  0x84   : > { %1019 = vmatmul.mubr.f32.gmra.mrb[30].mxu0 %v352_v18  ;;  %798 = vmatprep.mubr.f32.mxu1 %v360_v19  ;;  %v459_v18 = vld [vmem:[%s2715_s22 + $0x7a0] sm:$0xff]  ;;  %v461_v19 = vld [vmem:[%s2715_s22 + $0x7b0] sm:$0xff] }
  0x85   : > { %1023 = vmatprep.mubr.f32.mxu0 %v362_v21  ;;  %2291 = vmatpush1.bf16.msra.mxu0 %v2290_v20  ;;  %v458_v20 = vld [vmem:[%s2715_s22 + $0x798] sm:$0xff]  ;;  %v460_v21 = vld [vmem:[%s2715_s22 + $0x7a8] sm:$0xff] }
  0x86   : > { %2403 = vmatpush1.bf16.msra.mxu1 %v3199_v22  ;;  %2292 = vmatprep.subr.bf16.mxu0 %v2590_v3 }
  0x87   : > { %799 = vmatmul.mubr.f32.gmra.mrb[32].mxu1 %v359_v25  ;;  %2341 = vmatprep.subr.bf16.mxu1 %v3202_v23  ;;  %v468_v25 = vld [vmem:[%s2715_s22 + $0x7e8] sm:$0xff] }
  0x88   : > { %1024 = vmatmul.mubr.f32.gmra.mrb[32].mxu0 %v361_v27  ;;  %803 = vmatprep.mubr.f32.mxu1 %v369_v28  ;;  %v470_v27 = vld [vmem:[%s2715_s22 + $0x7f8] sm:$0xff]  ;;  %v467_v28 = vld [vmem:[%s2715_s22 + $0x7e0] sm:$0xff] }
  0x89   : > { %1028 = vmatprep.mubr.f32.mxu0 %v371_v29  ;;  %v469_v29 = vld [vmem:[%s2715_s22 + $0x7f0] sm:$0xff] }
  0x8b   : > { %804 = vmatmul.mubr.f32.gmra.mrb[34].mxu1 %v368_v30  ;;  %v477_v30 = vld [vmem:[%s2715_s22 + $0x830] sm:$0xff] }
  0x8c   : > { %1029 = vmatmul.mubr.f32.gmra.mrb[34].mxu0 %v370_v31  ;;  %808 = vmatprep.mubr.f32.mxu1 %v378_v32  ;;  %v479_v31 = vld [vmem:[%s2715_s22 + $0x840] sm:$0xff]  ;;  %v476_v32 = vld [vmem:[%s2715_s22 + $0x828] sm:$0xff] }
  0x8d   : > { %1033 = vmatprep.mubr.f32.mxu0 %v380_v33  ;;  %v478_v33 = vld [vmem:[%s2715_s22 + $0x838] sm:$0xff] }
  0x8f   : > { %809 = vmatmul.mubr.f32.gmra.mrb[36].mxu1 %v377_v35  ;;  %v486_v35 = vld [vmem:[%s2715_s22 + $0x878] sm:$0xff] }
  0x90   : > { %1034 = vmatmul.mubr.f32.gmra.mrb[36].mxu0 %v379_v36  ;;  %813 = vmatprep.mubr.f32.mxu1 %v387_v38  ;;  %v488_v36 = vld [vmem:[%s2715_s22 + $0x888] sm:$0xff]  ;;  %v485_v38 = vld [vmem:[%s2715_s22 + $0x870] sm:$0xff] }
  0x91   : > { %1038 = vmatprep.mubr.f32.mxu0 %v389_v39  ;;  %v487_v39 = vld [vmem:[%s2715_s22 + $0x880] sm:$0xff] }
  0x93   : > { %814 = vmatmul.mubr.f32.gmra.mrb[38].mxu1 %v386_v40  ;;  %v495_v40 = vld [vmem:[%s2715_s22 + $0x8c0] sm:$0xff] }
  0x94   : > { %1039 = vmatmul.mubr.f32.gmra.mrb[38].mxu0 %v388_v41  ;;  %818 = vmatprep.mubr.f32.mxu1 %v396_v42  ;;  %v497_v41 = vld [vmem:[%s2715_s22 + $0x8d0] sm:$0xff]  ;;  %v494_v42 = vld [vmem:[%s2715_s22 + $0x8b8] sm:$0xff] }
  0x95   : > { %1043 = vmatprep.mubr.f32.mxu0 %v398_v43  ;;  %v496_v43 = vld [vmem:[%s2715_s22 + $0x8c8] sm:$0xff] }
  0x97   : > { %819 = vmatmul.mubr.f32.gmra.mrb[40].mxu1 %v395_v45  ;;  %v294_v45 = vld [vmem:[%s2715_s22 + $0x278] sm:$0xff] }
  0x98   : > { %1044 = vmatmul.mubr.f32.gmra.mrb[40].mxu0 %v397_v46  ;;  %823 = vmatprep.mubr.f32.mxu1 %v405_v48  ;;  %v220_v46 = vld [vmem:[%s2715_s22 + $0x28] sm:$0xff]  ;;  %v293_v48 = vld [vmem:[%s2715_s22 + $0x270] sm:$0xff] }
  0x99   : > { %1048 = vmatprep.mubr.f32.mxu0 %v407_v50  ;;  %v633_v50 = vld [vmem:[%s3956_s1 + $0x410] sm:$0xff] }
  0x9b   : > { %824 = vmatmul.mubr.f32.gmra.mrb[42].mxu1 %v404_v51  ;;  %v634_v51 = vld [vmem:[%s3956_s1 + $0x418] sm:$0xff] }
  0x9c   : > { %1049 = vmatmul.mubr.f32.gmra.mrb[42].mxu0 %v406_v52  ;;  %828 = vmatprep.mubr.f32.mxu1 %v414_v53  ;;  %v219_v52 = vld [vmem:[%s2715_s22 + $0x20] sm:$0xff] }
  0x9d   : > { %1053 = vmatprep.mubr.f32.mxu0 %v416_v54  ;;  %v303_v53 = vld [vmem:[%s2715_s22 + $0x2c0] sm:$0xff]  ;;  %v229_v54 = vld [vmem:[%s2715_s22 + $0x70] sm:$0xff] }
  0x9f   : > { %829 = vmatmul.mubr.f32.gmra.mrb[44].mxu1 %v413_v56  ;;  %v2344_v56 = vpack.c.bf16 %v634_v51, %v633_v50  ;;  %v291_v50 = vld [vmem:[%s2715_s22 + $0x260] sm:$0xff] }
  0xa0   : > { %1054 = vmatmul.mubr.f32.gmra.mrb[44].mxu0 %v415_v58  ;;  %833 = vmatprep.mubr.f32.mxu1 %v423_v59  ;;  %v302_v58 = vld [vmem:[%s2715_s22 + $0x2b8] sm:$0xff]  ;;  %v635_v59 = vld [vmem:[%s3956_s1 + $0x420] sm:$0xff] }
  0xa1   : > { %1058 = vmatprep.mubr.f32.mxu0 %v425_v60  ;;  %v636_v60 = vld [vmem:[%s3956_s1 + $0x428] sm:$0xff]  ;;  %v375_v51 = vld [vmem:[%s2715_s22 + $0x500] sm:$0xff] }
  0xa3   : > { %834 = vmatmul.mubr.f32.gmra.mrb[46].mxu1 %v422_v62  ;;  %v228_v62 = vld [vmem:[%s2715_s22 + $0x68] sm:$0xff] }
  0xa4   : > { %1059 = vmatmul.mubr.f32.gmra.mrb[46].mxu0 %v424_v63  ;;  %838 = vmatprep.mubr.f32.mxu1 %v432_v0  ;;  %v312_v63 = vld [vmem:[%s2715_s22 + $0x308] sm:$0xff]  ;;  %v238_v0 = vld [vmem:[%s2715_s22 + $0xb8] sm:$0xff] }
  0xa5   : > { %1063 = vmatprep.mubr.f32.mxu0 %v434_v1  ;;  %v2348_v1 = vpack.c.bf16 %v636_v60, %v635_v59  ;;  %v393_v59 = vld [vmem:[%s2715_s22 + $0x590] sm:$0xff]  ;;  %v319_v60 = vld [vmem:[%s2715_s22 + $0x340] sm:$0xff] }
  0xa7   : > { %839 = vmatmul.mubr.f32.gmra.mrb[48].mxu1 %v431_v5  ;;  %v311_v5 = vld [vmem:[%s2715_s22 + $0x300] sm:$0xff] }
  0xa8   : > { %1064 = vmatmul.mubr.f32.gmra.mrb[48].mxu0 %v433_v6  ;;  %843 = vmatprep.mubr.f32.mxu1 %v441_v7  ;;  %v638_v6 = vld [vmem:[%s3956_s1 + $0x438] sm:$0xff]  ;;  %v237_v7 = vld [vmem:[%s2715_s22 + $0xb0] sm:$0xff] }
  0xa9   : > { %1068 = vmatprep.mubr.f32.mxu0 %v443_v8  ;;  %v247_v8 = vld [vmem:[%s2715_s22 + $0x100] sm:$0xff] }
  0xab   : > { %844 = vmatmul.mubr.f32.gmra.mrb[50].mxu1 %v440_v9 }
  0xac   : > { %1069 = vmatmul.mubr.f32.gmra.mrb[50].mxu0 %v442_v11  ;;  %848 = vmatprep.mubr.f32.mxu1 %v450_v12  ;;  %v320_v11 = vld [vmem:[%s2715_s22 + $0x348] sm:$0xff]  ;;  %v639_v12 = vld [vmem:[%s3956_s1 + $0x440] sm:$0xff] }
  0xad   : > { %1073 = vmatprep.mubr.f32.mxu0 %v452_v13  ;;  %v246_v13 = vld [vmem:[%s2715_s22 + $0xf8] sm:$0xff] }
  0xaf   : > { %849 = vmatmul.mubr.f32.gmra.mrb[52].mxu1 %v449_v16  ;;  %v330_v16 = vld [vmem:[%s2715_s22 + $0x398] sm:$0xff] }
  0xb0   : > { %1074 = vmatmul.mubr.f32.gmra.mrb[52].mxu0 %v451_v17  ;;  %853 = vmatprep.mubr.f32.mxu1 %v459_v18  ;;  %v256_v17 = vld [vmem:[%s2715_s22 + $0x148] sm:$0xff] }
  0xb1   : > { %1078 = vmatprep.mubr.f32.mxu0 %v461_v19  ;;  %v329_v19 = vld [vmem:[%s2715_s22 + $0x390] sm:$0xff] }
  0xb3   : > { %854 = vmatmul.mubr.f32.gmra.mrb[54].mxu1 %v458_v20  ;;  %v641_v20 = vld [vmem:[%s3956_s1 + $0x450] sm:$0xff] }
  0xb4   : > { %1079 = vmatmul.mubr.f32.gmra.mrb[54].mxu0 %v460_v21  ;;  %858 = vmatprep.mubr.f32.mxu1 %v468_v25  ;;  %v255_v21 = vld [vmem:[%s2715_s22 + $0x140] sm:$0xff] }
  0xb5   : > { %1083 = vmatprep.mubr.f32.mxu0 %v470_v27  ;;  %v339_v25 = vld [vmem:[%s2715_s22 + $0x3e0] sm:$0xff]  ;;  %v265_v27 = vld [vmem:[%s2715_s22 + $0x190] sm:$0xff] }
  0xb7   : > { %859 = vmatmul.mubr.f32.gmra.mrb[56].mxu1 %v467_v28 }
  0xb8   : > { %1084 = vmatmul.mubr.f32.gmra.mrb[56].mxu0 %v469_v29  ;;  %863 = vmatprep.mubr.f32.mxu1 %v477_v30  ;;  %v338_v29 = vld [vmem:[%s2715_s22 + $0x3d8] sm:$0xff]  ;;  %v643_v30 = vld [vmem:[%s3956_s1 + $0x460] sm:$0xff] }
  0xb9   : > { %1088 = vmatprep.mubr.f32.mxu0 %v479_v31  ;;  %v264_v31 = vld [vmem:[%s2715_s22 + $0x188] sm:$0xff] }
  0xbb   : > { %864 = vmatmul.mubr.f32.gmra.mrb[58].mxu1 %v476_v32  ;;  %v348_v32 = vld [vmem:[%s2715_s22 + $0x428] sm:$0xff] }
  0xbc   : > { %1089 = vmatmul.mubr.f32.gmra.mrb[58].mxu0 %v478_v33  ;;  %868 = vmatprep.mubr.f32.mxu1 %v486_v35  ;;  %v274_v33 = vld [vmem:[%s2715_s22 + $0x1d8] sm:$0xff] }
  0xbd   : > { %1093 = vmatprep.mubr.f32.mxu0 %v488_v36  ;;  %v347_v36 = vld [vmem:[%s2715_s22 + $0x420] sm:$0xff] }
  0xbf   : > { %869 = vmatmul.mubr.f32.gmra.mrb[60].mxu1 %v485_v38  ;;  %v645_v38 = vld [vmem:[%s3956_s1 + $0x470] sm:$0xff] }
  0xc0   : > { %1094 = vmatmul.mubr.f32.gmra.mrb[60].mxu0 %v487_v39  ;;  %873 = vmatprep.mubr.f32.mxu1 %v495_v40  ;;  %v273_v39 = vld [vmem:[%s2715_s22 + $0x1d0] sm:$0xff] }
  0xc1   : > { %1098 = vmatprep.mubr.f32.mxu0 %v497_v41  ;;  %v357_v40 = vld [vmem:[%s2715_s22 + $0x470] sm:$0xff]  ;;  %v283_v41 = vld [vmem:[%s2715_s22 + $0x220] sm:$0xff] }
  0xc3   : > { %874 = vmatmul.mubr.f32.gmra.mrb[62].mxu1 %v494_v42 }
  0xc4   : > { %1099 = vmatmul.mubr.f32.gmra.mrb[62].mxu0 %v496_v43  ;;  %1433 = vmatprep.mubr.f32.mxu1 %v294_v45  ;;  %v356_v43 = vld [vmem:[%s2715_s22 + $0x468] sm:$0xff]  ;;  %v282_v45 = vld [vmem:[%s2715_s22 + $0x218] sm:$0xff] }
  0xc5   : > { %1168 = vmatprep.mubr.f32.mxu0 %v220_v46  ;;  %v366_v46 = vld [vmem:[%s2715_s22 + $0x4b8] sm:$0xff] }
  0xc7   : > { %1434 = vmatmul.mubr.f32.vlgmr.msra.gmra.mrb[64].mxu1 %v293_v48  ;;  %v365_v48 = vld [vmem:[%s2715_s22 + $0x4b0] sm:$0xff] }
  0xc8   : > { %1169 = vmatmul.mubr.f32.vlgmr.msra.gmra.mrb[0].mxu0 %v219_v52  ;;  %1438 = vmatprep.mubr.f32.mxu1 %v303_v53  ;;  %v301_v52 = vld [vmem:[%s2715_s22 + $0x2b0] sm:$0xff]  ;;  %v300_v53 = vld [vmem:[%s2715_s22 + $0x2a8] sm:$0xff] }
  0xc9   : > { %2294 = vmatpush1.bf16.msra.mxu0 %v2885_v47  ;;  %1173 = vmatprep.mubr.f32.mxu0 %v229_v54  ;;  %v637_v47 = vld [vmem:[%s3956_s1 + $0x430] sm:$0xff]  ;;  %v384_v54 = vld [vmem:[%s2715_s22 + $0x548] sm:$0xff] }
  0xca   : > { %2295 = vmatprep.subr.bf16.mxu0 %v2590_v3  ;;  %2343 = vmatpush3.bf16.msra.mxu1 %v3202_v23  ;;  %v321_v23 = vld [vmem:[%s2715_s22 + $0x350] sm:$0xff]  ;;  %v2352_v9 = vpack.c.bf16 %v638_v6, %v637_v47  ;;  %v336_v6 = vld [vmem:[%s2715_s22 + $0x3c8] sm:$0xff] }
  0xcb   : > { %1439 = vmatmul.mubr.f32.gmra.mrb[66].mxu1 %v302_v58  ;;  %2345 = vmatprep.subr.bf16.mxu1 %v2344_v56  ;;  %v309_v58 = vld [vmem:[%s2715_s22 + $0x2f0] sm:$0xff] }
  0xcc   : > { %1174 = vmatmul.mubr.f32.gmra.mrb[2].mxu0 %v228_v62  ;;  %1443 = vmatprep.mubr.f32.mxu1 %v312_v63  ;;  %v318_v62 = vld [vmem:[%s2715_s22 + $0x338] sm:$0xff]  ;;  %v337_v47 = vld [vmem:[%s2715_s22 + $0x3d0] sm:$0xff] }
  0xcd   : > { %1178 = vmatprep.mubr.f32.mxu0 %v238_v0  ;;  %2297 = vmatpush1.bf16.msra.mxu0 %v2905_v57  ;;  %v640_v57 = vld [vmem:[%s3956_s1 + $0x448] sm:$0xff]  ;;  %v402_v63 = vld [vmem:[%s2715_s22 + $0x5d8] sm:$0xff] }
  0xce   : > { %2298 = vmatprep.subr.bf16.mxu0 %v2590_v3  ;;  %2347 = vmatpush3.bf16.msra.mxu1 %v2344_v56  ;;  %v2356_v18 = vpack.c.bf16 %v640_v57, %v639_v12  ;;  %v310_v56 = vld [vmem:[%s2715_s22 + $0x2f8] sm:$0xff]  ;;  %v328_v0 = vld [vmem:[%s2715_s22 + $0x388] sm:$0xff] }
  0xcf   : > { %1444 = vmatmul.mubr.f32.gmra.mrb[68].mxu1 %v311_v5  ;;  %2349 = vmatprep.subr.bf16.mxu1 %v2348_v1  ;;  %v411_v5 = vld [vmem:[%s2715_s22 + $0x620] sm:$0xff]  ;;  %v354_v12 = vld [vmem:[%s2715_s22 + $0x458] sm:$0xff] }
  0xd0   : > { %1179 = vmatmul.mubr.f32.gmra.mrb[4].mxu0 %v237_v7  ;;  %1448 = vmatprep.mubr.f32.mxu1 %v321_v23  ;;  %v420_v7 = vld [vmem:[%s2715_s22 + $0x668] sm:$0xff]  ;;  %v346_v23 = vld [vmem:[%s2715_s22 + $0x418] sm:$0xff] }
  0xd1   : > { %1183 = vmatprep.mubr.f32.mxu0 %v247_v8  ;;  %2300 = vmatpush1.bf16.msra.mxu0 %v2926_v4  ;;  %v642_v4 = vld [vmem:[%s3956_s1 + $0x458] sm:$0xff]  ;;  %v345_v8 = vld [vmem:[%s2715_s22 + $0x410] sm:$0xff] }
  0xd2   : > { %2301 = vmatprep.subr.bf16.mxu0 %v2590_v3  ;;  %2351 = vmatpush3.bf16.msra.mxu1 %v2348_v1  ;;  %v2360_v28 = vpack.c.bf16 %v642_v4, %v641_v20  ;;  %v327_v1 = vld [vmem:[%s2715_s22 + $0x380] sm:$0xff]  ;;  %v438_v57 = vld [vmem:[%s2715_s22 + $0x6f8] sm:$0xff] }
  0xd3   : > { %1449 = vmatmul.mubr.f32.gmra.mrb[70].mxu1 %v320_v11  ;;  %2353 = vmatprep.subr.bf16.mxu1 %v2352_v9  ;;  %v355_v11 = vld [vmem:[%s2715_s22 + $0x460] sm:$0xff]  ;;  %v382_v20 = vld [vmem:[%s2715_s22 + $0x538] sm:$0xff] }
  0xd4   : > { %1184 = vmatmul.mubr.f32.gmra.mrb[6].mxu0 %v246_v13  ;;  %1453 = vmatprep.mubr.f32.mxu1 %v330_v16  ;;  %v364_v13 = vld [vmem:[%s2715_s22 + $0x4a8] sm:$0xff]  ;;  %v363_v16 = vld [vmem:[%s2715_s22 + $0x4a0] sm:$0xff] }
  0xd5   : > { %1188 = vmatprep.mubr.f32.mxu0 %v256_v17  ;;  %2303 = vmatpush1.bf16.msra.mxu0 %v2947_v14  ;;  %v644_v14 = vld [vmem:[%s3956_s1 + $0x468] sm:$0xff]  ;;  %v447_v17 = vld [vmem:[%s2715_s22 + $0x740] sm:$0xff] }
  0xd6   : > { %2304 = vmatprep.subr.bf16.mxu0 %v2590_v3  ;;  %2355 = vmatpush3.bf16.msra.mxu1 %v2352_v9  ;;  %v2364_v35 = vpack.c.bf16 %v644_v14, %v643_v30  ;;  %v429_v9 = vld [vmem:[%s2715_s22 + $0x6b0] sm:$0xff]  ;;  %v455_v4 = vld [vmem:[%s2715_s22 + $0x780] sm:$0xff]  ;;  %v400_v30 = vld [vmem:[%s2715_s22 + $0x5c8] sm:$0xff] }
  0xd7   : > { %1454 = vmatmul.mubr.f32.gmra.mrb[72].mxu1 %v329_v19  ;;  %2357 = vmatprep.subr.bf16.mxu1 %v2356_v18  ;;  %v456_v19 = vld [vmem:[%s2715_s22 + $0x788] sm:$0xff]  ;;  %v473_v14 = vld [vmem:[%s2715_s22 + $0x810] sm:$0xff] }
  0xd8   : > { %1189 = vmatmul.mubr.f32.gmra.mrb[8].mxu0 %v255_v21  ;;  %1458 = vmatprep.mubr.f32.mxu1 %v339_v25  ;;  %v465_v21 = vld [vmem:[%s2715_s22 + $0x7d0] sm:$0xff]  ;;  %v391_v25 = vld [vmem:[%s2715_s22 + $0x580] sm:$0xff] }
  0xd9   : > { %1193 = vmatprep.mubr.f32.mxu0 %v265_v27  ;;  %2306 = vmatpush1.bf16.msra.mxu0 %v2968_v24  ;;  %v646_v24 = vld [vmem:[%s3956_s1 + $0x478] sm:$0xff]  ;;  %v464_v27 = vld [vmem:[%s2715_s22 + $0x7c8] sm:$0xff] }
  0xda   : > { %2307 = vmatprep.subr.bf16.mxu0 %v2590_v3  ;;  %2359 = vmatpush3.bf16.msra.mxu1 %v2356_v18  ;;  %v2368_v42 = vpack.c.bf16 %v646_v24, %v645_v38  ;;  %v373_v18 = vld [vmem:[%s2715_s22 + $0x4f0] sm:$0xff]  ;;  %v492_v38 = vld [vmem:[%s2715_s22 + $0x8a8] sm:$0xff]  ;;  %v418_v24 = vld [vmem:[%s2715_s22 + $0x658] sm:$0xff] }
  0xdb   : > { %1459 = vmatmul.mubr.f32.gmra.mrb[74].mxu1 %v338_v29  ;;  %2361 = vmatprep.subr.bf16.mxu1 %v2360_v28  ;;  %v474_v29 = vld [vmem:[%s2715_s22 + $0x818] sm:$0xff] }
  0xdc   : > { %1194 = vmatmul.mubr.f32.gmra.mrb[10].mxu0 %v264_v31  ;;  %1463 = vmatprep.mubr.f32.mxu1 %v348_v32  ;;  %v399_v31 = vld [vmem:[%s2715_s22 + $0x5c0] sm:$0xff] }
  0xdd   : > { %1198 = vmatprep.mubr.f32.mxu0 %v274_v33  ;;  %2309 = vmatpush1.bf16.msra.mxu0 %v2989_v34  ;;  %v292_v34 = vld [vmem:[%s2715_s22 + $0x268] sm:$0xff]  ;;  %v483_v32 = vld [vmem:[%s2715_s22 + $0x860] sm:$0xff]  ;;  %v409_v33 = vld [vmem:[%s2715_s22 + $0x610] sm:$0xff] }
  0xde   : > { %2310 = vmatprep.subr.bf16.mxu0 %v2590_v3  ;;  %2363 = vmatpush3.bf16.msra.mxu1 %v2360_v28  ;;  %v390_v28 = vld [vmem:[%s2715_s22 + $0x578] sm:$0xff] }
  0xdf   : > { %1464 = vmatmul.mubr.f32.gmra.mrb[76].mxu1 %v347_v36  ;;  %2365 = vmatprep.subr.bf16.mxu1 %v2364_v35  ;;  %v408_v36 = vld [vmem:[%s2715_s22 + $0x608] sm:$0xff] }
  0xe0   : > { %1199 = vmatmul.mubr.f32.gmra.mrb[12].mxu0 %v273_v39  ;;  %1468 = vmatprep.mubr.f32.mxu1 %v357_v40 }
  0xe1   : > { %1203 = vmatprep.mubr.f32.mxu0 %v283_v41  ;;  %2312 = vmatpush1.bf16.msra.mxu0 %v3010_v44  ;;  %v374_v44 = vld [vmem:[%s2715_s22 + $0x4f8] sm:$0xff]  ;;  %v491_v41 = vld [vmem:[%s2715_s22 + $0x8a0] sm:$0xff] }
  0xe2   : > { %2313 = vmatprep.subr.bf16.mxu0 %v2590_v3  ;;  %2367 = vmatpush3.bf16.msra.mxu1 %v2364_v35  ;;  %v482_v35 = vld [vmem:[%s2715_s22 + $0x858] sm:$0xff] }
  0xe3   : > { %1469 = vmatmul.mubr.f32.gmra.mrb[78].mxu1 %v356_v43  ;;  %2369 = vmatprep.subr.bf16.mxu1 %v2368_v42  ;;  %v501_v43 = vld [vmem:[%s2715_s22 + $0x8f0] sm:$0xff] }
  0xe4   : > { %1204 = vmatmul.mubr.f32.gmra.mrb[14].mxu0 %v282_v45  ;;  %1473 = vmatprep.mubr.f32.mxu1 %v366_v46  ;;  %v427_v45 = vld [vmem:[%s2715_s22 + $0x6a0] sm:$0xff] }
  0xe5   : > { %1208 = vmatprep.mubr.f32.mxu0 %v292_v34  ;;  %2315 = vmatpush1.bf16.msra.mxu0 %v3031_v55  ;;  %v383_v55 = vld [vmem:[%s2715_s22 + $0x540] sm:$0xff] }
  0xe6   : > { %2316 = vmatprep.subr.bf16.mxu0 %v2590_v3  ;;  %2371 = vmatpush3.bf16.msra.mxu1 %v2368_v42  ;;  %v417_v42 = vld [vmem:[%s2715_s22 + $0x650] sm:$0xff] }
  0xe7   : > { %1474 = vmatmul.mubr.f32.gmra.mrb[80].mxu1 %v365_v48  ;;  %v500_v48 = vld [vmem:[%s2715_s22 + $0x8e8] sm:$0xff] }
  0xe8   : > { %1209 = vmatmul.mubr.f32.gmra.mrb[16].mxu0 %v291_v50  ;;  %1478 = vmatprep.mubr.f32.mxu1 %v375_v51  ;;  %v426_v50 = vld [vmem:[%s2715_s22 + $0x698] sm:$0xff]  ;;  %v223_v51 = vld [vmem:[%s2715_s22 + $0x40] sm:$0xff] }
  0xe9   : > { %1213 = vmatprep.mubr.f32.mxu0 %v301_v52  ;;  %2318 = vmatpush1.bf16.msra.mxu0 %v3052_v2  ;;  %v392_v2 = vld [vmem:[%s2715_s22 + $0x588] sm:$0xff] }
  0xea   : > { %2319 = vmatprep.subr.bf16.mxu0 %v2590_v3  ;;  %v436_v52 = vld [vmem:[%s2715_s22 + $0x6e8] sm:$0xff] }
  0xeb   : > { %1479 = vmatmul.mubr.f32.gmra.mrb[82].mxu1 %v374_v44 }
  0xec   : > { %1214 = vmatmul.mubr.f32.gmra.mrb[18].mxu0 %v300_v53  ;;  %1483 = vmatprep.mubr.f32.mxu1 %v384_v54  ;;  %v232_v54 = vld [vmem:[%s2715_s22 + $0x88] sm:$0xff] }
  0xed   : > { %1218 = vmatprep.mubr.f32.mxu0 %v310_v56  ;;  %2321 = vmatpush1.bf16.msra.mxu0 %v3073_v15  ;;  %v401_v15 = vld [vmem:[%s2715_s22 + $0x5d0] sm:$0xff]  ;;  %v435_v56 = vld [vmem:[%s2715_s22 + $0x6e0] sm:$0xff] }
  0xee   : > { %2322 = vmatprep.subr.bf16.mxu0 %v2590_v3 }
  0xef   : > { %1484 = vmatmul.mubr.f32.gmra.mrb[84].mxu1 %v383_v55  ;;  %v241_v55 = vld [vmem:[%s2715_s22 + $0xd0] sm:$0xff] }
  0xf0   : > { %1219 = vmatmul.mubr.f32.gmra.mrb[20].mxu0 %v309_v58  ;;  %1488 = vmatprep.mubr.f32.mxu1 %v393_v59  ;;  %v445_v58 = vld [vmem:[%s2715_s22 + $0x730] sm:$0xff] }
  0xf1   : > { %1223 = vmatprep.mubr.f32.mxu0 %v319_v60  ;;  %2324 = vmatpush1.bf16.msra.mxu0 %v3094_v26  ;;  %v410_v26 = vld [vmem:[%s2715_s22 + $0x618] sm:$0xff] }
  0xf2   : > { %2325 = vmatprep.subr.bf16.mxu0 %v2590_v3 }
  0xf3   : > { %1489 = vmatmul.mubr.f32.gmra.mrb[86].mxu1 %v392_v2  ;;  %v250_v2 = vld [vmem:[%s2715_s22 + $0x118] sm:$0xff] }
  0xf4   : > { %1224 = vmatmul.mubr.f32.gmra.mrb[22].mxu0 %v318_v62  ;;  %1493 = vmatprep.mubr.f32.mxu1 %v402_v63  ;;  %v444_v62 = vld [vmem:[%s2715_s22 + $0x728] sm:$0xff]  ;;  %v259_v63 = vld [vmem:[%s2715_s22 + $0x160] sm:$0xff] }
  0xf5   : > { %1228 = vmatprep.mubr.f32.mxu0 %v328_v0  ;;  %2327 = vmatpush1.bf16.msra.mxu0 %v3115_v37  ;;  %v419_v37 = vld [vmem:[%s2715_s22 + $0x660] sm:$0xff]  ;;  %v454_v0 = vld [vmem:[%s2715_s22 + $0x778] sm:$0xff] }
  0xf6   : > { %2328 = vmatprep.subr.bf16.mxu0 %v2590_v3 }
  0xf7   : > { %1494 = vmatmul.mubr.f32.gmra.mrb[88].mxu1 %v401_v15 }
  0xf8   : > { %1229 = vmatmul.mubr.f32.gmra.mrb[24].mxu0 %v327_v1  ;;  %1498 = vmatprep.mubr.f32.mxu1 %v411_v5  ;;  %v268_v5 = vld [vmem:[%s2715_s22 + $0x1a8] sm:$0xff] }
  0xf9   : > { %1233 = vmatprep.mubr.f32.mxu0 %v337_v47  ;;  %2330 = vmatpush1.bf16.msra.mxu0 %v3136_v49  ;;  %v428_v49 = vld [vmem:[%s2715_s22 + $0x6a8] sm:$0xff]  ;;  %v453_v47 = vld [vmem:[%s2715_s22 + $0x770] sm:$0xff] }
  0xfa   : > { %2331 = vmatprep.subr.bf16.mxu0 %v2590_v3 }
  0xfb   : > { %1499 = vmatmul.mubr.f32.gmra.mrb[90].mxu1 %v410_v26  ;;  %v277_v26 = vld [vmem:[%s2715_s22 + $0x1f0] sm:$0xff] }
  0xfc   : > { %1234 = vmatmul.mubr.f32.gmra.mrb[26].mxu0 %v336_v6  ;;  %1503 = vmatprep.mubr.f32.mxu1 %v420_v7  ;;  %v463_v6 = vld [vmem:[%s2715_s22 + $0x7c0] sm:$0xff] }
  0xfd   : > { %1238 = vmatprep.mubr.f32.mxu0 %v346_v23  ;;  %2333 = vmatpush1.bf16.msra.mxu0 %v3157_v61  ;;  %v437_v61 = vld [vmem:[%s2715_s22 + $0x6f0] sm:$0xff] }
  0xfe   : > { %2334 = vmatprep.subr.bf16.mxu0 %v2590_v3 }
  0xff   : > { %1504 = vmatmul.mubr.f32.gmra.mrb[92].mxu1 %v419_v37  ;;  %v286_v37 = vld [vmem:[%s2715_s22 + $0x238] sm:$0xff] }
 0x100   : > { %1239 = vmatmul.mubr.f32.gmra.mrb[28].mxu0 %v345_v8  ;;  %1508 = vmatprep.mubr.f32.mxu1 %v429_v9  ;;  %v462_v8 = vld [vmem:[%s2715_s22 + $0x7b8] sm:$0xff]  ;;  %v295_v9 = vld [vmem:[%s2715_s22 + $0x280] sm:$0xff] }
 0x101   : > { %1243 = vmatprep.mubr.f32.mxu0 %v355_v11  ;;  %2336 = vmatpush1.bf16.msra.mxu0 %v3178_v10  ;;  %v372_v10 = vld [vmem:[%s2715_s22 + $0x4e8] sm:$0xff] }
 0x102   : > { %2337 = vmatprep.subr.bf16.mxu0 %v2590_v3  ;;  %v446_v3 = vld [vmem:[%s2715_s22 + $0x738] sm:$0xff]  ;;  %v472_v11 = vld [vmem:[%s2715_s22 + $0x808] sm:$0xff] }
 0x103   : > { %1509 = vmatmul.mubr.f32.gmra.mrb[94].mxu1 %v428_v49 }
 0x104   : > { %1244 = vmatmul.mubr.f32.gmra.mrb[30].mxu0 %v354_v12  ;;  %1513 = vmatprep.mubr.f32.mxu1 %v438_v57  ;;  %v304_v57 = vld [vmem:[%s2715_s22 + $0x2c8] sm:$0xff] }
 0x105   : > { %1248 = vmatprep.mubr.f32.mxu0 %v364_v13  ;;  %2339 = vmatpush1.bf16.msra.mxu0 %v3199_v22  ;;  %v381_v22 = vld [vmem:[%s2715_s22 + $0x530] sm:$0xff]  ;;  %v471_v13 = vld [vmem:[%s2715_s22 + $0x800] sm:$0xff] }
 0x107   : > { %1514 = vmatmul.mubr.f32.gmra.mrb[96].mxu1 %v437_v61  ;;  %v313_v61 = vld [vmem:[%s2715_s22 + $0x310] sm:$0xff] }
 0x108   : > { %1249 = vmatmul.mubr.f32.gmra.mrb[32].mxu0 %v363_v16  ;;  %1518 = vmatprep.mubr.f32.mxu1 %v447_v17  ;;  %v481_v16 = vld [vmem:[%s2715_s22 + $0x850] sm:$0xff] }
 0x109   : > { %1253 = vmatprep.mubr.f32.mxu0 %v373_v18 }
 0x10b   : > { %1519 = vmatmul.mubr.f32.gmra.mrb[98].mxu1 %v446_v3  ;;  %v322_v3 = vld [vmem:[%s2715_s22 + $0x358] sm:$0xff] }
 0x10c   : > { %1254 = vmatmul.mubr.f32.gmra.mrb[34].mxu0 %v372_v10  ;;  %1523 = vmatprep.mubr.f32.mxu1 %v456_v19  ;;  %v480_v10 = vld [vmem:[%s2715_s22 + $0x848] sm:$0xff]  ;;  %v331_v19 = vld [vmem:[%s2715_s22 + $0x3a0] sm:$0xff] }
 0x10d   : > { %1258 = vmatprep.mubr.f32.mxu0 %v382_v20  ;;  %v490_v20 = vld [vmem:[%s2715_s22 + $0x898] sm:$0xff] }
 0x10f   : > { %1524 = vmatmul.mubr.f32.gmra.mrb[100].mxu1 %v455_v4 }
 0x110   : > { %1259 = vmatmul.mubr.f32.gmra.mrb[36].mxu0 %v381_v22  ;;  %1528 = vmatprep.mubr.f32.mxu1 %v465_v21  ;;  %v340_v21 = vld [vmem:[%s2715_s22 + $0x3e8] sm:$0xff] }
 0x111   : > { %1263 = vmatprep.mubr.f32.mxu0 %v391_v25  ;;  %v489_v25 = vld [vmem:[%s2715_s22 + $0x890] sm:$0xff] }
 0x113   : > { %1529 = vmatmul.mubr.f32.gmra.mrb[102].mxu1 %v464_v27  ;;  %v349_v27 = vld [vmem:[%s2715_s22 + $0x430] sm:$0xff] }
 0x114   : > { %1264 = vmatmul.mubr.f32.gmra.mrb[38].mxu0 %v390_v28  ;;  %1533 = vmatprep.mubr.f32.mxu1 %v474_v29  ;;  %v499_v28 = vld [vmem:[%s2715_s22 + $0x8e0] sm:$0xff] }
 0x115   : > { %1268 = vmatprep.mubr.f32.mxu0 %v400_v30 }
 0x117   : > { %1534 = vmatmul.mubr.f32.gmra.mrb[104].mxu1 %v473_v14  ;;  %v358_v14 = vld [vmem:[%s2715_s22 + $0x478] sm:$0xff] }
 0x118   : > { %1269 = vmatmul.mubr.f32.gmra.mrb[40].mxu0 %v399_v31  ;;  %1538 = vmatprep.mubr.f32.mxu1 %v483_v32  ;;  %v498_v31 = vld [vmem:[%s2715_s22 + $0x8d8] sm:$0xff]  ;;  %v367_v32 = vld [vmem:[%s2715_s22 + $0x4c0] sm:$0xff] }
 0x119   : > { %1273 = vmatprep.mubr.f32.mxu0 %v409_v33  ;;  %v222_v33 = vld [vmem:[%s2715_s22 + $0x38] sm:$0xff] }
 0x11a   : > { %v3433_v39 = vpop.f32.mrb[0].mxu1 }
 0x11b   : > { %1539 = vmatmul.mubr.f32.gmra.mrb[106].mxu1 %v482_v35  ;;  %v722_v40 = vpop.f32.mrb[1].mxu1 }
 0x11c   : > { %1274 = vmatmul.mubr.f32.gmra.mrb[42].mxu0 %v408_v36  ;;  %1543 = vmatprep.mubr.f32.mxu1 %v492_v38  ;;  %v376_v38 = vld [vmem:[%s2715_s22 + $0x508] sm:$0xff]  ;;  %v385_v40 = vld [vmem:[%s2715_s22 + $0x550] sm:$0xff] }
 0x11d   : > { %1278 = vmatprep.mubr.f32.mxu0 %v418_v24  ;;  %v221_v24 = vld [vmem:[%s2715_s22 + $0x30] sm:$0xff] }
 0x11e   : > { %v3439_v46 = vpop.f32.mrb[2].mxu1 }
 0x11f   : > { %1544 = vmatmul.mubr.f32.gmra.mrb[108].mxu1 %v491_v41  ;;  %v727_v34 = vpop.f32.mrb[3].mxu1  ;;  %v231_v41 = vld [vmem:[%s2715_s22 + $0x80] sm:$0xff] }
 0x120   : > { %1279 = vmatmul.mubr.f32.gmra.mrb[44].mxu0 %v417_v42  ;;  %1548 = vmatprep.mubr.f32.mxu1 %v501_v43  ;;  %v230_v34 = vld [vmem:[%s2715_s22 + $0x78] sm:$0xff] }
 0x121   : > { %1283 = vmatprep.mubr.f32.mxu0 %v427_v45  ;;  %v394_v45 = vld [vmem:[%s2715_s22 + $0x598] sm:$0xff] }
 0x122   : > { %v3445_v44 = vpop.f32.mrb[4].mxu1 }
 0x123   : > { %1549 = vmatmul.mubr.f32.gmra.mrb[110].mxu1 %v500_v48  ;;  %v732_v53 = vpop.f32.mrb[5].mxu1  ;;  %v403_v48 = vld [vmem:[%s2715_s22 + $0x5e0] sm:$0xff] }
 0x124   : > { %1284 = vmatmul.mubr.f32.gmra.mrb[46].mxu0 %v426_v50  ;;  %2100 = vmatprep.mubr.f32.mxu1 %v223_v51  ;;  %v240_v50 = vld [vmem:[%s2715_s22 + $0xc8] sm:$0xff] }
 0x125   : > { %1288 = vmatprep.mubr.f32.mxu0 %v436_v52  ;;  %v412_v53 = vld [vmem:[%s2715_s22 + $0x628] sm:$0xff] }
 0x126   : > { %v3451_v59 = vpop.f32.mrb[6].mxu1 }
 0x127   : > { %2101 = vmatmul.mubr.f32.vlgmr.msra.gmra.mrb[112].mxu1 %v232_v54  ;;  %v737_v60 = vpop.f32.mrb[7].mxu1  ;;  %v239_v54 = vld [vmem:[%s2715_s22 + $0xc0] sm:$0xff] }
 0x128   : > { %1289 = vmatmul.mubr.f32.gmra.mrb[48].mxu0 %v435_v56  ;;  %2103 = vmatprep.mubr.f32.mxu1 %v241_v55  ;;  %v421_v56 = vld [vmem:[%s2715_s22 + $0x670] sm:$0xff] }
 0x129   : > { %1293 = vmatprep.mubr.f32.mxu0 %v445_v58  ;;  %v249_v55 = vld [vmem:[%s2715_s22 + $0x110] sm:$0xff] }
 0x12a   : > { %v3457_v15 = vpop.f32.mrb[8].mxu1 }
 0x12b   : > { %2104 = vmatmul.mubr.f32.gmra.mrb[114].mxu1 %v250_v2  ;;  %v742_v1 = vpop.f32.mrb[9].mxu1  ;;  %v430_v2 = vld [vmem:[%s2715_s22 + $0x6b8] sm:$0xff] }
 0x12c   : > { %1294 = vmatmul.mubr.f32.gmra.mrb[50].mxu0 %v444_v62  ;;  %2106 = vmatprep.mubr.f32.mxu1 %v259_v63  ;;  %v248_v62 = vld [vmem:[%s2715_s22 + $0x108] sm:$0xff]  ;;  %v439_v63 = vld [vmem:[%s2715_s22 + $0x700] sm:$0xff] }
 0x12d   : > { %1298 = vmatprep.mubr.f32.mxu0 %v454_v0  ;;  %v258_v0 = vld [vmem:[%s2715_s22 + $0x158] sm:$0xff] }
 0x12e   : > { %v3463_v7 = vpop.f32.mrb[10].mxu1 }
 0x12f   : > { %2107 = vmatmul.mubr.f32.gmra.mrb[116].mxu1 %v268_v5  ;;  %v747_v23 = vpop.f32.mrb[11].mxu1 }
 0x130   : > { %1299 = vmatmul.mubr.f32.gmra.mrb[52].mxu0 %v453_v47  ;;  %2109 = vmatprep.mubr.f32.mxu1 %v277_v26  ;;  %v448_v47 = vld [vmem:[%s2715_s22 + $0x748] sm:$0xff]  ;;  %v257_v26 = vld [vmem:[%s2715_s22 + $0x150] sm:$0xff]  ;;  %v267_v23 = vld [vmem:[%s2715_s22 + $0x1a0] sm:$0xff] }
 0x131   : > { %1303 = vmatprep.mubr.f32.mxu0 %v463_v6  ;;  %v457_v6 = vld [vmem:[%s2715_s22 + $0x790] sm:$0xff] }
 0x132   : > { %v3469_v49 = vpop.f32.mrb[12].mxu1 }
 0x133   : > { %2110 = vmatmul.mubr.f32.gmra.mrb[118].mxu1 %v286_v37  ;;  %v752_v12 = vpop.f32.mrb[13].mxu1 }
 0x134   : > { %1304 = vmatmul.mubr.f32.gmra.mrb[54].mxu0 %v462_v8  ;;  %2112 = vmatprep.mubr.f32.mxu1 %v295_v9  ;;  %v466_v9 = vld [vmem:[%s2715_s22 + $0x7d8] sm:$0xff]  ;;  %v475_v12 = vld [vmem:[%s2715_s22 + $0x820] sm:$0xff] }
 0x135   : > { %1308 = vmatprep.mubr.f32.mxu0 %v472_v11  ;;  %v266_v11 = vld [vmem:[%s2715_s22 + $0x198] sm:$0xff] }
 0x136   : > { %v3475_v17 = vpop.f32.mrb[14].mxu1 }
 0x137   : > { %2113 = vmatmul.mubr.f32.gmra.mrb[120].mxu1 %v304_v57  ;;  %v757_v18 = vpop.f32.mrb[15].mxu1  ;;  %v276_v57 = vld [vmem:[%s2715_s22 + $0x1e8] sm:$0xff] }
 0x138   : > { %1309 = vmatmul.mubr.f32.gmra.mrb[56].mxu0 %v471_v13  ;;  %2115 = vmatprep.mubr.f32.mxu1 %v313_v61  ;;  %v275_v18 = vld [vmem:[%s2715_s22 + $0x1e0] sm:$0xff] }
 0x139   : > { %1313 = vmatprep.mubr.f32.mxu0 %v481_v16  ;;  %v484_v16 = vld [vmem:[%s2715_s22 + $0x868] sm:$0xff] }
 0x13a   : > { %v3481_v4 = vpop.f32.mrb[16].mxu1 }
 0x13b   : > { %2116 = vmatmul.mubr.f32.gmra.mrb[122].mxu1 %v322_v3  ;;  %v762_v22 = vpop.f32.mrb[17].mxu1  ;;  %v493_v3 = vld [vmem:[%s2715_s22 + $0x8b0] sm:$0xff] }
 0x13c   : > { %1314 = vmatmul.mubr.f32.gmra.mrb[58].mxu0 %v480_v10  ;;  %2118 = vmatprep.mubr.f32.mxu1 %v331_v19  ;;  %v285_v10 = vld [vmem:[%s2715_s22 + $0x230] sm:$0xff]  ;;  %v502_v22 = vld [vmem:[%s2715_s22 + $0x8f8] sm:$0xff] }
 0x13d   : > { %1318 = vmatprep.mubr.f32.mxu0 %v490_v20 }
 0x13e   : > { %v3487_v29 = vpop.f32.mrb[18].mxu1 }
 0x13f   : > { %2119 = vmatmul.mubr.f32.gmra.mrb[124].mxu1 %v340_v21  ;;  %v767_v30 = vpop.f32.mrb[19].mxu1  ;;  %v284_v21 = vld [vmem:[%s2715_s22 + $0x228] sm:$0xff] }
 0x140   : > { %1319 = vmatmul.mubr.f32.gmra.mrb[60].mxu0 %v489_v25  ;;  %2121 = vmatprep.mubr.f32.mxu1 %v349_v27 }
 0x141   : > { %1323 = vmatprep.mubr.f32.mxu0 %v499_v28 }
 0x142   : > { %v3493_v35 = vpop.f32.mrb[20].mxu1 }
 0x143   : > { %2122 = vmatmul.mubr.f32.gmra.mrb[126].mxu1 %v358_v14  ;;  %v772_v36 = vpop.f32.mrb[21].mxu1 }
 0x144   : > { %1324 = vmatmul.mubr.f32.gmra.mrb[62].mxu0 %v498_v31  ;;  %2124 = vmatprep.mubr.f32.mxu1 %v367_v32 }
 0x145   : > { %1393 = vmatprep.mubr.f32.mxu0 %v222_v33 }
 0x146   : > { %v3499_v42 = vpop.f32.mrb[22].mxu1 }
 0x147   : > { %2125 = vmatmul.mubr.f32.gmra.mrb[128].mxu1 %v376_v38  ;;  %v777_v43 = vpop.f32.mrb[23].mxu1 }
 0x148   : > { %1394 = vmatmul.mubr.f32.vlgmr.msra.gmra.mrb[0].mxu0 %v221_v24  ;;  %2127 = vmatprep.mubr.f32.mxu1 %v385_v40 }
 0x149   : > { %1398 = vmatprep.mubr.f32.mxu0 %v231_v41 }
 0x14a   : > { %v3505_v51 = vpop.f32.mrb[24].mxu1 }
 0x14b   : > { %2128 = vmatmul.mubr.f32.gmra.mrb[130].mxu1 %v394_v45  ;;  %v782_v52 = vpop.f32.mrb[25].mxu1 }
 0x14c   : > { %1399 = vmatmul.mubr.f32.gmra.mrb[2].mxu0 %v230_v34  ;;  %2130 = vmatprep.mubr.f32.mxu1 %v403_v48 }
 0x14d   : > { %1403 = vmatprep.mubr.f32.mxu0 %v240_v50 }
 0x14e   : > { %v3511_v58 = vpop.f32.mrb[26].mxu1 }
 0x14f   : > { %2131 = vmatmul.mubr.f32.gmra.mrb[132].mxu1 %v412_v53  ;;  %v787_v60 = vpop.f32.mrb[27].mxu1 }
 0x150   : > { %1404 = vmatmul.mubr.f32.gmra.mrb[4].mxu0 %v239_v54  ;;  %2133 = vmatprep.mubr.f32.mxu1 %v421_v56 }
 0x151   : > { %1408 = vmatprep.mubr.f32.mxu0 %v249_v55 }
 0x152   : > { %v3517_v1 = vpop.f32.mrb[28].mxu1 }
 0x153   : > { %2134 = vmatmul.mubr.f32.gmra.mrb[134].mxu1 %v430_v2  ;;  %v792_v5 = vpop.f32.mrb[29].mxu1 }
 0x154   : > { %1409 = vmatmul.mubr.f32.gmra.mrb[6].mxu0 %v248_v62  ;;  %2136 = vmatprep.mubr.f32.mxu1 %v439_v63 }
 0x155   : > { %1413 = vmatprep.mubr.f32.mxu0 %v258_v0 }
 0x156   : > { %v3523_v37 = vpop.f32.mrb[30].mxu1 }
 0x157   : > { %2137 = vmatmul.mubr.f32.gmra.mrb[136].mxu1 %v448_v47  ;;  %v797_v8 = vpop.f32.mrb[31].mxu1 }
 0x158   : > { %1414 = vmatmul.mubr.f32.gmra.mrb[8].mxu0 %v257_v26  ;;  %2139 = vmatprep.mubr.f32.mxu1 %v457_v6 }
 0x159   : > { %1418 = vmatprep.mubr.f32.mxu0 %v267_v23 }
 0x15a   : > { %v3529_v13 = vpop.f32.mrb[32].mxu1 }
 0x15b   : > { %2140 = vmatmul.mubr.f32.gmra.mrb[138].mxu1 %v466_v9  ;;  %v802_v61 = vpop.f32.mrb[33].mxu1 }
 0x15c   : > { %1419 = vmatmul.mubr.f32.gmra.mrb[10].mxu0 %v266_v11  ;;  %2142 = vmatprep.mubr.f32.mxu1 %v475_v12 }
 0x15d   : > { %1423 = vmatprep.mubr.f32.mxu0 %v276_v57 }
 0x15e   : > { %v3535_v19 = vpop.f32.mrb[34].mxu1 }
 0x15f   : > { %2143 = vmatmul.mubr.f32.gmra.mrb[140].mxu1 %v484_v16  ;;  %v807_v20 = vpop.f32.mrb[35].mxu1 }
 0x160   : > { %1424 = vmatmul.mubr.f32.gmra.mrb[12].mxu0 %v275_v18  ;;  %2145 = vmatprep.mubr.f32.mxu1 %v493_v3 }
 0x161   : > { %1428 = vmatprep.mubr.f32.mxu0 %v285_v10 }
 0x162   : > { %v3539_v25 = vpop.f32.mrb[36].mxu1 }
 0x163   : > { %2146 = vmatmul.mubr.f32.gmra.mrb[142].mxu1 %v502_v22  ;;  %v812_v27 = vpop.f32.mrb[37].mxu1  ;;  %v3570_v22 = vld [vmem:[%s3957_s2] ss:$0 sm:$0xff] }
 0x164   : > { %1429 = vmatmul.mubr.f32.gmra.mrb[14].mxu0 %v284_v21  ;;  %v761_v21 = vadd.f32 %v3570_v22, %v3481_v4 }
 0x166   : > { %v3541_v28 = vpop.f32.mrb[38].mxu1 }
 0x167   : > { %v817_v30 = vpop.f32.mrb[39].mxu1 }
 0x16a   : > { %v3543_v14 = vpop.f32.mrb[40].mxu1 }
 0x16b   : > { %v822_v31 = vpop.f32.mrb[41].mxu1 }
 0x16e   : > { %v3545_v32 = vpop.f32.mrb[42].mxu1 }
 0x16f   : > { %v827_v33 = vpop.f32.mrb[43].mxu1 }
 0x172   : > { %v3547_v36 = vpop.f32.mrb[44].mxu1 }
 0x173   : > { %v832_v38 = vpop.f32.mrb[45].mxu1 }
 0x176   : > { %v3549_v24 = vpop.f32.mrb[46].mxu1 }
 0x177   : > { %v837_v40 = vpop.f32.mrb[47].mxu1 }
 0x178   : > { %v766_v40 = vadd.f32 %v3570_v22, %v3487_v29  ;;  %v776_v29 = vadd.f32 %v3570_v22, %v3499_v42  ;;  %v786_v42 = vadd.f32 %v3570_v22, %v3511_v58  ;;  %v796_v58 = vadd.f32 %v3570_v22, %v3523_v37 }
 0x179   : > { %v806_v37 = vadd.f32 %v3570_v22, %v3535_v19  ;;  %v816_v19 = vadd.f32 %v3570_v22, %v3541_v28  ;;  %v826_v28 = vadd.f32 %v3570_v22, %v3545_v32 }
 0x17a   : > { %v3551_v41 = vpop.f32.mrb[48].mxu1 }
 0x17b   : > { %v842_v43 = vpop.f32.mrb[49].mxu1 }
 0x17e   : > { %v3553_v45 = vpop.f32.mrb[50].mxu1 }
 0x17f   : > { %v847_v34 = vpop.f32.mrb[51].mxu1 }
 0x182   : > { %v3555_v48 = vpop.f32.mrb[52].mxu1 }
 0x183   : > { %v852_v50 = vpop.f32.mrb[53].mxu1 }
 0x186   : > { %v3557_v52 = vpop.f32.mrb[54].mxu1 }
 0x187   : > { %v857_v53 = vpop.f32.mrb[55].mxu1 }
 0x18a   : > { %v3559_v54 = vpop.f32.mrb[56].mxu1 }
 0x18b   : > { %v862_v56 = vpop.f32.mrb[57].mxu1 }
 0x18e   : > { %v3561_v55 = vpop.f32.mrb[58].mxu1 }
 0x18f   : > { %v867_v60 = vpop.f32.mrb[59].mxu1 }
 0x192   : > { %v3563_v2 = vpop.f32.mrb[60].mxu1 }
 0x193   : > { %v872_v62 = vpop.f32.mrb[61].mxu1 }
 0x194   : > { %v771_v62 = vadd.f32 %v3570_v22, %v3493_v35  ;;  %v781_v35 = vadd.f32 %v3570_v22, %v3505_v51  ;;  %v791_v51 = vadd.f32 %v3570_v22, %v3517_v1  ;;  %v801_v1 = vadd.f32 %v3570_v22, %v3529_v13 }
 0x195   : > { %v811_v13 = vadd.f32 %v3570_v22, %v3539_v25  ;;  %v821_v25 = vadd.f32 %v3570_v22, %v3543_v14  ;;  %v831_v14 = vadd.f32 %v3570_v22, %v3547_v36 }
 0x196   : > { %v3565_v63 = vpop.f32.mrb[62].mxu1 }
 0x197   : > { %v877_v0 = vpop.f32.mrb[63].mxu1 }
 0x19a   : > { %v1435_v5 = vpop.f32.mrb[64].mxu1 }
 0x19b   : > { %v1437_v47 = vpop.f32.mrb[65].mxu1 }
 0x19e   : > { %v1440_v26 = vpop.f32.mrb[66].mxu1 }
 0x19f   : > { %v1442_v6 = vpop.f32.mrb[67].mxu1 }
 0x1a2   : > { %v1445_v23 = vpop.f32.mrb[68].mxu1 }
 0x1a3   : > { %v1447_v8 = vpop.f32.mrb[69].mxu1 }
 0x1a6   : > { %v1450_v9 = vpop.f32.mrb[70].mxu1 }
 0x1a7   : > { %v1452_v11 = vpop.f32.mrb[71].mxu1 }
 0x1aa   : > { %v1455_v12 = vpop.f32.mrb[72].mxu1 }
 0x1ab   : > { %v1457_v57 = vpop.f32.mrb[73].mxu1 }
 0x1ae   : > { %v1460_v61 = vpop.f32.mrb[74].mxu1 }
 0x1af   : > { %v1462_v16 = vpop.f32.mrb[75].mxu1 }
 0x1b2   : > { %v1465_v18 = vpop.f32.mrb[76].mxu1 }
 0x1b3   : > { %v1467_v3 = vpop.f32.mrb[77].mxu1 }
 0x1b6   : > { %v1470_v10 = vpop.f32.mrb[78].mxu1 }
 0x1b7   : > { %v1472_v20 = vpop.f32.mrb[79].mxu1 }
 0x1ba   : > { %v1475_v27 = vpop.f32.mrb[80].mxu1 }
 0x1bb   : > { %v1210_v30 = vpop.f32.mrb[16].mxu0  ;;  %v1477_v31 = vpop.f32.mrb[81].mxu1 }
 0x1bc   : > { %v2421_v33 = vadd.f32 %v1210_v30, %v761_v21  ;;  %v1212_v38 = vpop.f32.mrb[17].mxu0 }
 0x1be   : > { %v3576_v43 = vadd.f32 %v2421_v33, %v1435_v5  ;;  %v1480_v34 = vpop.f32.mrb[82].mxu1 }
 0x1bf   : > { %v1215_v50 = vpop.f32.mrb[18].mxu0  ;;  %v1482_v53 = vpop.f32.mrb[83].mxu1 }
 0x1c0   : > { %v2424_v56 = vadd.f32 %v1215_v50, %v766_v40  ;;  %v1217_v60 = vpop.f32.mrb[19].mxu0 }
 0x1c2   : > { %v3580_v0 = vadd.f32 %v2424_v56, %v1440_v26  ;;  %v1485_v4 = vpop.f32.mrb[84].mxu1 }
 0x1c3   : > { %v1220_v47 = vpop.f32.mrb[20].mxu0  ;;  %v1487_v6 = vpop.f32.mrb[85].mxu1 }
 0x1c4   : > { %v2427_v8 = vadd.f32 %v1220_v47, %v771_v62  ;;  %v1222_v11 = vpop.f32.mrb[21].mxu0 }
 0x1c6   : > { %v3584_v5 = vadd.f32 %v2427_v8, %v1445_v23  ;;  %v1490_v57 = vpop.f32.mrb[86].mxu1 }
 0x1c7   : > { %v1225_v16 = vpop.f32.mrb[22].mxu0  ;;  %v1492_v3 = vpop.f32.mrb[87].mxu1 }
 0x1c8   : > { %v2430_v20 = vadd.f32 %v1225_v16, %v776_v29  ;;  %v1227_v21 = vpop.f32.mrb[23].mxu0 }
 0x1ca   : > { %v3588_v26 = vadd.f32 %v2430_v20, %v1450_v9  ;;  %v1495_v30 = vpop.f32.mrb[88].mxu1 }
 0x1cb   : > { %v1230_v31 = vpop.f32.mrb[24].mxu0  ;;  %v1497_v33 = vpop.f32.mrb[89].mxu1 }
 0x1cc   : > { %v2433_v38 = vadd.f32 %v1230_v31, %v781_v35  ;;  %v1232_v40 = vpop.f32.mrb[25].mxu0 }
 0x1ce   : > { %v3592_v23 = vadd.f32 %v2433_v38, %v1455_v12  ;;  %v3594_v50 = vpop.f32.mrb[90].mxu1 }
 0x1cf   : > { %v1235_v53 = vpop.f32.mrb[26].mxu0  ;;  %v1502_v56 = vpop.f32.mrb[91].mxu1 }
 0x1d0   : > { %v2436_v60 = vadd.f32 %v1235_v53, %v786_v42  ;;  %v1237_v62 = vpop.f32.mrb[27].mxu0 }
 0x1d2   : > { %v3598_v9 = vadd.f32 %v2436_v60, %v1460_v61  ;;  %v3600_v47 = vpop.f32.mrb[92].mxu1 }
 0x1d3   : > { %v1240_v6 = vpop.f32.mrb[28].mxu0  ;;  %v1507_v8 = vpop.f32.mrb[93].mxu1 }
 0x1d4   : > { %v2439_v11 = vadd.f32 %v1240_v6, %v791_v51  ;;  %v1242_v29 = vpop.f32.mrb[29].mxu0 }
 0x1d6   : > { %v3604_v12 = vadd.f32 %v2439_v11, %v1465_v18  ;;  %v3606_v16 = vpop.f32.mrb[94].mxu1 }
 0x1d7   : > { %v1245_v3 = vpop.f32.mrb[30].mxu0  ;;  %v1512_v20 = vpop.f32.mrb[95].mxu1 }
 0x1d8   : > { %v2442_v21 = vadd.f32 %v1245_v3, %v796_v58  ;;  %v1247_v35 = vpop.f32.mrb[31].mxu0 }
 0x1da   : > { %v3610_v61 = vadd.f32 %v2442_v21, %v1470_v10  ;;  %v3612_v31 = vpop.f32.mrb[96].mxu1 }
 0x1db   : > { %v1250_v33 = vpop.f32.mrb[32].mxu0  ;;  %v1517_v38 = vpop.f32.mrb[97].mxu1 }
 0x1dc   : > { %v2445_v40 = vadd.f32 %v1250_v33, %v801_v1  ;;  %v1252_v42 = vpop.f32.mrb[33].mxu0 }
 0x1de   : > { %v3616_v18 = vadd.f32 %v2445_v40, %v1475_v27  ;;  %v3618_v53 = vpop.f32.mrb[98].mxu1 }
 0x1df   : > { %v1255_v56 = vpop.f32.mrb[34].mxu0  ;;  %v1522_v60 = vpop.f32.mrb[99].mxu1 }
 0x1e0   : > { %v2448_v62 = vadd.f32 %v1255_v56, %v806_v37  ;;  %v1257_v51 = vpop.f32.mrb[35].mxu0 }
 0x1e2   : > { %v3622_v10 = vadd.f32 %v2448_v62, %v1480_v34  ;;  %v3624_v6 = vpop.f32.mrb[100].mxu1 }
 0x1e3   : > { %v1260_v8 = vpop.f32.mrb[36].mxu0  ;;  %v1527_v11 = vpop.f32.mrb[101].mxu1 }
 0x1e4   : > { %v2451_v29 = vadd.f32 %v1260_v8, %v811_v13  ;;  %v1262_v58 = vpop.f32.mrb[37].mxu0 }
 0x1e6   : > { %v3628_v27 = vadd.f32 %v2451_v29, %v1485_v4  ;;  %v3630_v3 = vpop.f32.mrb[102].mxu1 }
 0x1e7   : > { %v1265_v20 = vpop.f32.mrb[38].mxu0  ;;  %v1532_v21 = vpop.f32.mrb[103].mxu1 }
 0x1e8   : > { %v2454_v35 = vadd.f32 %v1265_v20, %v816_v19  ;;  %v1267_v1 = vpop.f32.mrb[39].mxu0 }
 0x1ea   : > { %v3634_v34 = vadd.f32 %v2454_v35, %v1490_v57  ;;  %v3636_v33 = vpop.f32.mrb[104].mxu1 }
 0x1eb   : > { %v1270_v38 = vpop.f32.mrb[40].mxu0  ;;  %v1537_v40 = vpop.f32.mrb[105].mxu1 }
 0x1ec   : > { %v2457_v42 = vadd.f32 %v1270_v38, %v821_v25  ;;  %v1272_v37 = vpop.f32.mrb[41].mxu0 }
 0x1ee   : > { %v3640_v4 = vadd.f32 %v2457_v42, %v1495_v30  ;;  %v3642_v56 = vpop.f32.mrb[106].mxu1  ;;  %v836_v30 = vadd.f32 %v3570_v22, %v3549_v24 }
 0x1ef   : > { %v1275_v60 = vpop.f32.mrb[42].mxu0  ;;  %v1542_v62 = vpop.f32.mrb[107].mxu1 }
 0x1f0   : > { %v2460_v51 = vadd.f32 %v1275_v60, %v826_v28  ;;  %v1277_v13 = vpop.f32.mrb[43].mxu0 }
 0x1f1   : > { %v851_v13 = vadd.f32 %v3570_v22, %v3555_v48 }
 0x1f2   : > { %v3646_v57 = vpop.f32.mrb[108].mxu1  ;;  %v3649_v8 = vadd.f32 %v2460_v51, %v3594_v50  ;;  %v841_v50 = vadd.f32 %v3570_v22, %v3551_v41 }
 0x1f3   : > { %v1280_v11 = vpop.f32.mrb[44].mxu0  ;;  %v1547_v29 = vpop.f32.mrb[109].mxu1 }
 0x1f4   : > { %v2463_v58 = vadd.f32 %v1280_v11, %v831_v14  ;;  %v1282_v32 = vpop.f32.mrb[45].mxu0 }
 0x1f5   : > { %v856_v32 = vadd.f32 %v3570_v22, %v3557_v52 }
 0x1f6   : > { %v3653_v19 = vpop.f32.mrb[110].mxu1  ;;  %v3656_v20 = vadd.f32 %v2463_v58, %v3600_v47  ;;  %v846_v47 = vadd.f32 %v3570_v22, %v3553_v45 }
 0x1f7   : > { %v1285_v21 = vpop.f32.mrb[46].mxu0  ;;  %v1552_v35 = vpop.f32.mrb[111].mxu1 }
 0x1f8   : > { %v2466_v36 = vadd.f32 %v1285_v21, %v836_v30  ;;  %v1287_v1 = vpop.f32.mrb[47].mxu0 }
 0x1f9   : > { %v861_v1 = vadd.f32 %v3570_v22, %v3559_v54 }
 0x1fa   : > { %v3660_v25 = vpop.f32.mrb[112].mxu1  ;;  %v3663_v38 = vadd.f32 %v2466_v36, %v3606_v16 }
 0x1fb   : > { %v1290_v40 = vpop.f32.mrb[48].mxu0  ;;  %v3665_v42 = vpop.f32.mrb[113].mxu1 }
 0x1fc   : > { %v2469_v24 = vadd.f32 %v1290_v40, %v841_v50  ;;  %v1292_v37 = vpop.f32.mrb[49].mxu0 }
 0x1fe   : > { %v3669_v28 = vpop.f32.mrb[114].mxu1  ;;  %v3672_v60 = vadd.f32 %v2469_v24, %v3612_v31 }
 0x1ff   : > { %v1295_v62 = vpop.f32.mrb[50].mxu0  ;;  %v3674_v41 = vpop.f32.mrb[115].mxu1 }
 0x200   : > { %v2472_v51 = vadd.f32 %v1295_v62, %v846_v47  ;;  %v1297_v16 = vpop.f32.mrb[51].mxu0  ;;  %v866_v62 = vadd.f32 %v3570_v22, %v3561_v55  ;;  %v871_v55 = vadd.f32 %v3570_v22, %v3563_v2  ;;  %v876_v2 = vadd.f32 %v3570_v22, %v3565_v63 }
 0x201   : > { %v721_v63 = vadd.f32 %v3570_v22, %v3433_v39  ;;  %v726_v39 = vadd.f32 %v3570_v22, %v3439_v46  ;;  %v731_v46 = vadd.f32 %v3570_v22, %v3445_v44 }
 0x202   : > { %v3678_v14 = vpop.f32.mrb[116].mxu1  ;;  %v3681_v11 = vadd.f32 %v2472_v51, %v3618_v53 }
 0x203   : > { %v1300_v45 = vpop.f32.mrb[52].mxu0  ;;  %v3683_v29 = vpop.f32.mrb[117].mxu1 }
 0x204   : > { %v2475_v58 = vadd.f32 %v1300_v45, %v851_v13  ;;  %v1302_v31 = vpop.f32.mrb[53].mxu0 }
 0x206   : > { %v3687_v30 = vpop.f32.mrb[118].mxu1  ;;  %v3690_v21 = vadd.f32 %v2475_v58, %v3624_v6 }
 0x207   : > { %v1305_v35 = vpop.f32.mrb[54].mxu0  ;;  %v3692_v48 = vpop.f32.mrb[119].mxu1 }
 0x208   : > { %v2478_v36 = vadd.f32 %v1305_v35, %v856_v32  ;;  %v1307_v53 = vpop.f32.mrb[55].mxu0 }
 0x20a   : > { %v2114_v52 = vpop.f32.mrb[120].mxu1  ;;  %v3703_v6 = vadd.f32 %v2478_v36, %v3630_v3 }
 0x20b   : > { %v1310_v50 = vpop.f32.mrb[56].mxu0  ;;  %v3706_v40 = vadd.f32 %v3580_v0, %v2114_v52  ;;  %v1660_v24 = vpop.f32.mrb[121].mxu1 }
 0x20c   : > { %v2481_v37 = vadd.f32 %v1310_v50, %v861_v1  ;;  %v1312_v54 = vpop.f32.mrb[57].mxu0  ;;  %v3709_v47 = vadd.f32 %v3576_v43, %v1660_v24 }
 0x20d   : > { %1788 = vst [vmem:[%s3700_s25 + $0x48] sm:$0xff] %v3706_v40 }
 0x20e   : > { %1787 = vst [vmem:[%s3700_s25 + $0x40] sm:$0xff] %v3709_v47  ;;  %v2117_v3 = vpop.f32.mrb[122].mxu1  ;;  %v3718_v51 = vadd.f32 %v2481_v37, %v3636_v33 }
 0x20f   : > { %v1315_v0 = vpop.f32.mrb[58].mxu0  ;;  %v3721_v16 = vadd.f32 %v3588_v26, %v2117_v3  ;;  %v1670_v13 = vpop.f32.mrb[123].mxu1 }
 0x210   : > { %v2484_v45 = vadd.f32 %v1315_v0, %v866_v62  ;;  %v1317_v43 = vpop.f32.mrb[59].mxu0  ;;  %v3724_v58 = vadd.f32 %v3584_v5, %v1670_v13 }
 0x211   : > { %1790 = vst [vmem:[%s3700_s25 + $0x58] sm:$0xff] %v3721_v16 }
 0x212   : > { %1789 = vst [vmem:[%s3700_s25 + $0x50] sm:$0xff] %v3724_v58  ;;  %v2120_v33 = vpop.f32.mrb[124].mxu1  ;;  %v3733_v31 = vadd.f32 %v2484_v45, %v3642_v56 }
 0x213   : > { %v1320_v26 = vpop.f32.mrb[60].mxu0  ;;  %v3736_v32 = vadd.f32 %v3598_v9, %v2120_v33  ;;  %v1680_v35 = vpop.f32.mrb[125].mxu1 }
 0x214   : > { %v2487_v36 = vadd.f32 %v1320_v26, %v871_v55  ;;  %v1322_v5 = vpop.f32.mrb[61].mxu0  ;;  %v3739_v53 = vadd.f32 %v3592_v23, %v1680_v35 }
 0x215   : > { %1792 = vst [vmem:[%s3700_s25 + $0x68] sm:$0xff] %v3736_v32 }
 0x216   : > { %1791 = vst [vmem:[%s3700_s25 + $0x60] sm:$0xff] %v3739_v53  ;;  %v2123_v56 = vpop.f32.mrb[126].mxu1  ;;  %v3748_v1 = vadd.f32 %v2487_v36, %v3646_v57 }
 0x217   : > { %v1325_v9 = vpop.f32.mrb[62].mxu0  ;;  %v3751_v52 = vadd.f32 %v3610_v61, %v2123_v56  ;;  %v1690_v50 = vpop.f32.mrb[127].mxu1 }
 0x218   : > { %v2490_v24 = vadd.f32 %v1325_v9, %v876_v2  ;;  %v1327_v23 = vpop.f32.mrb[63].mxu0  ;;  %v3754_v37 = vadd.f32 %v3604_v12, %v1690_v50 }
 0x219   : > { %1794 = vst [vmem:[%s3700_s25 + $0x78] sm:$0xff] %v3751_v52 }
 0x21a   : > { %1793 = vst [vmem:[%s3700_s25 + $0x70] sm:$0xff] %v3754_v37  ;;  %v2126_v57 = vpop.f32.mrb[128].mxu1  ;;  %v3763_v61 = vadd.f32 %v2490_v24, %v3653_v19 }
 0x21b   : > { %v1395_v54 = vpop.f32.mrb[0].mxu0  ;;  %v3766_v62 = vadd.f32 %v3622_v10, %v2126_v57  ;;  %v1700_v3 = vpop.f32.mrb[129].mxu1 }
 0x21c   : > { %v2405_v12 = vadd.f32 %v1395_v54, %v721_v63  ;;  %v1397_v0 = vpop.f32.mrb[1].mxu0  ;;  %v3769_v13 = vadd.f32 %v3616_v18, %v1700_v3 }
 0x21d   : > { %1796 = vst [vmem:[%s3700_s25 + $0x88] sm:$0xff] %v3766_v62 }
 0x21e   : > { %v1621_v19 = vadd.f32 %v2405_v12, %v3665_v42  ;;  %1795 = vst [vmem:[%s3700_s25 + $0x80] sm:$0xff] %v3769_v13  ;;  %v2129_v45 = vpop.f32.mrb[130].mxu1 }
 0x21f   : > { %v1400_v10 = vpop.f32.mrb[2].mxu0  ;;  %v3779_v43 = vadd.f32 %v3634_v34, %v2129_v45  ;;  %v1710_v55 = vpop.f32.mrb[131].mxu1 }
 0x220   : > { %1779 = vst [vmem:[%s3700_s25] sm:$0xff] %v1621_v19  ;;  %v2407_v18 = vadd.f32 %v1400_v10, %v726_v39  ;;  %v1402_v33 = vpop.f32.mrb[3].mxu0  ;;  %v3783_v26 = vadd.f32 %v3628_v27, %v1710_v55  ;;  %v1848_v35 = vmul.f32 %v1621_v19, %v1621_v19 }
 0x221   : > { %1798 = vst [vmem:[%s3700_s25 + $0x98] sm:$0xff] %v3779_v43 }
 0x222   : > { %v1626_v42 = vadd.f32 %v2407_v18, %v3660_v25  ;;  %1797 = vst [vmem:[%s3700_s25 + $0x90] sm:$0xff] %v3783_v26  ;;  %v2132_v34 = vpop.f32.mrb[132].mxu1  ;;  %v736_v25 = vadd.f32 %v3570_v22, %v3451_v59 }
 0x223   : > { %v1405_v36 = vpop.f32.mrb[4].mxu0  ;;  %v3793_v5 = vadd.f32 %v3649_v8, %v2132_v34  ;;  %v1720_v2 = vpop.f32.mrb[133].mxu1 }
 0x224   : > { %1780 = vst [vmem:[%s3700_s25 + $0x8] sm:$0xff] %v1626_v42  ;;  %v1811_v27 = vadd.f32 %v1626_v42, %v1621_v19  ;;  %v1849_v56 = vmul.f32 %v1626_v42, %v1626_v42  ;;  %v2409_v9 = vadd.f32 %v1405_v36, %v731_v46  ;;  %v1407_v50 = vpop.f32.mrb[5].mxu0  ;;  %v3797_v44 = vadd.f32 %v3640_v4, %v1720_v2 }
 0x225   : > { %1800 = vst [vmem:[%s3700_s25 + $0xa8] sm:$0xff] %v3793_v5 }
 0x226   : > { %v1880_v24 = vadd.f32 %v1849_v56, %v1848_v35  ;;  %v1631_v8 = vadd.f32 %v2409_v9, %v3674_v41  ;;  %1799 = vst [vmem:[%s3700_s25 + $0xa0] sm:$0xff] %v3797_v44  ;;  %v2135_v23 = vpop.f32.mrb[134].mxu1  ;;  %v741_v41 = vadd.f32 %v3570_v22, %v3457_v15 }
 0x227   : > { %v1410_v63 = vpop.f32.mrb[6].mxu0  ;;  %v3807_v57 = vadd.f32 %v3663_v38, %v2135_v23  ;;  %v1730_v54 = vpop.f32.mrb[135].mxu1 }
 0x228   : > { %1781 = vst [vmem:[%s3700_s25 + $0x10] sm:$0xff] %v1631_v8  ;;  %v1812_v4 = vadd.f32 %v1811_v27, %v1631_v8  ;;  %v1850_v3 = vmul.f32 %v1631_v8, %v1631_v8  ;;  %v2411_v12 = vadd.f32 %v1410_v63, %v736_v25  ;;  %v1412_v0 = vpop.f32.mrb[7].mxu0  ;;  %v3811_v59 = vadd.f32 %v3656_v20, %v1730_v54 }
 0x229   : > { %1802 = vst [vmem:[%s3700_s25 + $0xb8] sm:$0xff] %v3807_v57 }
 0x22a   : > { %v1881_v39 = vadd.f32 %v1880_v24, %v1850_v3  ;;  %v1636_v38 = vadd.f32 %v2411_v12, %v3669_v28  ;;  %1801 = vst [vmem:[%s3700_s25 + $0xb0] sm:$0xff] %v3811_v59  ;;  %v2138_v19 = vpop.f32.mrb[136].mxu1  ;;  %v746_v28 = vadd.f32 %v3570_v22, %v3463_v7 }
 0x22b   : > { %v1415_v45 = vpop.f32.mrb[8].mxu0  ;;  %v3821_v10 = vadd.f32 %v3681_v11, %v2138_v19  ;;  %v1740_v55 = vpop.f32.mrb[137].mxu1 }
 0x22c   : > { %1782 = vst [vmem:[%s3700_s25 + $0x18] sm:$0xff] %v1636_v38  ;;  %v1813_v20 = vadd.f32 %v1812_v4, %v1636_v38  ;;  %v1851_v18 = vmul.f32 %v1636_v38, %v1636_v38  ;;  %v2413_v33 = vadd.f32 %v1415_v45, %v741_v41  ;;  %v1417_v46 = vpop.f32.mrb[9].mxu0  ;;  %v3825_v15 = vadd.f32 %v3672_v60, %v1740_v55 }
 0x22d   : > { %1804 = vst [vmem:[%s3700_s25 + $0xc8] sm:$0xff] %v3821_v10 }
 0x22e   : > { %v1882_v42 = vadd.f32 %v1881_v39, %v1851_v18  ;;  %v1641_v11 = vadd.f32 %v2413_v33, %v3683_v29  ;;  %1803 = vst [vmem:[%s3700_s25 + $0xc0] sm:$0xff] %v3825_v15  ;;  %v2141_v34 = vpop.f32.mrb[138].mxu1  ;;  %v751_v29 = vadd.f32 %v3570_v22, %v3469_v49 }
 0x22f   : > { %v1420_v35 = vpop.f32.mrb[10].mxu0  ;;  %v3835_v36 = vadd.f32 %v3703_v6, %v2141_v34  ;;  %v1750_v2 = vpop.f32.mrb[139].mxu1  ;;  %v1859_v34 = vmul.f32 %v3721_v16, %v3721_v16 }
 0x230   : > { %1783 = vst [vmem:[%s3700_s25 + $0x20] sm:$0xff] %v1641_v11  ;;  %v1814_v60 = vadd.f32 %v1813_v20, %v1641_v11  ;;  %v1852_v27 = vmul.f32 %v1641_v11, %v1641_v11  ;;  %v2415_v56 = vadd.f32 %v1420_v35, %v746_v28  ;;  %v1422_v9 = vpop.f32.mrb[11].mxu0  ;;  %v3839_v7 = vadd.f32 %v3690_v21, %v1750_v2 }
 0x231   : > { %1806 = vst [vmem:[%s3700_s25 + $0xd8] sm:$0xff] %v3835_v36  ;;  %v1856_v20 = vmul.f32 %v3709_v47, %v3709_v47 }
 0x232   : > { %v1883_v50 = vadd.f32 %v1882_v42, %v1852_v27  ;;  %v1646_v6 = vadd.f32 %v2415_v56, %v3678_v14  ;;  %1805 = vst [vmem:[%s3700_s25 + $0xd0] sm:$0xff] %v3839_v7  ;;  %v2144_v25 = vpop.f32.mrb[140].mxu1  ;;  %v756_v14 = vadd.f32 %v3570_v22, %v3475_v17 }
 0x233   : > { %v1425_v24 = vpop.f32.mrb[12].mxu0  ;;  %v3849_v8 = vadd.f32 %v3733_v31, %v2144_v25  ;;  %v1760_v23 = vpop.f32.mrb[141].mxu1 }
 0x234   : > { %1784 = vst [vmem:[%s3700_s25 + $0x28] sm:$0xff] %v1646_v6  ;;  %v1815_v21 = vadd.f32 %v1814_v60, %v1646_v6  ;;  %v1853_v63 = vmul.f32 %v1646_v6, %v1646_v6  ;;  %v2417_v54 = vadd.f32 %v1425_v24, %v751_v29  ;;  %v1427_v4 = vpop.f32.mrb[13].mxu0  ;;  %v3853_v49 = vadd.f32 %v3718_v51, %v1760_v23 }
 0x235   : > { %1808 = vst [vmem:[%s3700_s25 + $0xe8] sm:$0xff] %v3849_v8 }
 0x236   : > { %v1884_v3 = vadd.f32 %v1883_v50, %v1853_v63  ;;  %v1651_v31 = vadd.f32 %v2417_v54, %v3692_v48  ;;  %1807 = vst [vmem:[%s3700_s25 + $0xe0] sm:$0xff] %v3853_v49  ;;  %v2147_v12 = vpop.f32.mrb[142].mxu1 }
 0x237   : > { %v1430_v0 = vpop.f32.mrb[14].mxu0  ;;  %v3863_v41 = vadd.f32 %v3763_v61, %v2147_v12  ;;  %v1770_v51 = vpop.f32.mrb[143].mxu1 }
 0x238   : > { %1785 = vst [vmem:[%s3700_s25 + $0x30] sm:$0xff] %v1651_v31  ;;  %v1816_v39 = vadd.f32 %v1815_v21, %v1651_v31  ;;  %v1854_v38 = vmul.f32 %v1651_v31, %v1651_v31  ;;  %v2419_v19 = vadd.f32 %v1430_v0, %v756_v14  ;;  %v1432_v45 = vpop.f32.mrb[15].mxu0  ;;  %v3867_v17 = vadd.f32 %v3748_v1, %v1770_v51 }
 0x239   : > { %1810 = vst [vmem:[%s3700_s25 + $0xf8] sm:$0xff] %v3863_v41  ;;  %v1857_v1 = vmul.f32 %v3706_v40, %v3706_v40 }
 0x23a   : > { %v1885_v22 = vadd.f32 %v1884_v3, %v1854_v38  ;;  %v1656_v48 = vadd.f32 %v2419_v19, %v3687_v30  ;;  %1809 = vst [vmem:[%s3700_s25 + $0xf0] sm:$0xff] %v3867_v17  ;;  %v1858_v30 = vmul.f32 %v3724_v58, %v3724_v58 }
 0x23c   : > { %1786 = vst [vmem:[%s3700_s25 + $0x38] sm:$0xff] %v1656_v48  ;;  %v1817_v55 = vadd.f32 %v1816_v39, %v1656_v48  ;;  %v1855_v61 = vmul.f32 %v1656_v48, %v1656_v48 }
 0x23e   : > { %v1818_v18 = vadd.f32 %v1817_v55, %v3709_v47  ;;  %v1886_v33 = vadd.f32 %v1885_v22, %v1855_v61  ;;  %v1860_v47 = vmul.f32 %v3739_v53, %v3739_v53 }
 0x240   : > { %v1819_v46 = vadd.f32 %v1818_v18, %v3706_v40  ;;  %v1887_v28 = vadd.f32 %v1886_v33, %v1856_v20  ;;  %v1861_v40 = vmul.f32 %v3736_v32, %v3736_v32 }
 0x242   : > { %v1820_v42 = vadd.f32 %v1819_v46, %v3724_v58  ;;  %v1888_v11 = vadd.f32 %v1887_v28, %v1857_v1  ;;  %v1862_v58 = vmul.f32 %v3754_v37, %v3754_v37  ;;  %v1876_v1 = vmul.f32 %v3853_v49, %v3853_v49 }
 0x243   : > { %v1877_v28 = vmul.f32 %v3849_v8, %v3849_v8 }
 0x244   : > { %v1821_v35 = vadd.f32 %v1820_v42, %v3721_v16  ;;  %v1889_v2 = vadd.f32 %v1888_v11, %v1858_v30  ;;  %v1863_v16 = vmul.f32 %v3751_v52, %v3751_v52 }
 0x246   : > { %v1822_v60 = vadd.f32 %v1821_v35, %v3739_v53  ;;  %v1890_v27 = vadd.f32 %v1889_v2, %v1859_v34  ;;  %v1864_v53 = vmul.f32 %v3769_v13, %v3769_v13  ;;  %v1879_v34 = vmul.f32 %v3863_v41, %v3863_v41 }
 0x248   : > { %v1823_v56 = vadd.f32 %v1822_v60, %v3736_v32  ;;  %v1891_v9 = vadd.f32 %v1890_v27, %v1860_v47  ;;  %v1865_v32 = vmul.f32 %v3766_v62, %v3766_v62 }
 0x24a   : > { %v1824_v29 = vadd.f32 %v1823_v56, %v3754_v37  ;;  %v1892_v50 = vadd.f32 %v1891_v9, %v1861_v40  ;;  %v1866_v37 = vmul.f32 %v3783_v26, %v3783_v26 }
 0x24c   : > { %v1825_v6 = vadd.f32 %v1824_v29, %v3751_v52  ;;  %v1893_v25 = vadd.f32 %v1892_v50, %v1862_v58  ;;  %v1867_v52 = vmul.f32 %v3779_v43, %v3779_v43 }
 0x24e   : > { %v1826_v24 = vadd.f32 %v1825_v6, %v3769_v13  ;;  %v1894_v23 = vadd.f32 %v1893_v25, %v1863_v16  ;;  %v1868_v13 = vmul.f32 %v3797_v44, %v3797_v44 }
 0x250   : > { %v1827_v21 = vadd.f32 %v1826_v24, %v3766_v62  ;;  %v1895_v63 = vadd.f32 %v1894_v23, %v1864_v53  ;;  %v1869_v62 = vmul.f32 %v3793_v5, %v3793_v5 }
 0x252   : > { %v1896_v54 = vadd.f32 %v1895_v63, %v1865_v32  ;;  %v1828_v4 = vadd.f32 %v1827_v21, %v3783_v26  ;;  %v1870_v26 = vmul.f32 %v3811_v59, %v3811_v59 }
 0x254   : > { %v1829_v14 = vadd.f32 %v1828_v4, %v3779_v43  ;;  %v1897_v3 = vadd.f32 %v1896_v54, %v1866_v37  ;;  %v1871_v43 = vmul.f32 %v3807_v57, %v3807_v57 }
 0x256   : > { %v1830_v31 = vadd.f32 %v1829_v14, %v3797_v44  ;;  %v1898_v12 = vadd.f32 %v1897_v3, %v1867_v52  ;;  %v1872_v44 = vmul.f32 %v3825_v15, %v3825_v15 }
 0x258   : > { %v1831_v0 = vadd.f32 %v1830_v31, %v3793_v5  ;;  %v1899_v51 = vadd.f32 %v1898_v12, %v1868_v13  ;;  %v1873_v5 = vmul.f32 %v3821_v10, %v3821_v10 }
 0x25a   : > { %v1832_v39 = vadd.f32 %v1831_v0, %v3811_v59  ;;  %v1900_v38 = vadd.f32 %v1899_v51, %v1869_v62  ;;  %v1874_v59 = vmul.f32 %v3839_v7, %v3839_v7 }
 0x25c   : > { %v1833_v19 = vadd.f32 %v1832_v39, %v3807_v57  ;;  %v1901_v45 = vadd.f32 %v1900_v38, %v1870_v26  ;;  %v1875_v57 = vmul.f32 %v3835_v36, %v3835_v36 }
 0x25e   : > { %v1834_v22 = vadd.f32 %v1833_v19, %v3825_v15  ;;  %v1902_v48 = vadd.f32 %v1901_v45, %v1871_v43 }
 0x260   : > { %v1835_v55 = vadd.f32 %v1834_v22, %v3821_v10  ;;  %v1903_v61 = vadd.f32 %v1902_v48, %v1872_v44 }
 0x262   : > { %v1836_v20 = vadd.f32 %v1835_v55, %v3839_v7  ;;  %v1904_v18 = vadd.f32 %v1903_v61, %v1873_v5 }
 0x264   : > { %v1837_v33 = vadd.f32 %v1836_v20, %v3835_v36  ;;  %v1905_v15 = vadd.f32 %v1904_v18, %v1874_v59  ;;  %v1878_v36 = vmul.f32 %v3867_v17, %v3867_v17 }
 0x266   : > { %v1838_v46 = vadd.f32 %v1837_v33, %v3853_v49  ;;  %v1906_v10 = vadd.f32 %v1905_v15, %v1875_v57 }
 0x268   : > { %v1839_v7 = vadd.f32 %v1838_v46, %v3849_v8  ;;  %v1907_v30 = vadd.f32 %v1906_v10, %v1876_v1 }
 0x26a   : > { %v1840_v42 = vadd.f32 %v1839_v7, %v3867_v17  ;;  %v1908_v11 = vadd.f32 %v1907_v30, %v1877_v28 }
 0x26c   : > { %v1841_v35 = vadd.f32 %v1840_v42, %v3863_v41  ;;  %v1909_v49 = vadd.f32 %v1908_v11, %v1878_v36 }
 0x26e   : > { %v1842_v2 = vrot.slane %v1841_v35, 4  ;;  %v1910_v47 = vadd.f32 %v1909_v49, %v1879_v34 }
 0x270   : > { %v1843_v60 = vadd.f32 %v1842_v2, %v1841_v35  ;;  %v1911_v27 = vrot.slane %v1910_v47, 4 }
 0x272   : > { %v1844_v40 = vrot.slane %v1843_v60, 2  ;;  %v1912_v8 = vadd.f32 %v1911_v27, %v1910_v47 }
 0x274   : > { %v1845_v56 = vadd.f32 %v1844_v40, %v1843_v60  ;;  %v1913_v9 = vrot.slane %v1912_v8, 2 }
 0x276   : > { %v1846_v58 = vrot.slane %v1845_v56, 1  ;;  %v1914_v29 = vadd.f32 %v1913_v9, %v1912_v8 }
 0x278   : > { %v1915_v17 = vrot.slane %v1914_v29, 1  ;;  %v1847_v41 = vadd.f32 %v1846_v58, %v1845_v56 }
 0x27a   : > { %v1916_v50 = vadd.f32 %v1915_v17, %v1914_v29 }
 0x27c   : > { %v1918_v16 = vsel %vm1917_vm0, %v1847_v41, %v1916_v50 }
 0x27d   : > { %1919 = vst [vmem:[%s214_s28] sm:$0x3] %v1918_v16 }
 0x27e PF: > { %s15_s15 = sadd.s32 1, %s2588_s15  }
 0x27f   : > { %p12_p5 = scmp.ge.s32.totalorder %s15_s15, 4  }
 0x281   :  { %14 = sbr.rel (!%p12_p5) target bundleno = 1 (0x1), region = 74 }

</bundles_post_ra>
